<compile_context>
chip_gen: v6e
topology: v6e:2x2x1
jax: 0.10.0
libtpu: 0.0.40
codegen_flags: <defaults>
</compile_context>

<pallas_src>
import functools

import numpy as np
import jax
import jax.numpy as jnp
from jax.experimental import pallas as pl
from jax.experimental.pallas import tpu as pltpu

LANES = 128   # lane padding for the final output row / fc bias
COUT = 40     # conv1/conv2 out channels (module constant)
NOUT = 10     # fc out features (module constant)


def _geometry(H, W):
    """Static geometry for the fused kernel (all Python ints)."""
    H1, W1 = H - 2, W - 2            # conv1 output (26, 26)
    Hp1, Wp1 = H1 // 2, W1 // 2      # pool1 output (13, 13)
    H2, W2 = Hp1 - 2, Wp1 - 2        # conv2 output (11, 11)
    Hp2, Wp2 = H2 // 2, W2 // 2      # pool2 output (5, 5)
    M1 = (H1 - 1) * W + W1           # conv1 accumulator cols (input-row indexing)
    R1 = M1 - (W + 1)                # pool1 shift-max cols
    M2 = (H2 - 1) * Wp1 + W2         # conv2 accumulator cols
    R2 = M2 - (Wp1 + 1)              # pool2 shift-max cols
    return H1, W1, Hp1, Wp1, H2, W2, Hp2, Wp2, M1, R1, M2, R2


# ----------------------------------------------------------------------------
# Fused Pallas kernel: whole forward for one image; channels on sublanes,
# flattened spatial on lanes; everything in VMEM.
# ----------------------------------------------------------------------------
def _quantnet_kernel(x_ref, w1_ref, b1_ref, s1_ref,
                     w2_ref, b2_ref, s2_ref,
                     bmat_ref, mz_ref, g_ref, bfc_ref,
                     out_ref, acc1_ref, p1_ref, acc2_ref, p2_ref,
                     *, H, W):
    (H1, W1, Hp1, Wp1, H2, W2, Hp2, Wp2, M1, R1, M2, R2) = _geometry(H, W)

    # -------- conv1: 9 tap matmuls, (40,Cin) @ (Cin, M1) ---------------------
    for t in range(9):
        ky, kx = divmod(t, 3)
        rhs = x_ref[:, pl.ds(ky * W + kx, M1)]                       # (Cin, M1)
        term = jnp.dot(w1_ref[t], rhs, preferred_element_type=jnp.float32)
        if t == 0:
            acc1_ref[...] = term
        else:
            acc1_ref[...] += term

    # -------- pool1 (2x2/2, floor): lane-shift max + 0/1 compaction matmul ---
    m1 = jnp.maximum(
        jnp.maximum(acc1_ref[:, pl.ds(0, R1)], acc1_ref[:, pl.ds(1, R1)]),
        jnp.maximum(acc1_ref[:, pl.ds(W, R1)], acc1_ref[:, pl.ds(W + 1, R1)]))
    pooled1 = jnp.dot(m1, s1_ref[...], preferred_element_type=jnp.float32)
    p1_ref[...] = jnp.maximum(pooled1 + b1_ref[...], 0.0)            # (40, 169)

    # -------- conv2: (40,40) @ (40, M2) per tap -------------------------------
    for t in range(9):
        ky, kx = divmod(t, 3)
        rhs = p1_ref[:, pl.ds(ky * Wp1 + kx, M2)]                    # (40, M2)
        term = jnp.dot(w2_ref[t], rhs, preferred_element_type=jnp.float32)
        if t == 0:
            acc2_ref[...] = term
        else:
            acc2_ref[...] += term

    # -------- pool2 -----------------------------------------------------------
    m2 = jnp.maximum(
        jnp.maximum(acc2_ref[:, pl.ds(0, R2)], acc2_ref[:, pl.ds(1, R2)]),
        jnp.maximum(acc2_ref[:, pl.ds(Wp1, R2)], acc2_ref[:, pl.ds(Wp1 + 1, R2)]))
    pooled2 = jnp.dot(m2, s2_ref[...], preferred_element_type=jnp.float32)
    p2_ref[...] = jnp.maximum(pooled2 + b2_ref[...], 0.0)            # (40, 25)

    # -------- fc: contraction over (channel, spatial) without any relayout ----
    #   z[c, n*40+c'] = sum_r p2[c, r] * Wfc[n, c'*25 + r]
    #   out[n]        = sum_c z[c, n*40+c]   (block-diag mask + sublane reduce
    #                                          + 0/1 compaction matmul)
    z = jnp.dot(p2_ref[...], bmat_ref[...], preferred_element_type=jnp.float32)
    cs = jnp.sum(z * mz_ref[...], axis=0, keepdims=True)             # (1, 400)
    out_ref[...] = (jnp.dot(cs, g_ref[...], preferred_element_type=jnp.float32)
                    + bfc_ref[...])                                  # (1, 128)


# ----------------------------------------------------------------------------
# Forward wrapper: one pallas_call, batch on a "parallel" grid axis.
# ----------------------------------------------------------------------------
def quantnet_forward(x_nchw, packed):
    B, Cin, H, W = x_nchw.shape
    (H1, W1, Hp1, Wp1, H2, W2, Hp2, Wp2, M1, R1, M2, R2) = _geometry(H, W)
    assert (Hp2, Wp2) == (5, 5), "QuantNet fc expects a 28x28 spatial input"

    # NCHW flattened to (B, C, H*W) is exactly the kernel layout: no transpose.
    x_cm = x_nchw.reshape(B, Cin, H * W)

    kernel = functools.partial(_quantnet_kernel, H=H, W=W)
    const2 = lambda b: (0, 0)
    const3 = lambda b: (0, 0, 0)

    out = pl.pallas_call(
        kernel,
        out_shape=jax.ShapeDtypeStruct((B, 1, LANES), jnp.float32),
        grid=(B,),
        in_specs=[
            pl.BlockSpec((None, Cin, H * W), lambda b: (b, 0, 0)),   # image (C, HW)
            pl.BlockSpec((9, COUT, Cin), const3),                    # conv1 taps
            pl.BlockSpec((COUT, 1), const2),                         # bias1 (per-sublane)
            pl.BlockSpec((R1, Hp1 * Wp1), const2),                   # pool1 selector
            pl.BlockSpec((9, COUT, COUT), const3),                   # conv2 taps
            pl.BlockSpec((COUT, 1), const2),                         # bias2
            pl.BlockSpec((R2, Hp2 * Wp2), const2),                   # pool2 selector
            pl.BlockSpec((Hp2 * Wp2, NOUT * COUT), const2),          # fc block weights
            pl.BlockSpec((COUT, NOUT * COUT), const2),               # fc block-diag mask
            pl.BlockSpec((NOUT * COUT, LANES), const2),              # fc output compaction
            pl.BlockSpec((1, LANES), const2),                        # fc bias
        ],
        out_specs=pl.BlockSpec((None, 1, LANES), lambda b: (b, 0, 0)),
        scratch_shapes=[
            pltpu.VMEM((COUT, M1), jnp.float32),           # conv1 pre-pool acc
            pltpu.VMEM((COUT, Hp1 * Wp1), jnp.float32),    # pool1 out (conv2 in)
            pltpu.VMEM((COUT, M2), jnp.float32),           # conv2 pre-pool acc
            pltpu.VMEM((COUT, Hp2 * Wp2), jnp.float32),    # pool2 out (fc in)
        ],
        compiler_params=pltpu.CompilerParams(
            dimension_semantics=("parallel",)),            # v7x: batch over both TCs
    )(x_cm, packed["w1"], packed["b1"], packed["s1"],
      packed["w2"], packed["b2"], packed["s2"],
      packed["bmat"], packed["mz"], packed["g"], packed["bfc"])

    return out.reshape(B, LANES)[:, :NOUT]


# ----------------------------------------------------------------------------
# One-time parameter repacking (hoisted out of the traced forward).
# ----------------------------------------------------------------------------
def _pool_select_matrix(h_conv, w_conv, row_stride, n_rows):
    """S[r, p] = 1 where r = (2*po)*row_stride + 2*qo is the top-left pooling
    tap of pooled position p = po*(w_conv//2) + qo (floor-mode 2x2/2 pooling)."""
    hp, wp = h_conv // 2, w_conv // 2
    sel = np.zeros((n_rows, hp * wp), np.float32)
    for po in range(hp):
        for qo in range(wp):
            sel[(2 * po) * row_stride + 2 * qo, po * wp + qo] = 1.0
    return jnp.asarray(sel)


def prepare_params(params, H=28, W=28):
    """Repack PyTorch-layout weights for the fused kernel:
       * conv weights -> (9, Cout, Cin) taps (channels-on-sublanes layout),
       * biases -> (Cout, 1) sublane vectors,
       * fc weights -> a (25, 400) block matrix + block-diag mask + (400, 128)
         output-compaction matrix (double contraction as 2 matmuls + 1 mask),
       * 0/1 pool-compaction selectors.
    Runs once, outside jit."""
    w1, b1 = params["w1"], params["b1"]      # (40, Cin, 3, 3), (40,)
    w2, b2 = params["w2"], params["b2"]      # (40, 40, 3, 3),  (40,)
    wfc, bfc = params["wfc"], params["bfc"]  # (10, 1000), (10,)

    def pack_conv(w):
        # (Cout, Cin, 3, 3) -> (9, Cout, Cin), tap index t = ky*3 + kx
        return jnp.transpose(w, (2, 3, 0, 1)).reshape(9, w.shape[0], w.shape[1])

    (H1, W1, Hp1, Wp1, H2, W2, Hp2, Wp2, M1, R1, M2, R2) = _geometry(H, W)
    P2 = Hp2 * Wp2                                                    # 25

    # PyTorch flattens (c, h, w): feature f = c*25 + r with r = h*5 + w.
    # bmat[r, n*40 + c] = Wfc[n, c*25 + r]
    wfc3 = wfc.reshape(NOUT, COUT, P2)
    bmat = jnp.transpose(wfc3, (2, 0, 1)).reshape(P2, NOUT * COUT)
    # Block-diagonal mask: mz[c, n*40 + c'] = [c == c']
    mz = np.tile(np.eye(COUT, dtype=np.float32), (1, NOUT))
    # Output compaction: g[n*40 + c, n] = 1  (lane-dense (1,128) result)
    g = np.zeros((NOUT * COUT, LANES), np.float32)
    g[np.arange(NOUT * COUT), np.arange(NOUT * COUT) // COUT] = 1.0

    return {
        "w1": pack_conv(w1).astype(jnp.float32),
        "b1": b1.astype(jnp.float32).reshape(COUT, 1),
        "s1": _pool_select_matrix(H1, W1, W, R1),
        "w2": pack_conv(w2).astype(jnp.float32),
        "b2": b2.astype(jnp.float32).reshape(COUT, 1),
        "s2": _pool_select_matrix(H2, W2, Wp1, R2),
        "bmat": bmat.astype(jnp.float32),
        "mz": jnp.asarray(mz),
        "g": jnp.asarray(g),
        "bfc": jnp.pad(bfc.astype(jnp.float32), (0, LANES - NOUT)).reshape(1, LANES),
    }


# ----------------------------------------------------------------------------
# Plain-XLA reference (for a sanity check) and deterministic init.
# ----------------------------------------------------------------------------
def reference_forward(x, params):
    def conv(z, w, b):
        y = jax.lax.conv_general_dilated(
            z, w, window_strides=(1, 1), padding="VALID",
            dimension_numbers=("NCHW", "OIHW", "NCHW"))
        return y + b[None, :, None, None]

    def relu_pool(y):
        y = jnp.maximum(y, 0.0)
        B, C, Hh, Ww = y.shape
        Ho, Wo = Hh // 2, Ww // 2
        return jnp.max(y[:, :, :2 * Ho, :2 * Wo].reshape(B, C, Ho, 2, Wo, 2),
                       axis=(3, 5))

    y = relu_pool(conv(x, params["w1"], params["b1"]))
    y = relu_pool(conv(y, params["w2"], params["b2"]))
    y = y.reshape(y.shape[0], -1)                       # (B, 40*5*5), CHW order
    return y @ params["wfc"].T + params["bfc"]


def init_params(key, in_channels):
    ks = jax.random.split(key, 6)

    def u(k, shape, fan_in):
        bound = 1.0 / float(fan_in) ** 0.5
        return jax.random.uniform(k, shape, jnp.float32, -bound, bound)

    return {
        "w1": u(ks[0], (COUT, in_channels, 3, 3), in_channels * 9),
        "b1": u(ks[1], (COUT,), in_channels * 9),
        "w2": u(ks[2], (COUT, COUT, 3, 3), COUT * 9),
        "b2": u(ks[3], (COUT,), COUT * 9),
        "wfc": u(ks[4], (NOUT, COUT * 5 * 5), COUT * 5 * 5),
        "bfc": u(ks[5], (NOUT,), COUT * 5 * 5),
    }


if __name__ == "__main__":
    key = jax.random.PRNGKey(0)
    kx, kp = jax.random.split(key)
    in_channels = 3
    # 28x28 input: conv(26) -> pool(13) -> conv(11) -> pool(5) => 40*5*5 fc features
    x = jax.random.normal(kx, (2, in_channels, 28, 28), dtype=jnp.float32)
    params = init_params(kp, in_channels)
    packed = prepare_params(params)       # one-time weight repacking (not traced)

    fwd = jax.jit(quantnet_forward)
    out = jax.block_until_ready(fwd(x, packed))
    assert out.shape == (2, 10), out.shape
    assert out.dtype == jnp.float32

    ref = jax.block_until_ready(reference_forward(x, params))
    np.testing.assert_allclose(np.asarray(out), np.asarray(ref),
                               rtol=5e-2, atol=5e-2)
    print("KERNEL_OK")
</pallas_src>

<mosaic_0001>
module attributes {stable_mosaic.version = 11 : i64} {
  func.func @_quantnet_kernel(%arg0: i32, %arg1: memref<1x3x784xf32, #tpu.memory_space<vmem>>, %arg2: memref<9x40x3xf32, #tpu.memory_space<vmem>>, %arg3: memref<40x1xf32, #tpu.memory_space<vmem>>, %arg4: memref<697x169xf32, #tpu.memory_space<vmem>>, %arg5: memref<9x40x40xf32, #tpu.memory_space<vmem>>, %arg6: memref<40x1xf32, #tpu.memory_space<vmem>>, %arg7: memref<127x25xf32, #tpu.memory_space<vmem>>, %arg8: memref<25x400xf32, #tpu.memory_space<vmem>>, %arg9: memref<40x400xf32, #tpu.memory_space<vmem>>, %arg10: memref<400x128xf32, #tpu.memory_space<vmem>>, %arg11: memref<1x128xf32, #tpu.memory_space<vmem>>, %arg12: memref<1x1x128xf32, #tpu.memory_space<vmem>>, %arg13: memref<40x726xf32, #tpu.memory_space<vmem>>, %arg14: memref<40x169xf32, #tpu.memory_space<vmem>>, %arg15: memref<40x141xf32, #tpu.memory_space<vmem>>, %arg16: memref<40x25xf32, #tpu.memory_space<vmem>>) attributes {dimension_semantics = [#tpu.dimension_semantics<parallel>], iteration_bounds = array<i64: 2>, scalar_prefetch = 0 : i64, scratch_operands = 4 : i64, tpu.core_type = #tpu.core_type<tc>, window_params = [{transform_indices = @transform_0, window_bounds = array<i64: 1, 3, 784>}, {pipeline_mode = #tpu.pipeline_mode<synchronous>, transform_indices = @transform_1, window_bounds = array<i64: 9, 40, 3>}, {pipeline_mode = #tpu.pipeline_mode<synchronous>, transform_indices = @transform_2, window_bounds = array<i64: 40, 1>}, {pipeline_mode = #tpu.pipeline_mode<synchronous>, transform_indices = @transform_3, window_bounds = array<i64: 697, 169>}, {pipeline_mode = #tpu.pipeline_mode<synchronous>, transform_indices = @transform_4, window_bounds = array<i64: 9, 40, 40>}, {pipeline_mode = #tpu.pipeline_mode<synchronous>, transform_indices = @transform_5, window_bounds = array<i64: 40, 1>}, {pipeline_mode = #tpu.pipeline_mode<synchronous>, transform_indices = @transform_6, window_bounds = array<i64: 127, 25>}, {pipeline_mode = #tpu.pipeline_mode<synchronous>, transform_indices = @transform_7, window_bounds = array<i64: 25, 400>}, {pipeline_mode = #tpu.pipeline_mode<synchronous>, transform_indices = @transform_8, window_bounds = array<i64: 40, 400>}, {pipeline_mode = #tpu.pipeline_mode<synchronous>, transform_indices = @transform_9, window_bounds = array<i64: 400, 128>}, {pipeline_mode = #tpu.pipeline_mode<synchronous>, transform_indices = @transform_10, window_bounds = array<i64: 1, 128>}, {transform_indices = @transform_11, window_bounds = array<i64: 1, 1, 128>}]} {
    %c0 = arith.constant 0 : index
    %c0_0 = arith.constant 0 : index
    %c0_1 = arith.constant 0 : index
    %0 = vector.load %arg1[%c0, %c0_0, %c0_1] : memref<1x3x784xf32, #tpu.memory_space<vmem>>, vector<1x3x726xf32>
    %1 = vector.shape_cast %0 : vector<1x3x726xf32> to vector<3x726xf32>
    %c0_2 = arith.constant 0 : index
    %c0_3 = arith.constant 0 : index
    %c0_4 = arith.constant 0 : index
    %2 = vector.load %arg2[%c0_2, %c0_3, %c0_4] : memref<9x40x3xf32, #tpu.memory_space<vmem>>, vector<1x40x3xf32>
    %3 = vector.shape_cast %2 : vector<1x40x3xf32> to vector<40x3xf32>
    %cst = arith.constant dense<0.000000e+00> : vector<40x726xf32>
    %4 = tpu.matmul %3, %1, %cst {dimension_numbers = #tpu.dot_dimension_numbers<[1], [0], [0], [1], [0, 0, 1, 1], [], []>} : vector<40x3xf32>, vector<3x726xf32>, vector<40x726xf32> -> vector<40x726xf32>
    %c0_5 = arith.constant 0 : index
    %c0_6 = arith.constant 0 : index
    %5 = vector.load %arg13[%c0_5, %c0_6] : memref<40x726xf32, #tpu.memory_space<vmem>>, vector<40x726xf32>
    tpu.vector_store %arg13[%c0_5, %c0_6], %4 {strides = array<i32>} : memref<40x726xf32, #tpu.memory_space<vmem>>, vector<40x726xf32>,
    %c0_7 = arith.constant 0 : index
    %c0_8 = arith.constant 0 : index
    %c1 = arith.constant 1 : index
    %6 = vector.load %arg1[%c0_7, %c0_8, %c1] : memref<1x3x784xf32, #tpu.memory_space<vmem>>, vector<1x3x726xf32>
    %7 = vector.shape_cast %6 : vector<1x3x726xf32> to vector<3x726xf32>
    %c1_9 = arith.constant 1 : index
    %c0_10 = arith.constant 0 : index
    %c0_11 = arith.constant 0 : index
    %8 = vector.load %arg2[%c1_9, %c0_10, %c0_11] : memref<9x40x3xf32, #tpu.memory_space<vmem>>, vector<1x40x3xf32>
    %9 = vector.shape_cast %8 : vector<1x40x3xf32> to vector<40x3xf32>
    %cst_12 = arith.constant dense<0.000000e+00> : vector<40x726xf32>
    %10 = tpu.matmul %9, %7, %cst_12 {dimension_numbers = #tpu.dot_dimension_numbers<[1], [0], [0], [1], [0, 0, 1, 1], [], []>} : vector<40x3xf32>, vector<3x726xf32>, vector<40x726xf32> -> vector<40x726xf32>
    %c0_13 = arith.constant 0 : index
    %c0_14 = arith.constant 0 : index
    %11 = vector.load %arg13[%c0_13, %c0_14] : memref<40x726xf32, #tpu.memory_space<vmem>>, vector<40x726xf32>
    %12 = arith.addf %11, %10 : vector<40x726xf32>
    %c0_15 = arith.constant 0 : index
    %c0_16 = arith.constant 0 : index
    %13 = vector.load %arg13[%c0_15, %c0_16] : memref<40x726xf32, #tpu.memory_space<vmem>>, vector<40x726xf32>
    tpu.vector_store %arg13[%c0_15, %c0_16], %12 {strides = array<i32>} : memref<40x726xf32, #tpu.memory_space<vmem>>, vector<40x726xf32>,
    %c0_17 = arith.constant 0 : index
    %c0_18 = arith.constant 0 : index
    %c2 = arith.constant 2 : index
    %14 = vector.load %arg1[%c0_17, %c0_18, %c2] : memref<1x3x784xf32, #tpu.memory_space<vmem>>, vector<1x3x726xf32>
    %15 = vector.shape_cast %14 : vector<1x3x726xf32> to vector<3x726xf32>
    %c2_19 = arith.constant 2 : index
    %c0_20 = arith.constant 0 : index
    %c0_21 = arith.constant 0 : index
    %16 = vector.load %arg2[%c2_19, %c0_20, %c0_21] : memref<9x40x3xf32, #tpu.memory_space<vmem>>, vector<1x40x3xf32>
    %17 = vector.shape_cast %16 : vector<1x40x3xf32> to vector<40x3xf32>
    %cst_22 = arith.constant dense<0.000000e+00> : vector<40x726xf32>
    %18 = tpu.matmul %17, %15, %cst_22 {dimension_numbers = #tpu.dot_dimension_numbers<[1], [0], [0], [1], [0, 0, 1, 1], [], []>} : vector<40x3xf32>, vector<3x726xf32>, vector<40x726xf32> -> vector<40x726xf32>
    %c0_23 = arith.constant 0 : index
    %c0_24 = arith.constant 0 : index
    %19 = vector.load %arg13[%c0_23, %c0_24] : memref<40x726xf32, #tpu.memory_space<vmem>>, vector<40x726xf32>
    %20 = arith.addf %19, %18 : vector<40x726xf32>
    %c0_25 = arith.constant 0 : index
    %c0_26 = arith.constant 0 : index
    %21 = vector.load %arg13[%c0_25, %c0_26] : memref<40x726xf32, #tpu.memory_space<vmem>>, vector<40x726xf32>
    tpu.vector_store %arg13[%c0_25, %c0_26], %20 {strides = array<i32>} : memref<40x726xf32, #tpu.memory_space<vmem>>, vector<40x726xf32>,
    %c0_27 = arith.constant 0 : index
    %c0_28 = arith.constant 0 : index
    %c28 = arith.constant 28 : index
    %22 = vector.load %arg1[%c0_27, %c0_28, %c28] : memref<1x3x784xf32, #tpu.memory_space<vmem>>, vector<1x3x726xf32>
    %23 = vector.shape_cast %22 : vector<1x3x726xf32> to vector<3x726xf32>
    %c3 = arith.constant 3 : index
    %c0_29 = arith.constant 0 : index
    %c0_30 = arith.constant 0 : index
    %24 = vector.load %arg2[%c3, %c0_29, %c0_30] : memref<9x40x3xf32, #tpu.memory_space<vmem>>, vector<1x40x3xf32>
    %25 = vector.shape_cast %24 : vector<1x40x3xf32> to vector<40x3xf32>
    %cst_31 = arith.constant dense<0.000000e+00> : vector<40x726xf32>
    %26 = tpu.matmul %25, %23, %cst_31 {dimension_numbers = #tpu.dot_dimension_numbers<[1], [0], [0], [1], [0, 0, 1, 1], [], []>} : vector<40x3xf32>, vector<3x726xf32>, vector<40x726xf32> -> vector<40x726xf32>
    %c0_32 = arith.constant 0 : index
    %c0_33 = arith.constant 0 : index
    %27 = vector.load %arg13[%c0_32, %c0_33] : memref<40x726xf32, #tpu.memory_space<vmem>>, vector<40x726xf32>
    %28 = arith.addf %27, %26 : vector<40x726xf32>
    %c0_34 = arith.constant 0 : index
    %c0_35 = arith.constant 0 : index
    %29 = vector.load %arg13[%c0_34, %c0_35] : memref<40x726xf32, #tpu.memory_space<vmem>>, vector<40x726xf32>
    tpu.vector_store %arg13[%c0_34, %c0_35], %28 {strides = array<i32>} : memref<40x726xf32, #tpu.memory_space<vmem>>, vector<40x726xf32>,
    %c0_36 = arith.constant 0 : index
    %c0_37 = arith.constant 0 : index
    %c29 = arith.constant 29 : index
    %30 = vector.load %arg1[%c0_36, %c0_37, %c29] : memref<1x3x784xf32, #tpu.memory_space<vmem>>, vector<1x3x726xf32>
    %31 = vector.shape_cast %30 : vector<1x3x726xf32> to vector<3x726xf32>
    %c4 = arith.constant 4 : index
    %c0_38 = arith.constant 0 : index
    %c0_39 = arith.constant 0 : index
    %32 = vector.load %arg2[%c4, %c0_38, %c0_39] : memref<9x40x3xf32, #tpu.memory_space<vmem>>, vector<1x40x3xf32>
    %33 = vector.shape_cast %32 : vector<1x40x3xf32> to vector<40x3xf32>
    %cst_40 = arith.constant dense<0.000000e+00> : vector<40x726xf32>
    %34 = tpu.matmul %33, %31, %cst_40 {dimension_numbers = #tpu.dot_dimension_numbers<[1], [0], [0], [1], [0, 0, 1, 1], [], []>} : vector<40x3xf32>, vector<3x726xf32>, vector<40x726xf32> -> vector<40x726xf32>
    %c0_41 = arith.constant 0 : index
    %c0_42 = arith.constant 0 : index
    %35 = vector.load %arg13[%c0_41, %c0_42] : memref<40x726xf32, #tpu.memory_space<vmem>>, vector<40x726xf32>
    %36 = arith.addf %35, %34 : vector<40x726xf32>
    %c0_43 = arith.constant 0 : index
    %c0_44 = arith.constant 0 : index
    %37 = vector.load %arg13[%c0_43, %c0_44] : memref<40x726xf32, #tpu.memory_space<vmem>>, vector<40x726xf32>
    tpu.vector_store %arg13[%c0_43, %c0_44], %36 {strides = array<i32>} : memref<40x726xf32, #tpu.memory_space<vmem>>, vector<40x726xf32>,
    %c0_45 = arith.constant 0 : index
    %c0_46 = arith.constant 0 : index
    %c30 = arith.constant 30 : index
    %38 = vector.load %arg1[%c0_45, %c0_46, %c30] : memref<1x3x784xf32, #tpu.memory_space<vmem>>, vector<1x3x726xf32>
    %39 = vector.shape_cast %38 : vector<1x3x726xf32> to vector<3x726xf32>
    %c5 = arith.constant 5 : index
    %c0_47 = arith.constant 0 : index
    %c0_48 = arith.constant 0 : index
    %40 = vector.load %arg2[%c5, %c0_47, %c0_48] : memref<9x40x3xf32, #tpu.memory_space<vmem>>, vector<1x40x3xf32>
    %41 = vector.shape_cast %40 : vector<1x40x3xf32> to vector<40x3xf32>
    %cst_49 = arith.constant dense<0.000000e+00> : vector<40x726xf32>
    %42 = tpu.matmul %41, %39, %cst_49 {dimension_numbers = #tpu.dot_dimension_numbers<[1], [0], [0], [1], [0, 0, 1, 1], [], []>} : vector<40x3xf32>, vector<3x726xf32>, vector<40x726xf32> -> vector<40x726xf32>
    %c0_50 = arith.constant 0 : index
    %c0_51 = arith.constant 0 : index
    %43 = vector.load %arg13[%c0_50, %c0_51] : memref<40x726xf32, #tpu.memory_space<vmem>>, vector<40x726xf32>
    %44 = arith.addf %43, %42 : vector<40x726xf32>
    %c0_52 = arith.constant 0 : index
    %c0_53 = arith.constant 0 : index
    %45 = vector.load %arg13[%c0_52, %c0_53] : memref<40x726xf32, #tpu.memory_space<vmem>>, vector<40x726xf32>
    tpu.vector_store %arg13[%c0_52, %c0_53], %44 {strides = array<i32>} : memref<40x726xf32, #tpu.memory_space<vmem>>, vector<40x726xf32>,
    %c0_54 = arith.constant 0 : index
    %c0_55 = arith.constant 0 : index
    %c56 = arith.constant 56 : index
    %46 = vector.load %arg1[%c0_54, %c0_55, %c56] : memref<1x3x784xf32, #tpu.memory_space<vmem>>, vector<1x3x726xf32>
    %47 = vector.shape_cast %46 : vector<1x3x726xf32> to vector<3x726xf32>
    %c6 = arith.constant 6 : index
    %c0_56 = arith.constant 0 : index
    %c0_57 = arith.constant 0 : index
    %48 = vector.load %arg2[%c6, %c0_56, %c0_57] : memref<9x40x3xf32, #tpu.memory_space<vmem>>, vector<1x40x3xf32>
    %49 = vector.shape_cast %48 : vector<1x40x3xf32> to vector<40x3xf32>
    %cst_58 = arith.constant dense<0.000000e+00> : vector<40x726xf32>
    %50 = tpu.matmul %49, %47, %cst_58 {dimension_numbers = #tpu.dot_dimension_numbers<[1], [0], [0], [1], [0, 0, 1, 1], [], []>} : vector<40x3xf32>, vector<3x726xf32>, vector<40x726xf32> -> vector<40x726xf32>
    %c0_59 = arith.constant 0 : index
    %c0_60 = arith.constant 0 : index
    %51 = vector.load %arg13[%c0_59, %c0_60] : memref<40x726xf32, #tpu.memory_space<vmem>>, vector<40x726xf32>
    %52 = arith.addf %51, %50 : vector<40x726xf32>
    %c0_61 = arith.constant 0 : index
    %c0_62 = arith.constant 0 : index
    %53 = vector.load %arg13[%c0_61, %c0_62] : memref<40x726xf32, #tpu.memory_space<vmem>>, vector<40x726xf32>
    tpu.vector_store %arg13[%c0_61, %c0_62], %52 {strides = array<i32>} : memref<40x726xf32, #tpu.memory_space<vmem>>, vector<40x726xf32>,
    %c0_63 = arith.constant 0 : index
    %c0_64 = arith.constant 0 : index
    %c57 = arith.constant 57 : index
    %54 = vector.load %arg1[%c0_63, %c0_64, %c57] : memref<1x3x784xf32, #tpu.memory_space<vmem>>, vector<1x3x726xf32>
    %55 = vector.shape_cast %54 : vector<1x3x726xf32> to vector<3x726xf32>
    %c7 = arith.constant 7 : index
    %c0_65 = arith.constant 0 : index
    %c0_66 = arith.constant 0 : index
    %56 = vector.load %arg2[%c7, %c0_65, %c0_66] : memref<9x40x3xf32, #tpu.memory_space<vmem>>, vector<1x40x3xf32>
    %57 = vector.shape_cast %56 : vector<1x40x3xf32> to vector<40x3xf32>
    %cst_67 = arith.constant dense<0.000000e+00> : vector<40x726xf32>
    %58 = tpu.matmul %57, %55, %cst_67 {dimension_numbers = #tpu.dot_dimension_numbers<[1], [0], [0], [1], [0, 0, 1, 1], [], []>} : vector<40x3xf32>, vector<3x726xf32>, vector<40x726xf32> -> vector<40x726xf32>
    %c0_68 = arith.constant 0 : index
    %c0_69 = arith.constant 0 : index
    %59 = vector.load %arg13[%c0_68, %c0_69] : memref<40x726xf32, #tpu.memory_space<vmem>>, vector<40x726xf32>
    %60 = arith.addf %59, %58 : vector<40x726xf32>
    %c0_70 = arith.constant 0 : index
    %c0_71 = arith.constant 0 : index
    %61 = vector.load %arg13[%c0_70, %c0_71] : memref<40x726xf32, #tpu.memory_space<vmem>>, vector<40x726xf32>
    tpu.vector_store %arg13[%c0_70, %c0_71], %60 {strides = array<i32>} : memref<40x726xf32, #tpu.memory_space<vmem>>, vector<40x726xf32>,
    %c0_72 = arith.constant 0 : index
    %c0_73 = arith.constant 0 : index
    %c58 = arith.constant 58 : index
    %62 = vector.load %arg1[%c0_72, %c0_73, %c58] : memref<1x3x784xf32, #tpu.memory_space<vmem>>, vector<1x3x726xf32>
    %63 = vector.shape_cast %62 : vector<1x3x726xf32> to vector<3x726xf32>
    %c8 = arith.constant 8 : index
    %c0_74 = arith.constant 0 : index
    %c0_75 = arith.constant 0 : index
    %64 = vector.load %arg2[%c8, %c0_74, %c0_75] : memref<9x40x3xf32, #tpu.memory_space<vmem>>, vector<1x40x3xf32>
    %65 = vector.shape_cast %64 : vector<1x40x3xf32> to vector<40x3xf32>
    %cst_76 = arith.constant dense<0.000000e+00> : vector<40x726xf32>
    %66 = tpu.matmul %65, %63, %cst_76 {dimension_numbers = #tpu.dot_dimension_numbers<[1], [0], [0], [1], [0, 0, 1, 1], [], []>} : vector<40x3xf32>, vector<3x726xf32>, vector<40x726xf32> -> vector<40x726xf32>
    %c0_77 = arith.constant 0 : index
    %c0_78 = arith.constant 0 : index
    %67 = vector.load %arg13[%c0_77, %c0_78] : memref<40x726xf32, #tpu.memory_space<vmem>>, vector<40x726xf32>
    %68 = arith.addf %67, %66 : vector<40x726xf32>
    %c0_79 = arith.constant 0 : index
    %c0_80 = arith.constant 0 : index
    %69 = vector.load %arg13[%c0_79, %c0_80] : memref<40x726xf32, #tpu.memory_space<vmem>>, vector<40x726xf32>
    tpu.vector_store %arg13[%c0_79, %c0_80], %68 {strides = array<i32>} : memref<40x726xf32, #tpu.memory_space<vmem>>, vector<40x726xf32>,
    %c0_81 = arith.constant 0 : index
    %c0_82 = arith.constant 0 : index
    %70 = vector.load %arg13[%c0_81, %c0_82] : memref<40x726xf32, #tpu.memory_space<vmem>>, vector<40x697xf32>
    %c0_83 = arith.constant 0 : index
    %c1_84 = arith.constant 1 : index
    %71 = vector.load %arg13[%c0_83, %c1_84] : memref<40x726xf32, #tpu.memory_space<vmem>>, vector<40x697xf32>
    %72 = arith.maximumf %70, %71 : vector<40x697xf32>
    %c0_85 = arith.constant 0 : index
    %c28_86 = arith.constant 28 : index
    %73 = vector.load %arg13[%c0_85, %c28_86] : memref<40x726xf32, #tpu.memory_space<vmem>>, vector<40x697xf32>
    %c0_87 = arith.constant 0 : index
    %c29_88 = arith.constant 29 : index
    %74 = vector.load %arg13[%c0_87, %c29_88] : memref<40x726xf32, #tpu.memory_space<vmem>>, vector<40x697xf32>
    %75 = arith.maximumf %73, %74 : vector<40x697xf32>
    %76 = arith.maximumf %72, %75 : vector<40x697xf32>
    %c0_89 = arith.constant 0 : index
    %c0_90 = arith.constant 0 : index
    %77 = vector.load %arg4[%c0_89, %c0_90] : memref<697x169xf32, #tpu.memory_space<vmem>>, vector<697x169xf32>
    %cst_91 = arith.constant dense<0.000000e+00> : vector<40x169xf32>
    %78 = tpu.matmul %76, %77, %cst_91 {dimension_numbers = #tpu.dot_dimension_numbers<[1], [0], [0], [1], [0, 0, 1, 1], [], []>} : vector<40x697xf32>, vector<697x169xf32>, vector<40x169xf32> -> vector<40x169xf32>
    %c0_92 = arith.constant 0 : index
    %c0_93 = arith.constant 0 : index
    %79 = vector.load %arg3[%c0_92, %c0_93] : memref<40x1xf32, #tpu.memory_space<vmem>>, vector<40x1xf32>
    %80 = vector.broadcast %79 : vector<40x1xf32> to vector<40x169xf32>
    %81 = arith.addf %78, %80 : vector<40x169xf32>
    %cst_94 = arith.constant 0.000000e+00 : f32
    %82 = vector.broadcast %cst_94 : f32 to vector<40x169xf32>
    %83 = arith.maximumf %81, %82 : vector<40x169xf32>
    %c0_95 = arith.constant 0 : index
    %c0_96 = arith.constant 0 : index
    %84 = vector.load %arg14[%c0_95, %c0_96] : memref<40x169xf32, #tpu.memory_space<vmem>>, vector<40x169xf32>
    tpu.vector_store %arg14[%c0_95, %c0_96], %83 {strides = array<i32>} : memref<40x169xf32, #tpu.memory_space<vmem>>, vector<40x169xf32>,
    %c0_97 = arith.constant 0 : index
    %c0_98 = arith.constant 0 : index
    %85 = vector.load %arg14[%c0_97, %c0_98] : memref<40x169xf32, #tpu.memory_space<vmem>>, vector<40x141xf32>
    %c0_99 = arith.constant 0 : index
    %c0_100 = arith.constant 0 : index
    %c0_101 = arith.constant 0 : index
    %86 = vector.load %arg5[%c0_99, %c0_100, %c0_101] : memref<9x40x40xf32, #tpu.memory_space<vmem>>, vector<1x40x40xf32>
    %87 = vector.shape_cast %86 : vector<1x40x40xf32> to vector<40x40xf32>
    %cst_102 = arith.constant dense<0.000000e+00> : vector<40x141xf32>
    %88 = tpu.matmul %87, %85, %cst_102 {dimension_numbers = #tpu.dot_dimension_numbers<[1], [0], [0], [1], [0, 0, 1, 1], [], []>} : vector<40x40xf32>, vector<40x141xf32>, vector<40x141xf32> -> vector<40x141xf32>
    %c0_103 = arith.constant 0 : index
    %c0_104 = arith.constant 0 : index
    %89 = vector.load %arg15[%c0_103, %c0_104] : memref<40x141xf32, #tpu.memory_space<vmem>>, vector<40x141xf32>
    tpu.vector_store %arg15[%c0_103, %c0_104], %88 {strides = array<i32>} : memref<40x141xf32, #tpu.memory_space<vmem>>, vector<40x141xf32>,
    %c0_105 = arith.constant 0 : index
    %c1_106 = arith.constant 1 : index
    %90 = vector.load %arg14[%c0_105, %c1_106] : memref<40x169xf32, #tpu.memory_space<vmem>>, vector<40x141xf32>
    %c1_107 = arith.constant 1 : index
    %c0_108 = arith.constant 0 : index
    %c0_109 = arith.constant 0 : index
    %91 = vector.load %arg5[%c1_107, %c0_108, %c0_109] : memref<9x40x40xf32, #tpu.memory_space<vmem>>, vector<1x40x40xf32>
    %92 = vector.shape_cast %91 : vector<1x40x40xf32> to vector<40x40xf32>
    %cst_110 = arith.constant dense<0.000000e+00> : vector<40x141xf32>
    %93 = tpu.matmul %92, %90, %cst_110 {dimension_numbers = #tpu.dot_dimension_numbers<[1], [0], [0], [1], [0, 0, 1, 1], [], []>} : vector<40x40xf32>, vector<40x141xf32>, vector<40x141xf32> -> vector<40x141xf32>
    %c0_111 = arith.constant 0 : index
    %c0_112 = arith.constant 0 : index
    %94 = vector.load %arg15[%c0_111, %c0_112] : memref<40x141xf32, #tpu.memory_space<vmem>>, vector<40x141xf32>
    %95 = arith.addf %94, %93 : vector<40x141xf32>
    %c0_113 = arith.constant 0 : index
    %c0_114 = arith.constant 0 : index
    %96 = vector.load %arg15[%c0_113, %c0_114] : memref<40x141xf32, #tpu.memory_space<vmem>>, vector<40x141xf32>
    tpu.vector_store %arg15[%c0_113, %c0_114], %95 {strides = array<i32>} : memref<40x141xf32, #tpu.memory_space<vmem>>, vector<40x141xf32>,
    %c0_115 = arith.constant 0 : index
    %c2_116 = arith.constant 2 : index
    %97 = vector.load %arg14[%c0_115, %c2_116] : memref<40x169xf32, #tpu.memory_space<vmem>>, vector<40x141xf32>
    %c2_117 = arith.constant 2 : index
    %c0_118 = arith.constant 0 : index
    %c0_119 = arith.constant 0 : index
    %98 = vector.load %arg5[%c2_117, %c0_118, %c0_119] : memref<9x40x40xf32, #tpu.memory_space<vmem>>, vector<1x40x40xf32>
    %99 = vector.shape_cast %98 : vector<1x40x40xf32> to vector<40x40xf32>
    %cst_120 = arith.constant dense<0.000000e+00> : vector<40x141xf32>
    %100 = tpu.matmul %99, %97, %cst_120 {dimension_numbers = #tpu.dot_dimension_numbers<[1], [0], [0], [1], [0, 0, 1, 1], [], []>} : vector<40x40xf32>, vector<40x141xf32>, vector<40x141xf32> -> vector<40x141xf32>
    %c0_121 = arith.constant 0 : index
    %c0_122 = arith.constant 0 : index
    %101 = vector.load %arg15[%c0_121, %c0_122] : memref<40x141xf32, #tpu.memory_space<vmem>>, vector<40x141xf32>
    %102 = arith.addf %101, %100 : vector<40x141xf32>
    %c0_123 = arith.constant 0 : index
    %c0_124 = arith.constant 0 : index
    %103 = vector.load %arg15[%c0_123, %c0_124] : memref<40x141xf32, #tpu.memory_space<vmem>>, vector<40x141xf32>
    tpu.vector_store %arg15[%c0_123, %c0_124], %102 {strides = array<i32>} : memref<40x141xf32, #tpu.memory_space<vmem>>, vector<40x141xf32>,
    %c0_125 = arith.constant 0 : index
    %c13 = arith.constant 13 : index
    %104 = vector.load %arg14[%c0_125, %c13] : memref<40x169xf32, #tpu.memory_space<vmem>>, vector<40x141xf32>
    %c3_126 = arith.constant 3 : index
    %c0_127 = arith.constant 0 : index
    %c0_128 = arith.constant 0 : index
    %105 = vector.load %arg5[%c3_126, %c0_127, %c0_128] : memref<9x40x40xf32, #tpu.memory_space<vmem>>, vector<1x40x40xf32>
    %106 = vector.shape_cast %105 : vector<1x40x40xf32> to vector<40x40xf32>
    %cst_129 = arith.constant dense<0.000000e+00> : vector<40x141xf32>
    %107 = tpu.matmul %106, %104, %cst_129 {dimension_numbers = #tpu.dot_dimension_numbers<[1], [0], [0], [1], [0, 0, 1, 1], [], []>} : vector<40x40xf32>, vector<40x141xf32>, vector<40x141xf32> -> vector<40x141xf32>
    %c0_130 = arith.constant 0 : index
    %c0_131 = arith.constant 0 : index
    %108 = vector.load %arg15[%c0_130, %c0_131] : memref<40x141xf32, #tpu.memory_space<vmem>>, vector<40x141xf32>
    %109 = arith.addf %108, %107 : vector<40x141xf32>
    %c0_132 = arith.constant 0 : index
    %c0_133 = arith.constant 0 : index
    %110 = vector.load %arg15[%c0_132, %c0_133] : memref<40x141xf32, #tpu.memory_space<vmem>>, vector<40x141xf32>
    tpu.vector_store %arg15[%c0_132, %c0_133], %109 {strides = array<i32>} : memref<40x141xf32, #tpu.memory_space<vmem>>, vector<40x141xf32>,
    %c0_134 = arith.constant 0 : index
    %c14 = arith.constant 14 : index
    %111 = vector.load %arg14[%c0_134, %c14] : memref<40x169xf32, #tpu.memory_space<vmem>>, vector<40x141xf32>
    %c4_135 = arith.constant 4 : index
    %c0_136 = arith.constant 0 : index
    %c0_137 = arith.constant 0 : index
    %112 = vector.load %arg5[%c4_135, %c0_136, %c0_137] : memref<9x40x40xf32, #tpu.memory_space<vmem>>, vector<1x40x40xf32>
    %113 = vector.shape_cast %112 : vector<1x40x40xf32> to vector<40x40xf32>
    %cst_138 = arith.constant dense<0.000000e+00> : vector<40x141xf32>
    %114 = tpu.matmul %113, %111, %cst_138 {dimension_numbers = #tpu.dot_dimension_numbers<[1], [0], [0], [1], [0, 0, 1, 1], [], []>} : vector<40x40xf32>, vector<40x141xf32>, vector<40x141xf32> -> vector<40x141xf32>
    %c0_139 = arith.constant 0 : index
    %c0_140 = arith.constant 0 : index
    %115 = vector.load %arg15[%c0_139, %c0_140] : memref<40x141xf32, #tpu.memory_space<vmem>>, vector<40x141xf32>
    %116 = arith.addf %115, %114 : vector<40x141xf32>
    %c0_141 = arith.constant 0 : index
    %c0_142 = arith.constant 0 : index
    %117 = vector.load %arg15[%c0_141, %c0_142] : memref<40x141xf32, #tpu.memory_space<vmem>>, vector<40x141xf32>
    tpu.vector_store %arg15[%c0_141, %c0_142], %116 {strides = array<i32>} : memref<40x141xf32, #tpu.memory_space<vmem>>, vector<40x141xf32>,
    %c0_143 = arith.constant 0 : index
    %c15 = arith.constant 15 : index
    %118 = vector.load %arg14[%c0_143, %c15] : memref<40x169xf32, #tpu.memory_space<vmem>>, vector<40x141xf32>
    %c5_144 = arith.constant 5 : index
    %c0_145 = arith.constant 0 : index
    %c0_146 = arith.constant 0 : index
    %119 = vector.load %arg5[%c5_144, %c0_145, %c0_146] : memref<9x40x40xf32, #tpu.memory_space<vmem>>, vector<1x40x40xf32>
    %120 = vector.shape_cast %119 : vector<1x40x40xf32> to vector<40x40xf32>
    %cst_147 = arith.constant dense<0.000000e+00> : vector<40x141xf32>
    %121 = tpu.matmul %120, %118, %cst_147 {dimension_numbers = #tpu.dot_dimension_numbers<[1], [0], [0], [1], [0, 0, 1, 1], [], []>} : vector<40x40xf32>, vector<40x141xf32>, vector<40x141xf32> -> vector<40x141xf32>
    %c0_148 = arith.constant 0 : index
    %c0_149 = arith.constant 0 : index
    %122 = vector.load %arg15[%c0_148, %c0_149] : memref<40x141xf32, #tpu.memory_space<vmem>>, vector<40x141xf32>
    %123 = arith.addf %122, %121 : vector<40x141xf32>
    %c0_150 = arith.constant 0 : index
    %c0_151 = arith.constant 0 : index
    %124 = vector.load %arg15[%c0_150, %c0_151] : memref<40x141xf32, #tpu.memory_space<vmem>>, vector<40x141xf32>
    tpu.vector_store %arg15[%c0_150, %c0_151], %123 {strides = array<i32>} : memref<40x141xf32, #tpu.memory_space<vmem>>, vector<40x141xf32>,
    %c0_152 = arith.constant 0 : index
    %c26 = arith.constant 26 : index
    %125 = vector.load %arg14[%c0_152, %c26] : memref<40x169xf32, #tpu.memory_space<vmem>>, vector<40x141xf32>
    %c6_153 = arith.constant 6 : index
    %c0_154 = arith.constant 0 : index
    %c0_155 = arith.constant 0 : index
    %126 = vector.load %arg5[%c6_153, %c0_154, %c0_155] : memref<9x40x40xf32, #tpu.memory_space<vmem>>, vector<1x40x40xf32>
    %127 = vector.shape_cast %126 : vector<1x40x40xf32> to vector<40x40xf32>
    %cst_156 = arith.constant dense<0.000000e+00> : vector<40x141xf32>
    %128 = tpu.matmul %127, %125, %cst_156 {dimension_numbers = #tpu.dot_dimension_numbers<[1], [0], [0], [1], [0, 0, 1, 1], [], []>} : vector<40x40xf32>, vector<40x141xf32>, vector<40x141xf32> -> vector<40x141xf32>
    %c0_157 = arith.constant 0 : index
    %c0_158 = arith.constant 0 : index
    %129 = vector.load %arg15[%c0_157, %c0_158] : memref<40x141xf32, #tpu.memory_space<vmem>>, vector<40x141xf32>
    %130 = arith.addf %129, %128 : vector<40x141xf32>
    %c0_159 = arith.constant 0 : index
    %c0_160 = arith.constant 0 : index
    %131 = vector.load %arg15[%c0_159, %c0_160] : memref<40x141xf32, #tpu.memory_space<vmem>>, vector<40x141xf32>
    tpu.vector_store %arg15[%c0_159, %c0_160], %130 {strides = array<i32>} : memref<40x141xf32, #tpu.memory_space<vmem>>, vector<40x141xf32>,
    %c0_161 = arith.constant 0 : index
    %c27 = arith.constant 27 : index
    %132 = vector.load %arg14[%c0_161, %c27] : memref<40x169xf32, #tpu.memory_space<vmem>>, vector<40x141xf32>
    %c7_162 = arith.constant 7 : index
    %c0_163 = arith.constant 0 : index
    %c0_164 = arith.constant 0 : index
    %133 = vector.load %arg5[%c7_162, %c0_163, %c0_164] : memref<9x40x40xf32, #tpu.memory_space<vmem>>, vector<1x40x40xf32>
    %134 = vector.shape_cast %133 : vector<1x40x40xf32> to vector<40x40xf32>
    %cst_165 = arith.constant dense<0.000000e+00> : vector<40x141xf32>
    %135 = tpu.matmul %134, %132, %cst_165 {dimension_numbers = #tpu.dot_dimension_numbers<[1], [0], [0], [1], [0, 0, 1, 1], [], []>} : vector<40x40xf32>, vector<40x141xf32>, vector<40x141xf32> -> vector<40x141xf32>
    %c0_166 = arith.constant 0 : index
    %c0_167 = arith.constant 0 : index
    %136 = vector.load %arg15[%c0_166, %c0_167] : memref<40x141xf32, #tpu.memory_space<vmem>>, vector<40x141xf32>
    %137 = arith.addf %136, %135 : vector<40x141xf32>
    %c0_168 = arith.constant 0 : index
    %c0_169 = arith.constant 0 : index
    %138 = vector.load %arg15[%c0_168, %c0_169] : memref<40x141xf32, #tpu.memory_space<vmem>>, vector<40x141xf32>
    tpu.vector_store %arg15[%c0_168, %c0_169], %137 {strides = array<i32>} : memref<40x141xf32, #tpu.memory_space<vmem>>, vector<40x141xf32>,
    %c0_170 = arith.constant 0 : index
    %c28_171 = arith.constant 28 : index
    %139 = vector.load %arg14[%c0_170, %c28_171] : memref<40x169xf32, #tpu.memory_space<vmem>>, vector<40x141xf32>
    %c8_172 = arith.constant 8 : index
    %c0_173 = arith.constant 0 : index
    %c0_174 = arith.constant 0 : index
    %140 = vector.load %arg5[%c8_172, %c0_173, %c0_174] : memref<9x40x40xf32, #tpu.memory_space<vmem>>, vector<1x40x40xf32>
    %141 = vector.shape_cast %140 : vector<1x40x40xf32> to vector<40x40xf32>
    %cst_175 = arith.constant dense<0.000000e+00> : vector<40x141xf32>
    %142 = tpu.matmul %141, %139, %cst_175 {dimension_numbers = #tpu.dot_dimension_numbers<[1], [0], [0], [1], [0, 0, 1, 1], [], []>} : vector<40x40xf32>, vector<40x141xf32>, vector<40x141xf32> -> vector<40x141xf32>
    %c0_176 = arith.constant 0 : index
    %c0_177 = arith.constant 0 : index
    %143 = vector.load %arg15[%c0_176, %c0_177] : memref<40x141xf32, #tpu.memory_space<vmem>>, vector<40x141xf32>
    %144 = arith.addf %143, %142 : vector<40x141xf32>
    %c0_178 = arith.constant 0 : index
    %c0_179 = arith.constant 0 : index
    %145 = vector.load %arg15[%c0_178, %c0_179] : memref<40x141xf32, #tpu.memory_space<vmem>>, vector<40x141xf32>
    tpu.vector_store %arg15[%c0_178, %c0_179], %144 {strides = array<i32>} : memref<40x141xf32, #tpu.memory_space<vmem>>, vector<40x141xf32>,
    %c0_180 = arith.constant 0 : index
    %c0_181 = arith.constant 0 : index
    %146 = vector.load %arg15[%c0_180, %c0_181] : memref<40x141xf32, #tpu.memory_space<vmem>>, vector<40x127xf32>
    %c0_182 = arith.constant 0 : index
    %c1_183 = arith.constant 1 : index
    %147 = vector.load %arg15[%c0_182, %c1_183] : memref<40x141xf32, #tpu.memory_space<vmem>>, vector<40x127xf32>
    %148 = arith.maximumf %146, %147 : vector<40x127xf32>
    %c0_184 = arith.constant 0 : index
    %c13_185 = arith.constant 13 : index
    %149 = vector.load %arg15[%c0_184, %c13_185] : memref<40x141xf32, #tpu.memory_space<vmem>>, vector<40x127xf32>
    %c0_186 = arith.constant 0 : index
    %c14_187 = arith.constant 14 : index
    %150 = vector.load %arg15[%c0_186, %c14_187] : memref<40x141xf32, #tpu.memory_space<vmem>>, vector<40x127xf32>
    %151 = arith.maximumf %149, %150 : vector<40x127xf32>
    %152 = arith.maximumf %148, %151 : vector<40x127xf32>
    %c0_188 = arith.constant 0 : index
    %c0_189 = arith.constant 0 : index
    %153 = vector.load %arg7[%c0_188, %c0_189] : memref<127x25xf32, #tpu.memory_space<vmem>>, vector<127x25xf32>
    %cst_190 = arith.constant dense<0.000000e+00> : vector<40x25xf32>
    %154 = tpu.matmul %152, %153, %cst_190 {dimension_numbers = #tpu.dot_dimension_numbers<[1], [0], [0], [1], [0, 0, 1, 1], [], []>} : vector<40x127xf32>, vector<127x25xf32>, vector<40x25xf32> -> vector<40x25xf32>
    %c0_191 = arith.constant 0 : index
    %c0_192 = arith.constant 0 : index
    %155 = vector.load %arg6[%c0_191, %c0_192] : memref<40x1xf32, #tpu.memory_space<vmem>>, vector<40x1xf32>
    %156 = vector.broadcast %155 : vector<40x1xf32> to vector<40x25xf32>
    %157 = arith.addf %154, %156 : vector<40x25xf32>
    %cst_193 = arith.constant 0.000000e+00 : f32
    %158 = vector.broadcast %cst_193 : f32 to vector<40x25xf32>
    %159 = arith.maximumf %157, %158 : vector<40x25xf32>
    %c0_194 = arith.constant 0 : index
    %c0_195 = arith.constant 0 : index
    %160 = vector.load %arg16[%c0_194, %c0_195] : memref<40x25xf32, #tpu.memory_space<vmem>>, vector<40x25xf32>
    tpu.vector_store %arg16[%c0_194, %c0_195], %159 {strides = array<i32>} : memref<40x25xf32, #tpu.memory_space<vmem>>, vector<40x25xf32>,
    %c0_196 = arith.constant 0 : index
    %c0_197 = arith.constant 0 : index
    %161 = vector.load %arg16[%c0_196, %c0_197] : memref<40x25xf32, #tpu.memory_space<vmem>>, vector<40x25xf32>
    %c0_198 = arith.constant 0 : index
    %c0_199 = arith.constant 0 : index
    %162 = vector.load %arg8[%c0_198, %c0_199] : memref<25x400xf32, #tpu.memory_space<vmem>>, vector<25x400xf32>
    %cst_200 = arith.constant dense<0.000000e+00> : vector<40x400xf32>
    %163 = tpu.matmul %161, %162, %cst_200 {dimension_numbers = #tpu.dot_dimension_numbers<[1], [0], [0], [1], [0, 0, 1, 1], [], []>} : vector<40x25xf32>, vector<25x400xf32>, vector<40x400xf32> -> vector<40x400xf32>
    %c0_201 = arith.constant 0 : index
    %c0_202 = arith.constant 0 : index
    %164 = vector.load %arg9[%c0_201, %c0_202] : memref<40x400xf32, #tpu.memory_space<vmem>>, vector<40x400xf32>
    %165 = arith.mulf %163, %164 : vector<40x400xf32>
    %cst_203 = arith.constant dense<0.000000e+00> : vector<400xf32>
    %166 = vector.multi_reduction <add>, %165, %cst_203 [0] : vector<40x400xf32> to vector<400xf32>
    %167 = vector.shape_cast %166 : vector<400xf32> to vector<1x400xf32>
    %c0_204 = arith.constant 0 : index
    %c0_205 = arith.constant 0 : index
    %168 = vector.load %arg10[%c0_204, %c0_205] : memref<400x128xf32, #tpu.memory_space<vmem>>, vector<400x128xf32>
    %cst_206 = arith.constant dense<0.000000e+00> : vector<1x128xf32>
    %169 = tpu.matmul %167, %168, %cst_206 {dimension_numbers = #tpu.dot_dimension_numbers<[1], [0], [0], [1], [0, 0, 1, 1], [], []>} : vector<1x400xf32>, vector<400x128xf32>, vector<1x128xf32> -> vector<1x128xf32>
    %c0_207 = arith.constant 0 : index
    %c0_208 = arith.constant 0 : index
    %170 = vector.load %arg11[%c0_207, %c0_208] : memref<1x128xf32, #tpu.memory_space<vmem>>, vector<1x128xf32>
    %171 = arith.addf %169, %170 : vector<1x128xf32>
    %c0_209 = arith.constant 0 : index
    %c0_210 = arith.constant 0 : index
    %c0_211 = arith.constant 0 : index
    %172 = vector.load %arg12[%c0_209, %c0_210, %c0_211] : memref<1x1x128xf32, #tpu.memory_space<vmem>>, vector<1x1x128xf32>
    %173 = vector.shape_cast %172 : vector<1x1x128xf32> to vector<1x128xf32>
    %174 = vector.shape_cast %171 : vector<1x128xf32> to vector<1x1x128xf32>
    tpu.vector_store %arg12[%c0_209, %c0_210, %c0_211], %174 {strides = array<i32>} : memref<1x1x128xf32, #tpu.memory_space<vmem>>, vector<1x1x128xf32>,
    return
  }
  func.func @transform_0(%arg0: i32) -> (i32, i32, i32) {
    %c0_i32 = arith.constant 0 : i32
    %c0_i32_0 = arith.constant 0 : i32
    %c0_i32_1 = arith.constant 0 : i32
    return %arg0, %c0_i32, %c0_i32_0 : i32, i32, i32
  }
  func.func @transform_1(%arg0: i32) -> (i32, i32, i32) {
    %c0_i32 = arith.constant 0 : i32
    %c0_i32_0 = arith.constant 0 : i32
    %c0_i32_1 = arith.constant 0 : i32
    %c0_i32_2 = arith.constant 0 : i32
    return %c0_i32, %c0_i32_0, %c0_i32_1 : i32, i32, i32
  }
  func.func @transform_2(%arg0: i32) -> (i32, i32) {
    %c0_i32 = arith.constant 0 : i32
    %c0_i32_0 = arith.constant 0 : i32
    %c0_i32_1 = arith.constant 0 : i32
    return %c0_i32, %c0_i32_0 : i32, i32
  }
  func.func @transform_3(%arg0: i32) -> (i32, i32) {
    %c0_i32 = arith.constant 0 : i32
    %c0_i32_0 = arith.constant 0 : i32
    %c0_i32_1 = arith.constant 0 : i32
    return %c0_i32, %c0_i32_0 : i32, i32
  }
  func.func @transform_4(%arg0: i32) -> (i32, i32, i32) {
    %c0_i32 = arith.constant 0 : i32
    %c0_i32_0 = arith.constant 0 : i32
    %c0_i32_1 = arith.constant 0 : i32
    %c0_i32_2 = arith.constant 0 : i32
    return %c0_i32, %c0_i32_0, %c0_i32_1 : i32, i32, i32
  }
  func.func @transform_5(%arg0: i32) -> (i32, i32) {
    %c0_i32 = arith.constant 0 : i32
    %c0_i32_0 = arith.constant 0 : i32
    %c0_i32_1 = arith.constant 0 : i32
    return %c0_i32, %c0_i32_0 : i32, i32
  }
  func.func @transform_6(%arg0: i32) -> (i32, i32) {
    %c0_i32 = arith.constant 0 : i32
    %c0_i32_0 = arith.constant 0 : i32
    %c0_i32_1 = arith.constant 0 : i32
    return %c0_i32, %c0_i32_0 : i32, i32
  }
  func.func @transform_7(%arg0: i32) -> (i32, i32) {
    %c0_i32 = arith.constant 0 : i32
    %c0_i32_0 = arith.constant 0 : i32
    %c0_i32_1 = arith.constant 0 : i32
    return %c0_i32, %c0_i32_0 : i32, i32
  }
  func.func @transform_8(%arg0: i32) -> (i32, i32) {
    %c0_i32 = arith.constant 0 : i32
    %c0_i32_0 = arith.constant 0 : i32
    %c0_i32_1 = arith.constant 0 : i32
    return %c0_i32, %c0_i32_0 : i32, i32
  }
  func.func @transform_9(%arg0: i32) -> (i32, i32) {
    %c0_i32 = arith.constant 0 : i32
    %c0_i32_0 = arith.constant 0 : i32
    %c0_i32_1 = arith.constant 0 : i32
    return %c0_i32, %c0_i32_0 : i32, i32
  }
  func.func @transform_10(%arg0: i32) -> (i32, i32) {
    %c0_i32 = arith.constant 0 : i32
    %c0_i32_0 = arith.constant 0 : i32
    %c0_i32_1 = arith.constant 0 : i32
    return %c0_i32, %c0_i32_0 : i32, i32
  }
  func.func @transform_11(%arg0: i32) -> (i32, i32, i32) {
    %c0_i32 = arith.constant 0 : i32
    %c0_i32_0 = arith.constant 0 : i32
    %c0_i32_1 = arith.constant 0 : i32
    return %arg0, %c0_i32, %c0_i32_0 : i32, i32, i32
  }
}

</mosaic_0001>

<bundles_post_ra>
// kernel: quantnet_forward.1
= control target key start
LH: loop header
LB: loop body
LE: loop exit
PB: predicated region body
PF: predicated region fallthrough
CT: control target
= control target key end

     0   :  { %s12118_s0 = inlined_call_operand.vmem [shape: f32[2,3,784], index: 0, kind: input, shape index: {}]   ;;  %s12119_s1 = inlined_call_operand.vmem [shape: f32[9,40,3], index: 1, kind: input, shape index: {}]   ;;  %s12120_s2 = inlined_call_operand.vmem [shape: f32[40,1], index: 2, kind: input, shape index: {}]   ;;  %s12121_s3 = inlined_call_operand.vmem [shape: f32[697,169], index: 3, kind: input, shape index: {}]   ;;  %s12122_s4 = inlined_call_operand.vmem [shape: f32[9,40,40], index: 4, kind: input, shape index: {}]   ;;  %s12123_s5 = inlined_call_operand.vmem [shape: f32[40,1], index: 5, kind: input, shape index: {}]   ;;  %s12124_s6 = inlined_call_operand.vmem [shape: f32[127,25], index: 6, kind: input, shape index: {}]   ;;  %s12125_s7 = inlined_call_operand.vmem [shape: f32[25,400], index: 7, kind: input, shape index: {}]   ;;  %s12126_s8 = inlined_call_operand.vmem [shape: f32[40,400], index: 8, kind: input, shape index: {}]   ;;  %s12127_s9 = inlined_call_operand.vmem [shape: f32[400,128], index: 9, kind: input, shape index: {}]   ;;  %s12128_s10 = inlined_call_operand.vmem [shape: f32[1,128], index: 10, kind: input, shape index: {}]   ;;  %s12129_s11 = inlined_call_operand.hbm [shape: f32[2,1,128], index: 11, kind: output, shape index: {}]  }
   0x1   :  { %12138 = sst [smem:[#allocation69_spill]] %s12118_s0 }
   0x2   :  { %16 = vsyncpa [#allocation7], 0 }
   0x3   :  { %18 = vsyncpa [#allocation7 + $0x1], 0  ;;  %s8575_s17 = smov 0   ;;  %s8577_s18 = smov 0  }
   0x4   :  { %s8579_s19 = smov 0   ;;  %s8581_s20 = smov 0  }
   0x5 LB: > { %s8596_s21 = sadd.s32 4294967295, %s8496_s20   ;;  %s7776_s22 = sadd.s32 4294967294, %s8496_s20   ;;  %s8496_s20 = sphi %s8581_s20, %s12269_s20   ;;  %s8492_s19 = sphi %s8579_s19, %s12268_s19   ;;  %s8488_s18 = sphi %s8577_s18, %s12267_s18   ;;  %s8484_s17 = sphi %s8575_s17, %s12266_s17  }
   0x6   : > { %s8600_s23 = sadd.s32 1, %s8496_s20   ;;  %s267_s24 = sadd.s32 1, %s8492_s19 }
   0x7   : > { %s264_s25 = ssub.s32 %s8496_s20, %s8600_s23  ;;  %p277_p0 = scmp.ne.s32.totalorder %s8492_s19, %s8488_s18 }
   0x8   : > { %p265_p1 = scmp.eq.s32.totalorder %s264_s25, 0  ;;  %p278_p2 = scmp.eq.s32.totalorder %s8596_s21, 1 }
   0x9   : > { %p283_p3 = scmp.ne.s32.totalorder %s8488_s18, %s8484_s17  ;;  %p284_p4 = scmp.eq.s32.totalorder %s7776_s22, 1 }
   0xa   : > { %s8611_s26 = scalar_select %p265_p1, %s8492_s19, %s267_s24  }
   0xb   : > { %p8613_p5 = por %p278_p2, %p277_p0  ;;  %p8617_p6 = por %p284_p4, %p283_p3 }
   0xc   : > { %p7779_p7 = scmp.ge.s32.totalorder %s8496_s20, 1  ;;  %p340_p8 = scmp.lt.s32.totalorder %s8496_s20, 3 }
   0xe   : > { %p341_p9 = pnand %p7779_p7, %p340_p8 }
  0x10   : > { %344 = sbr.rel (%p341_p9) target bundleno = 2447 (0x98f), region = 64 }
  0x15   : > { %p379_p10 = scmp.lt.s32.totalorder %s8596_s21, 1  ;;  %v12130_v0 = vmov 0.0   ;;  %s12141_s0 = sld [smem:[#allocation69_spill]]  ;;  %vm414_vm0 = vcmask 1042432   ;;  %v8643_v10 = vld [vmem:[%s12119_s1] sm:$0xff]  ;;  %vm398_vm1 = vcmask 23552  }
  0x16   : > { %491 = vmatprep.mubr.f32.mxu0 %v12130_v0  ;;  %598 = vmatprep.mubr.f32.mxu1 %v12130_v0  ;;  %s12134_s15 = smov 127   ;;  %v8658_v15 = vld [vmem:[%s12119_s1 + $0x8] sm:$0xff]  ;;  %v389_v18 = vld [vmem:[%s12119_s1 + $0x10] sm:$0xff]  ;;  %v390_v23 = vld [vmem:[%s12119_s1 + $0x18] sm:$0xff]  ;;  %s12136_s22 = smov 100   ;;  %vm770_vm2 = vcmask 1039360  }
  0x17   : > { %s380_s29 = scalar_select %p379_p10, %s8596_s21, 1  ;;  %v391_v25 = vld [vmem:[%s12119_s1 + $0x20] sm:$0xff]  ;;  %vm1205_vm3 = vcmask 1031168   ;;  %vm1640_vm4 = vcmask 818176   ;;  %vm2075_vm5 = vcmask 809984   ;;  %vm2510_vm6 = vcmask 801792  }
  0x18   : > { %s8503_s12 = smov 98   ;;  %s8504_s13 = smov 72   ;;  %vm2949_vm7 = vcmask 588800   ;;  %vm717_vm8 = vcmask 703488   ;;  %vm3389_vm9 = vcmask 580608   ;;  %vm3829_vm10 = vcmask 572416  }
  0x19   : > { %s8231_s30 = smul.u32 28, %s380_s29  ;;  %s12132_s29 = smov 126   ;;  %vm4824_vm11 = vcmask 465920   ;;  %vm4840_vm12 = vcmask 1040384   ;;  %vm5143_vm13 = vcmask 334848   ;;  %vm5168_vm14 = vcmask 326656  }
  0x1a   : > { %s8505_s16 = smov 71   ;;  %s8506_s24 = smov 70   ;;  %vm5940_vm15 = vcmask 932864  }
  0x1b   : > { %s8630_s14 = scalar_lea.vmem %s12141_s0, %s8231_s30  ;;  %s8502_s30 = smov 99  }
  0x1c   : > { %v743_v1 = vld [vmem:[%s8630_s14] sm:$0x77]  ;;  %v744_v2 = vld [vmem:[%s8630_s14 + $0x8] sm:$0x77]  ;;  %v745_v6 = vld [vmem:[%s8630_s14 + $0x10] sm:$0x77] }
  0x1d   : > { %758 = vrot.lane.b32.xlu1 %v743_v1, %s12134_s15  ;;  %v755_v3 = vcombine.high %v743_v1, %v743_v1  ;;  %v756_v4 = vcombine.high %v744_v2, %v744_v2  ;;  %v384_v5 = vld [vmem:[%s8630_s14] sm:$0x77]  ;;  %v385_v8 = vld [vmem:[%s8630_s14 + $0x8] sm:$0x77]  ;;  %v757_v9 = vcombine.high %v745_v6, %v745_v6  ;;  %v386_v12 = vld [vmem:[%s8630_s14 + $0x10] sm:$0x77] }
  0x1e   : > { %v395_v7 = vcombine.high %v384_v5, %v384_v5  ;;  %v396_v11 = vcombine.high %v385_v8, %v385_v8  ;;  %v397_v13 = vcombine.high %v386_v12, %v386_v12  ;;  %v1178_v14 = vld [vmem:[%s8630_s14] sm:$0x77]  ;;  %v1179_v17 = vld [vmem:[%s8630_s14 + $0x8] sm:$0x77]  ;;  %v1180_v19 = vld [vmem:[%s8630_s14 + $0x10] sm:$0x77] }
  0x1f   : > { %760 = vrot.lane.b32.xlu0 %v755_v3, %s12134_s15  ;;  %v1190_v16 = vcombine.high %v1178_v14, %v1178_v14  ;;  %v1613_v20 = vld [vmem:[%s8630_s14] sm:$0x77]  ;;  %v1191_v21 = vcombine.high %v1179_v17, %v1179_v17  ;;  %v1192_v24 = vcombine.high %v1180_v19, %v1180_v19  ;;  %v1614_v26 = vld [vmem:[%s8630_s14 + $0x8] sm:$0x77]  ;;  %v1615_v28 = vld [vmem:[%s8630_s14 + $0x10] sm:$0x77] }
  0x20   : > { %7781 = vmatprep.subr.msk.mxu0 %vm414_vm0, %v395_v7  ;;  %8229 = vmatprep.subr.msk.mxu1 %vm414_vm0, %v396_v11  ;;  %v1625_v22 = vcombine.high %v1613_v20, %v1613_v20  ;;  %v1626_v27 = vcombine.high %v1614_v26, %v1614_v26  ;;  %v1627_v29 = vcombine.high %v1615_v28, %v1615_v28  ;;  %v2048_v30 = vld [vmem:[%s8630_s14] sm:$0x77]  ;;  %v2049_v32 = vld [vmem:[%s8630_s14 + $0x8] sm:$0x77]  ;;  %v2050_v33 = vld [vmem:[%s8630_s14 + $0x10] sm:$0x77] }
  0x21   : > { %764 = vrot.lane.b32.xlu1 %v756_v4, %s12134_s15  ;;  %7782 = vmatpush1.msk.msra.mxu0 %vm414_vm0, %v384_v5  ;;  %v2060_v31 = vcombine.high %v2048_v30, %v2048_v30  ;;  %v2483_v34 = vld [vmem:[%s8630_s14] sm:$0x77]  ;;  %v2061_v35 = vcombine.high %v2049_v32, %v2049_v32  ;;  %v2062_v37 = vcombine.high %v2050_v33, %v2050_v33  ;;  %v2484_v38 = vld [vmem:[%s8630_s14 + $0x8] sm:$0x77]  ;;  %v2485_v40 = vld [vmem:[%s8630_s14 + $0x10] sm:$0x77] }
  0x22   : > { %7783 = vmatmul.mubr.msk.f32.vlgmr.msra.gmra.mxu0 %vm398_vm1, %v8643_v10  ;;  %7788 = vmatprep.subr.msk.mxu0 %vm414_vm0, %v396_v11  ;;  %v2495_v36 = vcombine.high %v2483_v34, %v2483_v34  ;;  %v2496_v39 = vcombine.high %v2484_v38, %v2484_v38  ;;  %v2497_v41 = vcombine.high %v2485_v40, %v2485_v40  ;;  %v2918_v42 = vld [vmem:[%s8630_s14] sm:$0x77]  ;;  %v2919_v44 = vld [vmem:[%s8630_s14 + $0x8] sm:$0x77]  ;;  %v2920_v45 = vld [vmem:[%s8630_s14 + $0x10] sm:$0x77] }
  0x23   : > { %762 = vrot.lane.b32.xlu0 %v744_v2, %s12134_s15  ;;  %497 = vmatprep.mubr.f32.mxu0 %v12130_v0  ;;  %v2932_v43 = vcombine.high %v2918_v42, %v2918_v42  ;;  %v2933_v46 = vcombine.high %v2919_v44, %v2919_v44  ;;  %v2934_v47 = vcombine.high %v2920_v45, %v2920_v45  ;;  %v3358_v48 = vld [vmem:[%s8630_s14] sm:$0x77]  ;;  %v2921_v50 = vld [vmem:[%s8630_s14 + $0x18] sm:$0x7]  ;;  %v3359_v51 = vld [vmem:[%s8630_s14 + $0x8] sm:$0x77] }
  0x24   : > { %7789 = vmatpush1.msk.msra.mxu0 %vm414_vm0, %v385_v8  ;;  %8230 = vmatpush1.msk.msra.mxu1 %vm414_vm0, %v385_v8  ;;  %v3372_v49 = vcombine.high %v3358_v48, %v3358_v48  ;;  %v3360_v52 = vld [vmem:[%s8630_s14 + $0x10] sm:$0x77]  ;;  %v3373_v53 = vcombine.high %v3359_v51, %v3359_v51  ;;  %v3361_v54 = vld [vmem:[%s8630_s14 + $0x18] sm:$0x7]  ;;  %v3798_v56 = vld [vmem:[%s8630_s14] sm:$0x77] }
  0x25   : > { %768 = vrot.lane.b32.xlu1 %v757_v9, %s12134_s15  ;;  %7795 = vmatprep.subr.msk.mxu0 %vm414_vm0, %v397_v13  ;;  %v3374_v55 = vcombine.high %v3360_v52, %v3360_v52  ;;  %v3812_v57 = vcombine.high %v3798_v56, %v3798_v56  ;;  %v3799_v58 = vld [vmem:[%s8630_s14 + $0x8] sm:$0x77]  ;;  %v3800_v59 = vld [vmem:[%s8630_s14 + $0x10] sm:$0x77]  ;;  %v3801_v62 = vld [vmem:[%s8630_s14 + $0x18] sm:$0x7] }
  0x26   : > { %7784 = vmatmul.mubr.msk.f32.gmra.mxu0 %vm398_vm1, %v8658_v15  ;;  %7792 = vmatmul.mubr.msk.f32.vlgmr.msra.gmra.mxu1 %vm398_vm1, %v389_v18  ;;  %v3813_v60 = vcombine.high %v3799_v58, %v3799_v58  ;;  %v3814_v61 = vcombine.high %v3800_v59, %v3800_v59  ;;  %v7802_v5 = vld [vmem:[%s12119_s1 + $0x28] sm:$0xff]  ;;  %s12262_s25 = smov 100   ;;  %s12264_s0 = smov 127  }
  0x27   : > { %766 = vrot.lane.b32.xlu0 %v745_v6, %s12134_s15  ;;  %503 = vmatprep.mubr.f32.mxu0 %v12130_v0  ;;  %s377_s14 = sand.u32 1, %s8488_s18  }
  0x28   : > { %604 = vmatprep.mubr.f32.mxu1 %v12130_v0 }
  0x29   : > { %1197 = vrot.lane.b32.xlu1 %v1179_v17, %s12132_s29 }
  0x2a   : > { %7785 = vmatmul.mubr.msk.f32.gmra.mxu0 %vm398_vm1, %v389_v18  ;;  %7793 = vmatmul.mubr.msk.f32.gmra.mxu1 %vm398_vm1, %v390_v23 }
  0x2b   : > { %1195 = vrot.lane.b32.xlu0 %v1190_v16, %s12132_s29  ;;  %509 = vmatprep.mubr.f32.mxu0 %v12130_v0 }
  0x2c   : > { %610 = vmatprep.mubr.f32.mxu1 %v12130_v0 }
  0x2d   : > { %1201 = vrot.lane.b32.xlu1 %v1180_v19, %s12132_s29  ;;  %v7805_v19 = vld [vmem:[%s12119_s1 + $0x40] sm:$0xff] }
  0x2e   : > { %7786 = vmatmul.mubr.msk.f32.gmra.mxu0 %vm398_vm1, %v390_v23  ;;  %7794 = vmatmul.mubr.msk.f32.gmra.mxu1 %vm398_vm1, %v391_v25 }
  0x2f   : > { %1199 = vrot.lane.b32.xlu0 %v1191_v21, %s12132_s29  ;;  %515 = vmatprep.mubr.f32.mxu0 %v12130_v0 }
  0x30   : > { %867 = vmatprep.mubr.f32.mxu1 %v12130_v0 }
  0x31   : > { %1630 = vrot.lane.b32.xlu1 %v1625_v22, %s12136_s22 }
  0x32   : > { %7787 = vmatmul.mubr.msk.f32.gmra.mxu0 %vm398_vm1, %v391_v25 }
  0x33   : > { %1193 = vrot.lane.b32.xlu0 %v1178_v14, %s12132_s29  ;;  %586 = vmatprep.mubr.f32.mxu0 %v12130_v0 }
  0x35   : > { %1203 = vrot.lane.b32.xlu1 %v1192_v24, %s12132_s29 }
  0x36   : > { %7790 = vmatmul.mubr.msk.f32.vlgmr.msra.gmra.mxu0 %vm398_vm1, %v8643_v10 }
  0x37   : > { %1632 = vrot.lane.b32.xlu0 %v1614_v26, %s12136_s22  ;;  %592 = vmatprep.mubr.f32.mxu0 %v12130_v0 }
  0x38   : > { %7796 = vmatpush1.msk.msra.mxu0 %vm414_vm0, %v386_v12 }
  0x39   : > { %1634 = vrot.lane.b32.xlu1 %v1626_v27, %s12136_s22 }
  0x3a   : > { %7791 = vmatmul.mubr.msk.f32.gmra.mxu0 %vm398_vm1, %v8658_v15 }
  0x3b   : > { %1628 = vrot.lane.b32.xlu0 %v1613_v20, %s12136_s22  ;;  %681 = vmatprep.mubr.f32.mxu0 %v12130_v0 }
  0x3d   : > { %1638 = vrot.lane.b32.xlu1 %v1627_v29, %s12136_s22 }
  0x3e   : > { %7797 = vmatmul.mubr.msk.f32.vlgmr.msra.gmra.mxu0 %vm398_vm1, %v8643_v10  ;;  %v7803_v10 = vld [vmem:[%s12119_s1 + $0x30] sm:$0xff] }
  0x3f   : > { %1636 = vrot.lane.b32.xlu0 %v1615_v28, %s12136_s22  ;;  %687 = vmatprep.mubr.f32.mxu0 %v12130_v0  ;;  %s8508_s22 = smov 115  }
  0x41   : > { %2067 = vrot.lane.b32.xlu1 %v2049_v32, %s8502_s30 }
  0x42   : > { %7798 = vmatmul.mubr.msk.f32.gmra.mxu0 %vm398_vm1, %v8658_v15  ;;  %v7804_v15 = vld [vmem:[%s12119_s1 + $0x38] sm:$0xff] }
  0x43   : > { %2065 = vrot.lane.b32.xlu0 %v2060_v31, %s8502_s30  ;;  %693 = vmatprep.mubr.f32.mxu0 %v12130_v0 }
  0x45   : > { %2071 = vrot.lane.b32.xlu1 %v2050_v33, %s8502_s30 }
  0x46   : > { %7799 = vmatmul.mubr.msk.f32.gmra.mxu0 %vm398_vm1, %v389_v18 }
  0x47   : > { %2069 = vrot.lane.b32.xlu0 %v2061_v35, %s8502_s30  ;;  %699 = vmatprep.mubr.f32.mxu0 %v12130_v0 }
  0x49   : > { %2500 = vrot.lane.b32.xlu1 %v2495_v36, %s8503_s12  ;;  %v7830_v36 = vld [vmem:[%s12119_s1 + $0x60] sm:$0xff] }
  0x4a   : > { %7800 = vmatmul.mubr.msk.f32.gmra.mxu0 %vm398_vm1, %v390_v23  ;;  %v7806_v23 = vld [vmem:[%s12119_s1 + $0x48] sm:$0xff] }
  0x4b   : > { %2063 = vrot.lane.b32.xlu0 %v2048_v30, %s8502_s30  ;;  %705 = vmatprep.mubr.f32.mxu0 %v12130_v0  ;;  %v7828_v30 = vld [vmem:[%s12119_s1 + $0x50] sm:$0xff] }
  0x4d   : > { %2073 = vrot.lane.b32.xlu1 %v2062_v37, %s8502_s30  ;;  %v7831_v37 = vld [vmem:[%s12119_s1 + $0x68] sm:$0xff] }
  0x4e   : > { %7801 = vmatmul.mubr.msk.f32.gmra.mxu0 %vm398_vm1, %v391_v25 }
  0x4f   : > { %2502 = vrot.lane.b32.xlu0 %v2484_v38, %s8503_s12  ;;  %962 = vmatprep.mubr.f32.mxu0 %v12130_v0 }
  0x51   : > { %2504 = vrot.lane.b32.xlu1 %v2496_v39, %s8503_s12  ;;  %v7832_v39 = vld [vmem:[%s12119_s1 + $0x70] sm:$0xff] }
  0x53   : > { %2498 = vrot.lane.b32.xlu0 %v2483_v34, %s8503_s12  ;;  %v7829_v34 = vld [vmem:[%s12119_s1 + $0x58] sm:$0xff] }
  0x55   : > { %2508 = vrot.lane.b32.xlu1 %v2497_v41, %s8503_s12 }
  0x57   : > { %2506 = vrot.lane.b32.xlu0 %v2485_v40, %s8503_s12  ;;  %s8509_s12 = smov 114  }
  0x59   : > { %2939 = vrot.lane.b32.xlu1 %v2919_v44, %s8504_s13 }
  0x5b   : > { %2937 = vrot.lane.b32.xlu0 %v2932_v43, %s8504_s13 }
  0x5d   : > { %2943 = vrot.lane.b32.xlu1 %v2920_v45, %s8504_s13 }
  0x5f   : > { %2941 = vrot.lane.b32.xlu0 %v2933_v46, %s8504_s13 }
  0x61   : > { %2945 = vrot.lane.b32.xlu1 %v2934_v47, %s8504_s13  ;;  %v7854_v47 = vld [vmem:[%s12119_s1 + $0x78] sm:$0xff] }
  0x63   : > { %2935 = vrot.lane.b32.xlu0 %v2918_v42, %s8504_s13 }
  0x65   : > { %3377 = vrot.lane.b32.xlu1 %v3372_v49, %s8505_s16 }
  0x67   : > { %2947 = vrot.lane.b32.xlu0 %v2921_v50, %s8504_s13  ;;  %s8510_s13 = smov 113  }
  0x69   : > { %3375 = vrot.lane.b32.xlu1 %v3358_v48, %s8505_s16 }
  0x6b   : > { %3379 = vrot.lane.b32.xlu0 %v3359_v51, %s8505_s16 }
  0x6d   : > { %3383 = vrot.lane.b32.xlu1 %v3360_v52, %s8505_s16  ;;  %v7855_v52 = vld [vmem:[%s12119_s1 + $0x80] sm:$0xff] }
  0x6f   : > { %3381 = vrot.lane.b32.xlu0 %v3373_v53, %s8505_s16 }
  0x71   : > { %3387 = vrot.lane.b32.xlu1 %v3361_v54, %s8505_s16 }
  0x73   : > { %3385 = vrot.lane.b32.xlu0 %v3374_v55, %s8505_s16  ;;  %v7856_v55 = vld [vmem:[%s12119_s1 + $0x88] sm:$0xff]  ;;  %s8511_s16 = smov 102  }
  0x75   : > { %3819 = vrot.lane.b32.xlu1 %v3799_v58, %s8506_s24  ;;  %v7858_v58 = vld [vmem:[%s12119_s1 + $0x98] sm:$0xff] }
  0x77   : > { %3817 = vrot.lane.b32.xlu0 %v3812_v57, %s8506_s24 }
  0x79   : > { %3823 = vrot.lane.b32.xlu1 %v3800_v59, %s8506_s24 }
  0x7b   : > { %3821 = vrot.lane.b32.xlu0 %v3813_v60, %s8506_s24 }
  0x7d   : > { %3825 = vrot.lane.b32.xlu1 %v3814_v61, %s8506_s24 }
  0x7f   : > { %3815 = vrot.lane.b32.xlu0 %v3798_v56, %s8506_s24  ;;  %v7857_v56 = vld [vmem:[%s12119_s1 + $0x90] sm:$0xff] }
  0x83   : > { %3827 = vrot.lane.b32.xlu0 %v3801_v62, %s8506_s24 }
  0x8f   : > { %v759_v63 = vpop.permute.xlu1 %758 }
  0x91   : > { %v761_v1 = vpop.permute.xlu0 %760 }
  0x92   : > { %v771_v6 = vsel %vm770_vm2, %v759_v63, %v761_v1 }
  0x93   : > { %v765_v2 = vpop.permute.xlu1 %764 }
  0x95   : > { %v763_v3 = vpop.permute.xlu0 %762 }
  0x96   : > { %v772_v4 = vsel %vm770_vm2, %v761_v1, %v763_v3  ;;  %v773_v12 = vsel %vm770_vm2, %v763_v3, %v765_v2  ;;  %v7880_v3 = vld [vmem:[%s12119_s1 + $0xa0] sm:$0xff] }
  0x97   : > { %7807 = vmatprep.subr.msk.mxu1 %vm414_vm0, %v772_v4  ;;  %v769_v7 = vpop.permute.xlu1 %768 }
  0x98   : > { %7808 = vmatpush1.msk.msra.mxu1 %vm414_vm0, %v771_v6 }
  0x99   : > { %v767_v8 = vpop.permute.xlu0 %766  ;;  %7809 = vmatmul.mubr.msk.f32.vlgmr.msra.gmra.mxu1 %vm398_vm1, %v7802_v5  ;;  %7821 = vmatprep.subr.msk.mxu1 %vm414_vm0, %v769_v7 }
  0x9a   : > { %v774_v9 = vsel %vm770_vm2, %v765_v2, %v767_v8  ;;  %873 = vmatprep.mubr.f32.mxu1 %v12130_v0  ;;  %v775_v11 = vsel %vm770_vm2, %v767_v8, %v769_v7 }
  0x9b   : > { %7814 = vmatprep.subr.msk.mxu0 %vm414_vm0, %v774_v9  ;;  %7822 = vmatpush1.msk.msra.mxu1 %vm414_vm0, %v775_v11  ;;  %v1198_v13 = vpop.permute.xlu1 %1197  ;;  %v7881_v9 = vld [vmem:[%s12119_s1 + $0xa8] sm:$0xff] }
  0x9c   : > { %7815 = vmatpush1.msk.msra.mxu0 %vm414_vm0, %v773_v12  ;;  %v7882_v12 = vld [vmem:[%s12119_s1 + $0xb0] sm:$0xff] }
  0x9d   : > { %7810 = vmatmul.mubr.msk.f32.gmra.mxu1 %vm398_vm1, %v7803_v10  ;;  %7816 = vmatmul.mubr.msk.f32.vlgmr.msra.gmra.mxu0 %vm398_vm1, %v7802_v5  ;;  %v1196_v14 = vpop.permute.xlu0 %1195 }
  0x9e   : > { %879 = vmatprep.mubr.f32.mxu1 %v12130_v0  ;;  %968 = vmatprep.mubr.f32.mxu0 %v12130_v0  ;;  %v1207_v16 = vsel %vm1205_vm3, %v1196_v14, %v1198_v13 }
  0x9f   : > { %v1202_v17 = vpop.permute.xlu1 %1201  ;;  %7833 = vmatprep.subr.msk.mxu0 %vm414_vm0, %v1207_v16 }
  0xa1   : > { %7811 = vmatmul.mubr.msk.f32.gmra.mxu1 %vm398_vm1, %v7804_v15  ;;  %7817 = vmatmul.mubr.msk.f32.gmra.mxu0 %vm398_vm1, %v7803_v10  ;;  %v1200_v18 = vpop.permute.xlu0 %1199 }
  0xa2   : > { %885 = vmatprep.mubr.f32.mxu1 %v12130_v0  ;;  %974 = vmatprep.mubr.f32.mxu0 %v12130_v0  ;;  %v1209_v20 = vsel %vm1205_vm3, %v1200_v18, %v1202_v17  ;;  %v1208_v27 = vsel %vm1205_vm3, %v1198_v13, %v1200_v18 }
  0xa3   : > { %v1631_v21 = vpop.permute.xlu1 %1630  ;;  %7840 = vmatprep.subr.msk.mxu1 %vm414_vm0, %v1209_v20 }
  0xa5   : > { %7812 = vmatmul.mubr.msk.f32.gmra.mxu1 %vm398_vm1, %v7805_v19  ;;  %7818 = vmatmul.mubr.msk.f32.gmra.mxu0 %vm398_vm1, %v7804_v15  ;;  %v1194_v22 = vpop.permute.xlu0 %1193 }
  0xa6   : > { %891 = vmatprep.mubr.f32.mxu1 %v12130_v0  ;;  %980 = vmatprep.mubr.f32.mxu0 %v12130_v0  ;;  %v1206_v24 = vsel %vm1205_vm3, %v1194_v22, %v1196_v14 }
  0xa7   : > { %7834 = vmatpush1.msk.msra.mxu0 %vm414_vm0, %v1206_v24  ;;  %v1204_v25 = vpop.permute.xlu1 %1203 }
  0xa8   : > { %7847 = vmatprep.subr.msk.mxu0 %vm414_vm0, %v1204_v25  ;;  %v1210_v32 = vsel %vm1205_vm3, %v1202_v17, %v1204_v25 }
  0xa9   : > { %7813 = vmatmul.mubr.msk.f32.gmra.mxu1 %vm398_vm1, %v7806_v23  ;;  %7819 = vmatmul.mubr.msk.f32.gmra.mxu0 %vm398_vm1, %v7805_v19  ;;  %v1633_v26 = vpop.permute.xlu0 %1632 }
  0xaa   : > { %986 = vmatprep.mubr.f32.mxu0 %v12130_v0  ;;  %1057 = vmatprep.mubr.f32.mxu1 %v12130_v0  ;;  %v1642_v29 = vsel %vm1640_vm4, %v1631_v21, %v1633_v26 }
  0xab   : > { %v1635_v31 = vpop.permute.xlu1 %1634 }
  0xac   : > { %v1643_v42 = vsel %vm1640_vm4, %v1633_v26, %v1635_v31 }
  0xad   : > { %7820 = vmatmul.mubr.msk.f32.gmra.mxu0 %vm398_vm1, %v7806_v23  ;;  %7823 = vmatmul.mubr.msk.f32.vlgmr.msra.gmra.mxu1 %vm398_vm1, %v7802_v5  ;;  %v1629_v28 = vpop.permute.xlu0 %1628 }
  0xae   : > { %1063 = vmatprep.mubr.f32.mxu1 %v12130_v0  ;;  %1302 = vmatprep.mubr.f32.mxu0 %v12130_v0  ;;  %v1641_v40 = vsel %vm1640_vm4, %v1629_v28, %v1631_v21 }
  0xaf   : > { %7841 = vmatpush1.msk.msra.mxu1 %vm414_vm0, %v1208_v27  ;;  %v1639_v38 = vpop.permute.xlu1 %1638 }
  0xb0   : > { %7859 = vmatprep.subr.msk.mxu1 %vm414_vm0, %v1642_v29 }
  0xb1   : > { %7824 = vmatmul.mubr.msk.f32.gmra.mxu1 %vm398_vm1, %v7803_v10  ;;  %7835 = vmatmul.mubr.msk.f32.vlgmr.msra.gmra.mxu0 %vm398_vm1, %v7828_v30  ;;  %v1637_v33 = vpop.permute.xlu0 %1636 }
  0xb2   : > { %1069 = vmatprep.mubr.f32.mxu1 %v12130_v0  ;;  %1308 = vmatprep.mubr.f32.mxu0 %v12130_v0  ;;  %v1644_v35 = vsel %vm1640_vm4, %v1635_v31, %v1637_v33  ;;  %v1645_v49 = vsel %vm1640_vm4, %v1637_v33, %v1639_v38 }
  0xb3   : > { %7848 = vmatpush1.msk.msra.mxu0 %vm414_vm0, %v1210_v32  ;;  %v8842_v41 = vpop.permute.xlu1 %2067 }
  0xb4   : > { %7866 = vmatprep.subr.msk.mxu0 %vm414_vm0, %v1644_v35 }
  0xb5   : > { %7825 = vmatmul.mubr.msk.f32.gmra.mxu1 %vm398_vm1, %v7804_v15  ;;  %7836 = vmatmul.mubr.msk.f32.gmra.mxu0 %vm398_vm1, %v7829_v34  ;;  %v2066_v43 = vpop.permute.xlu0 %2065  ;;  %v7883_v15 = vld [vmem:[%s12119_s1 + $0xb8] sm:$0xff] }
  0xb6   : > { %1075 = vmatprep.mubr.f32.mxu1 %v12130_v0  ;;  %1314 = vmatprep.mubr.f32.mxu0 %v12130_v0  ;;  %v2077_v44 = vsel %vm2075_vm5, %v2066_v43, %v8842_v41 }
  0xb7   : > { %v2072_v45 = vpop.permute.xlu1 %2071 }
  0xb9   : > { %7826 = vmatmul.mubr.msk.f32.gmra.mxu1 %vm398_vm1, %v7805_v19  ;;  %7837 = vmatmul.mubr.msk.f32.gmra.mxu0 %vm398_vm1, %v7830_v36  ;;  %v2070_v46 = vpop.permute.xlu0 %2069  ;;  %v7884_v19 = vld [vmem:[%s12119_s1 + $0xc0] sm:$0xff] }
  0xba   : > { %1081 = vmatprep.mubr.f32.mxu1 %v12130_v0  ;;  %1320 = vmatprep.mubr.f32.mxu0 %v12130_v0  ;;  %v2079_v51 = vsel %vm2075_vm5, %v2070_v46, %v2072_v45  ;;  %v2078_v62 = vsel %vm2075_vm5, %v8842_v41, %v2070_v46 }
  0xbb   : > { %v8870_v48 = vpop.permute.xlu1 %2500 }
  0xbd   : > { %7827 = vmatmul.mubr.msk.f32.gmra.mxu1 %vm398_vm1, %v7806_v23  ;;  %7838 = vmatmul.mubr.msk.f32.gmra.mxu0 %vm398_vm1, %v7831_v37  ;;  %v2064_v50 = vpop.permute.xlu0 %2063 }
  0xbe   : > { %1326 = vmatprep.mubr.f32.mxu0 %v12130_v0  ;;  %1397 = vmatprep.mubr.f32.mxu1 %v12130_v0  ;;  %v2076_v53 = vsel %vm2075_vm5, %v2064_v50, %v2066_v43  ;;  %v7909_v50 = vld [vmem:[%s12119_s1 + $0xe0] sm:$0xff] }
  0xbf   : > { %v2074_v54 = vpop.permute.xlu1 %2073 }
  0xc0   : > { %v2080_v6 = vsel %vm2075_vm5, %v2072_v45, %v2074_v54  ;;  %vm5280_vm5 = vcmask 105472  }
  0xc1   : > { %7839 = vmatmul.mubr.msk.f32.gmra.mxu0 %vm398_vm1, %v7832_v39  ;;  %7842 = vmatmul.mubr.msk.f32.vlgmr.msra.gmra.mxu1 %vm398_vm1, %v7828_v30  ;;  %v8900_v57 = vpop.permute.xlu0 %2502 }
  0xc2   : > { %1403 = vmatprep.mubr.f32.mxu1 %v12130_v0  ;;  %1492 = vmatprep.mubr.f32.mxu0 %v12130_v0  ;;  %v2512_v2 = vsel %vm2510_vm6, %v8870_v48, %v8900_v57 }
  0xc3   : > { %7860 = vmatpush1.msk.msra.mxu1 %vm414_vm0, %v1641_v40  ;;  %v2505_v1 = vpop.permute.xlu1 %2504 }
  0xc4   : > { %7873 = vmatprep.subr.msk.mxu1 %vm414_vm0, %v1639_v38  ;;  %v2513_v25 = vsel %vm2510_vm6, %v8900_v57, %v2505_v1  ;;  %v7932_v57 = vld [vmem:[%s12119_s1 + $0xf0] sm:$0xff] }
  0xc5   : > { %7843 = vmatmul.mubr.msk.f32.gmra.mxu1 %vm398_vm1, %v7829_v34  ;;  %7849 = vmatmul.mubr.msk.f32.vlgmr.msra.gmra.mxu0 %vm398_vm1, %v7828_v30  ;;  %v2499_v59 = vpop.permute.xlu0 %2498 }
  0xc6   : > { %1409 = vmatprep.mubr.f32.mxu1 %v12130_v0  ;;  %1498 = vmatprep.mubr.f32.mxu0 %v12130_v0  ;;  %v2511_v21 = vsel %vm2510_vm6, %v2499_v59, %v8870_v48 }
  0xc7   : > { %7867 = vmatpush1.msk.msra.mxu0 %vm414_vm0, %v1643_v42  ;;  %v2509_v17 = vpop.permute.xlu1 %2508 }
  0xc8   : > { %7885 = vmatprep.subr.msk.mxu0 %vm414_vm0, %v2077_v44  ;;  %v7907_v44 = vld [vmem:[%s12119_s1 + $0xd0] sm:$0xff] }
  0xc9   : > { %7844 = vmatmul.mubr.msk.f32.gmra.mxu1 %vm398_vm1, %v7830_v36  ;;  %7850 = vmatmul.mubr.msk.f32.gmra.mxu0 %vm398_vm1, %v7829_v34  ;;  %v8931_v4 = vpop.permute.xlu0 %2506 }
  0xca   : > { %1415 = vmatprep.mubr.f32.mxu1 %v12130_v0  ;;  %1504 = vmatprep.mubr.f32.mxu0 %v12130_v0  ;;  %v2514_v8 = vsel %vm2510_vm6, %v2505_v1, %v8931_v4  ;;  %v2515_v40 = vsel %vm2510_vm6, %v8931_v4, %v2509_v17  ;;  %v7935_v4 = vld [vmem:[%s12119_s1 + $0x108] sm:$0xff]  ;;  %vm6546_vm6 = vcmask 826368  }
  0xcb   : > { %v8994_v23 = vpop.permute.xlu1 %2939 }
  0xcd   : > { %7845 = vmatmul.mubr.msk.f32.gmra.mxu1 %vm398_vm1, %v7831_v37  ;;  %7851 = vmatmul.mubr.msk.f32.gmra.mxu0 %vm398_vm1, %v7830_v36  ;;  %v2938_v26 = vpop.permute.xlu0 %2937 }
  0xce   : > { %1421 = vmatprep.mubr.f32.mxu1 %v12130_v0  ;;  %1510 = vmatprep.mubr.f32.mxu0 %v12130_v0  ;;  %v2951_v28 = vsel %vm2949_vm7, %v2938_v26, %v8994_v23 }
  0xcf   : > { %v9026_v35 = vpop.permute.xlu1 %2943 }
  0xd1   : > { %7846 = vmatmul.mubr.msk.f32.gmra.mxu1 %vm398_vm1, %v7832_v39  ;;  %7852 = vmatmul.mubr.msk.f32.gmra.mxu0 %vm398_vm1, %v7831_v37  ;;  %v2942_v32 = vpop.permute.xlu0 %2941  ;;  %v7906_v37 = vld [vmem:[%s12119_s1 + $0xc8] sm:$0xff] }
  0xd2   : > { %1516 = vmatprep.mubr.f32.mxu0 %v12130_v0  ;;  %1737 = vmatprep.mubr.f32.mxu1 %v12130_v0  ;;  %v2953_v42 = vsel %vm2949_vm7, %v2942_v32, %v9026_v35 }
  0xd3   : > { %v2946_v43 = vpop.permute.xlu1 %2945 }
  0xd5   : > { %7853 = vmatmul.mubr.msk.f32.gmra.mxu0 %vm398_vm1, %v7832_v39  ;;  %7861 = vmatmul.mubr.msk.f32.vlgmr.msra.gmra.mxu1 %vm398_vm1, %v7854_v47  ;;  %v2936_v38 = vpop.permute.xlu0 %2935 }
  0xd6   : > { %1743 = vmatprep.mubr.f32.mxu1 %v12130_v0  ;;  %1832 = vmatprep.mubr.f32.mxu0 %v12130_v0 }
  0xd7   : > { %7874 = vmatpush1.msk.msra.mxu1 %vm414_vm0, %v1645_v49  ;;  %v7908_v49 = vld [vmem:[%s12119_s1 + $0xd8] sm:$0xff] }
  0xd8   : > { %7892 = vmatprep.subr.msk.mxu1 %vm414_vm0, %v2079_v51  ;;  %v3378_v51 = vpop.permute.xlu1 %3377 }
  0xd9   : > { %7862 = vmatmul.mubr.msk.f32.gmra.mxu1 %vm398_vm1, %v7855_v52  ;;  %7868 = vmatmul.mubr.msk.f32.vlgmr.msra.gmra.mxu0 %vm398_vm1, %v7854_v47  ;;  %v2948_v45 = vpop.permute.xlu0 %2947 }
  0xda   : > { %1749 = vmatprep.mubr.f32.mxu1 %v12130_v0  ;;  %1838 = vmatprep.mubr.f32.mxu0 %v12130_v0  ;;  %v2955_v48 = vsel %vm2949_vm7, %v2946_v43, %v2948_v45  ;;  %v7960_v45 = vld [vmem:[%s12119_s1 + $0x128] sm:$0xff] }
  0xdb   : > { %7886 = vmatpush1.msk.msra.mxu0 %vm414_vm0, %v2076_v53 }
  0xdc   : > { %7899 = vmatprep.subr.msk.mxu0 %vm414_vm0, %v2074_v54  ;;  %v3376_v53 = vpop.permute.xlu1 %3375 }
  0xdd   : > { %7863 = vmatmul.mubr.msk.f32.gmra.mxu1 %vm398_vm1, %v7856_v55  ;;  %7869 = vmatmul.mubr.msk.f32.gmra.mxu0 %vm398_vm1, %v7855_v52  ;;  %v3380_v54 = vpop.permute.xlu0 %3379 }
  0xde   : > { %1755 = vmatprep.mubr.f32.mxu1 %v12130_v0  ;;  %1844 = vmatprep.mubr.f32.mxu0 %v12130_v0 }
  0xe1   : > { %7864 = vmatmul.mubr.msk.f32.gmra.mxu1 %vm398_vm1, %v7857_v56  ;;  %7870 = vmatmul.mubr.msk.f32.gmra.mxu0 %vm398_vm1, %v7856_v55  ;;  %v3382_v59 = vpop.permute.xlu0 %3381 }
  0xe2   : > { %1761 = vmatprep.mubr.f32.mxu1 %v12130_v0  ;;  %1850 = vmatprep.mubr.f32.mxu0 %v12130_v0  ;;  %v8909_v60 = vpop.f32.mrf.mxu0 }
  0xe4   : > { %v8915_v61 = vpop.f32.mrf.mxu0 }
  0xe5   : > { %7865 = vmatmul.mubr.msk.f32.gmra.mxu1 %vm398_vm1, %v7858_v58  ;;  %7871 = vmatmul.mubr.msk.f32.gmra.mxu0 %vm398_vm1, %v7857_v56 }
  0xe6   : > { %1856 = vmatprep.mubr.f32.mxu0 %v12130_v0  ;;  %1927 = vmatprep.mubr.f32.mxu1 %v12130_v0  ;;  %v8919_v63 = vpop.f32.mrf.mxu0 }
  0xe8   : > { %v8933_v5 = vpop.f32.mrf.mxu0 }
  0xe9   : > { %7872 = vmatmul.mubr.msk.f32.gmra.mxu0 %vm398_vm1, %v7858_v58  ;;  %7875 = vmatmul.mubr.msk.f32.vlgmr.msra.gmra.mxu1 %vm398_vm1, %v7854_v47  ;;  %v2950_v47 = vsel %vm2949_vm7, %v2936_v38, %v2938_v26  ;;  %v7959_v38 = vld [vmem:[%s12119_s1 + $0x120] sm:$0xff] }
  0xea   : > { %1933 = vmatprep.mubr.f32.mxu1 %v12130_v0  ;;  %2172 = vmatprep.mubr.f32.mxu0 %v12130_v0  ;;  %v8938_v7 = vpop.f32.mrf.mxu0 }
  0xeb   : > { %7893 = vmatpush1.msk.msra.mxu1 %vm414_vm0, %v2078_v62  ;;  %v2954_v62 = vsel %vm2949_vm7, %v9026_v35, %v2946_v43 }
  0xec   : > { %7911 = vmatprep.subr.msk.mxu1 %vm414_vm0, %v2512_v2  ;;  %v8949_v10 = vpop.f32.mrf.mxu0  ;;  %v7933_v2 = vld [vmem:[%s12119_s1 + $0xf8] sm:$0xff] }
  0xed   : > { %7876 = vmatmul.mubr.msk.f32.gmra.mxu1 %vm398_vm1, %v7855_v52  ;;  %7887 = vmatmul.mubr.msk.f32.vlgmr.msra.gmra.mxu0 %vm398_vm1, %v7880_v3  ;;  %v7910_v52 = vld [vmem:[%s12119_s1 + $0xe8] sm:$0xff] }
  0xee   : > { %1939 = vmatprep.mubr.f32.mxu1 %v12130_v0  ;;  %2178 = vmatprep.mubr.f32.mxu0 %v12130_v0  ;;  %v8953_v11 = vpop.f32.mrf.mxu0 }
  0xef   : > { %7900 = vmatpush1.msk.msra.mxu0 %vm414_vm0, %v2080_v6  ;;  %v7936_v6 = vld [vmem:[%s12119_s1 + $0x110] sm:$0xff] }
  0xf0   : > { %7918 = vmatprep.subr.msk.mxu0 %vm414_vm0, %v2514_v8  ;;  %v8962_v13 = vpop.f32.mrf.mxu0 }
  0xf1   : > { %7877 = vmatmul.mubr.msk.f32.gmra.mxu1 %vm398_vm1, %v7856_v55  ;;  %7888 = vmatmul.mubr.msk.f32.gmra.mxu0 %vm398_vm1, %v7881_v9  ;;  %v2952_v55 = vsel %vm2949_vm7, %v8994_v23, %v2942_v32  ;;  %vm8513_vm7 = vmmov 0  }
  0xf2   : > { %1945 = vmatprep.mubr.f32.mxu1 %v12130_v0  ;;  %2184 = vmatprep.mubr.f32.mxu0 %v12130_v0  ;;  %v8964_v14 = vpop.f32.mrf.mxu0 }
  0xf4   : > { %v8973_v16 = vpop.f32.mrf.mxu0 }
  0xf5   : > { %7878 = vmatmul.mubr.msk.f32.gmra.mxu1 %vm398_vm1, %v7857_v56  ;;  %7889 = vmatmul.mubr.msk.f32.gmra.mxu0 %vm398_vm1, %v7882_v12  ;;  %v3391_v56 = vsel %vm3389_vm9, %v3378_v51, %v3380_v54 }
  0xf6   : > { %1951 = vmatprep.mubr.f32.mxu1 %v12130_v0  ;;  %2190 = vmatprep.mubr.f32.mxu0 %v12130_v0  ;;  %v8975_v18 = vpop.f32.mrf.mxu0 }
  0xf8   : > { %v8984_v20 = vpop.f32.mrf.mxu0 }
  0xf9   : > { %7879 = vmatmul.mubr.msk.f32.gmra.mxu1 %vm398_vm1, %v7858_v58  ;;  %7890 = vmatmul.mubr.msk.f32.gmra.mxu0 %vm398_vm1, %v7883_v15  ;;  %v9094_v58 = vpop.permute.xlu1 %3383 }
  0xfa   : > { %2196 = vmatprep.mubr.f32.mxu0 %v12130_v0  ;;  %2267 = vmatprep.mubr.f32.mxu1 %v12130_v0  ;;  %v8988_v22 = vpop.f32.mrf.mxu0  ;;  %v3393_v1 = vsel %vm3389_vm9, %v3382_v59, %v9094_v58 }
  0xfc   : > { %v8996_v24 = vpop.f32.mrf.mxu0 }
  0xfd   : > { %7891 = vmatmul.mubr.msk.f32.gmra.mxu0 %vm398_vm1, %v7884_v19  ;;  %7894 = vmatmul.mubr.msk.f32.vlgmr.msra.gmra.mxu1 %vm398_vm1, %v7880_v3  ;;  %v3388_v8 = vpop.permute.xlu1 %3387 }
  0xfe   : > { %2273 = vmatprep.mubr.f32.mxu1 %v12130_v0  ;;  %2362 = vmatprep.mubr.f32.mxu0 %v12130_v0  ;;  %v9002_v27 = vpop.f32.mrf.mxu0 }
  0xff   : > { %7912 = vmatpush1.msk.msra.mxu1 %vm414_vm0, %v2511_v21 }
 0x100   : > { %7925 = vmatprep.subr.msk.mxu1 %vm414_vm0, %v2509_v17  ;;  %v685_v29 = vpop.f32.mrf.mxu0 }
 0x101   : > { %7895 = vmatmul.mubr.msk.f32.gmra.mxu1 %vm398_vm1, %v7881_v9  ;;  %7901 = vmatmul.mubr.msk.f32.vlgmr.msra.gmra.mxu0 %vm398_vm1, %v7880_v3  ;;  %718 = vst.msk [vmem:[#allocation2 + $0x28] sm:$0xff] %vm717_vm8, %v685_v29  ;;  %v7934_v3 = vld [vmem:[%s12119_s1 + $0x100] sm:$0xff]  ;;  %v9138_v17 = vpop.permute.xlu1 %3819 }
 0x102   : > { %2279 = vmatprep.mubr.f32.mxu1 %v12130_v0  ;;  %2368 = vmatprep.mubr.f32.mxu0 %v12130_v0  ;;  %v9013_v30 = vpop.f32.mrf.mxu0 }
 0x103   : > { %7919 = vmatpush1.msk.msra.mxu0 %vm414_vm0, %v2513_v25  ;;  %v9155_v25 = vpop.f32.mrf.mxu1 }
 0x104   : > { %7937 = vmatprep.subr.msk.mxu0 %vm414_vm0, %v2951_v28  ;;  %v691_v31 = vpop.f32.mrf.mxu0 }
 0x105   : > { %7896 = vmatmul.mubr.msk.f32.gmra.mxu1 %vm398_vm1, %v7882_v12  ;;  %7902 = vmatmul.mubr.msk.f32.gmra.mxu0 %vm398_vm1, %v7881_v9  ;;  %724 = vst.msk [vmem:[#allocation2 + $0x58] sm:$0xff] %vm717_vm8, %v691_v31  ;;  %v3386_v9 = vpop.permute.xlu0 %3385  ;;  %v9161_v28 = vpop.f32.mrf.mxu1  ;;  %v7958_v31 = vld [vmem:[%s12119_s1 + $0x118] sm:$0xff] }
 0x106   : > { %2285 = vmatprep.mubr.f32.mxu1 %v12130_v0  ;;  %2374 = vmatprep.mubr.f32.mxu0 %v12130_v0  ;;  %v9020_v33 = vpop.f32.mrf.mxu0  ;;  %v9163_v29 = vpop.permute.xlu1 %3823  ;;  %v3394_v35 = vsel %vm3389_vm9, %v9094_v58, %v3386_v9 }
 0x108   : > { %v697_v34 = vpop.f32.mrf.mxu0 }
 0x109   : > { %7897 = vmatmul.mubr.msk.f32.gmra.mxu1 %vm398_vm1, %v7883_v15  ;;  %7903 = vmatmul.mubr.msk.f32.gmra.mxu0 %vm398_vm1, %v7882_v12  ;;  %730 = vst.msk [vmem:[#allocation2 + $0x88] sm:$0xff] %vm717_vm8, %v697_v34  ;;  %v3390_v12 = vsel %vm3389_vm9, %v3376_v53, %v3378_v51  ;;  %v3818_v21 = vpop.permute.xlu0 %3817  ;;  %v9172_v34 = vpop.f32.mrf.mxu1 }
 0x10a   : > { %2291 = vmatprep.mubr.f32.mxu1 %v12130_v0  ;;  %2380 = vmatprep.mubr.f32.mxu0 %v12130_v0  ;;  %v9029_v36 = vpop.f32.mrf.mxu0  ;;  %v3831_v23 = vsel %vm3829_vm10, %v3818_v21, %v9138_v17 }
 0x10c   : > { %v703_v39 = vpop.f32.mrf.mxu0 }
 0x10d   : > { %7898 = vmatmul.mubr.msk.f32.gmra.mxu1 %vm398_vm1, %v7884_v19  ;;  %7904 = vmatmul.mubr.msk.f32.gmra.mxu0 %vm398_vm1, %v7883_v15  ;;  %736 = vst.msk [vmem:[#allocation2 + $0xb8] sm:$0xff] %vm717_vm8, %v703_v39  ;;  %v3395_v15 = vsel %vm3389_vm9, %v3386_v9, %v3388_v8  ;;  %v3822_v26 = vpop.permute.xlu0 %3821  ;;  %v3826_v39 = vpop.permute.xlu1 %3825 }
 0x10e   : > { %2386 = vmatprep.mubr.f32.mxu0 %v12130_v0  ;;  %2607 = vmatprep.mubr.f32.mxu1 %v12130_v0  ;;  %v9041_v41 = vpop.f32.mrf.mxu0 }
 0x110   : > { %v709_v46 = vpop.f32.mrf.mxu0 }
 0x111   : > { %7905 = vmatmul.mubr.msk.f32.gmra.mxu0 %vm398_vm1, %v7884_v19  ;;  %7913 = vmatmul.mubr.msk.f32.vlgmr.msra.gmra.mxu1 %vm398_vm1, %v7906_v37  ;;  %742 = vst.msk [vmem:[#allocation2 + $0xe8] sm:$0xff] %vm717_vm8, %v709_v46  ;;  %v3392_v19 = vsel %vm3389_vm9, %v3380_v54, %v3382_v59  ;;  %v3816_v32 = vpop.permute.xlu0 %3815  ;;  %v9245_v59 = vld [vmem:[%s12119_s1 + $0x140] sm:$0xff] }
 0x112   : > { %2613 = vmatprep.mubr.f32.mxu1 %v12130_v0  ;;  %2702 = vmatprep.mubr.f32.mxu0 %v12130_v0  ;;  %v3830_v43 = vsel %vm3829_vm10, %v3816_v32, %v3818_v21 }
 0x113   : > { %7926 = vmatpush1.msk.msra.mxu1 %vm414_vm0, %v2515_v40 }
 0x114   : > { %7944 = vmatprep.subr.msk.mxu1 %vm414_vm0, %v2953_v42  ;;  %v9185_v42 = vpop.f32.mrf.mxu1 }
 0x115   : > { %7914 = vmatmul.mubr.msk.f32.gmra.mxu1 %vm398_vm1, %v7907_v44  ;;  %7920 = vmatmul.mubr.msk.f32.vlgmr.msra.gmra.mxu0 %vm398_vm1, %v7906_v37  ;;  %v3828_v40 = vpop.permute.xlu0 %3827 }
 0x116   : > { %2619 = vmatprep.mubr.f32.mxu1 %v12130_v0  ;;  %2708 = vmatprep.mubr.f32.mxu0 %v12130_v0  ;;  %v9198_v46 = vpop.f32.mrf.mxu1 }
 0x117   : > { %7938 = vmatpush1.msk.msra.mxu0 %vm414_vm0, %v2950_v47  ;;  %v7961_v47 = vld [vmem:[%s12119_s1 + $0x130] sm:$0xff] }
 0x118   : > { %7951 = vmatprep.subr.msk.mxu0 %vm414_vm0, %v2955_v48  ;;  %v9209_v48 = vpop.f32.mrf.mxu1 }
 0x119   : > { %7915 = vmatmul.mubr.msk.f32.gmra.mxu1 %vm398_vm1, %v7908_v49  ;;  %7921 = vmatmul.mubr.msk.f32.gmra.mxu0 %vm398_vm1, %v7907_v44  ;;  %12142 = vst [vmem:[#allocation9_spill] sm:$0xff] %v9209_v48 }
 0x11a   : > { %2625 = vmatprep.mubr.f32.mxu1 %v12130_v0  ;;  %2714 = vmatprep.mubr.f32.mxu0 %v12130_v0 }
 0x11d   : > { %7916 = vmatmul.mubr.msk.f32.gmra.mxu1 %vm398_vm1, %v7909_v50  ;;  %7922 = vmatmul.mubr.msk.f32.gmra.mxu0 %vm398_vm1, %v7908_v49 }
 0x11e   : > { %2631 = vmatprep.mubr.f32.mxu1 %v12130_v0  ;;  %2720 = vmatprep.mubr.f32.mxu0 %v12130_v0 }
 0x121   : > { %7917 = vmatmul.mubr.msk.f32.gmra.mxu1 %vm398_vm1, %v7910_v52  ;;  %7923 = vmatmul.mubr.msk.f32.gmra.mxu0 %vm398_vm1, %v7909_v50 }
 0x122   : > { %2726 = vmatprep.mubr.f32.mxu0 %v12130_v0  ;;  %2797 = vmatprep.mubr.f32.mxu1 %v12130_v0 }
 0x125   : > { %7924 = vmatmul.mubr.msk.f32.gmra.mxu0 %vm398_vm1, %v7910_v52  ;;  %7927 = vmatmul.mubr.msk.f32.vlgmr.msra.gmra.mxu1 %vm398_vm1, %v7906_v37  ;;  %v3833_v37 = vsel %vm3829_vm10, %v3822_v26, %v9163_v29 }
 0x126   : > { %2803 = vmatprep.mubr.f32.mxu1 %v12130_v0  ;;  %3047 = vmatprep.mubr.f32.mxu0 %v12130_v0 }
 0x127   : > { %7945 = vmatpush1.msk.msra.mxu1 %vm414_vm0, %v2952_v55 }
 0x128   : > { %7963 = vmatprep.subr.msk.mxu1 %vm414_vm0, %v3391_v56  ;;  %v3832_v56 = vsel %vm3829_vm10, %v9138_v17, %v3822_v26  ;;  %v9285_v17 = vld [vmem:[%s12119_s1 + $0x150] sm:$0xff] }
 0x129   : > { %7928 = vmatmul.mubr.msk.f32.gmra.mxu1 %vm398_vm1, %v7907_v44  ;;  %7939 = vmatmul.mubr.msk.f32.vlgmr.msra.gmra.mxu0 %vm398_vm1, %v7932_v57  ;;  %v3835_v44 = vsel %vm3829_vm10, %v3826_v39, %v3828_v40 }
 0x12a   : > { %2809 = vmatprep.mubr.f32.mxu1 %v12130_v0  ;;  %3053 = vmatprep.mubr.f32.mxu0 %v12130_v0 }
 0x12b   : > { %7952 = vmatpush1.msk.msra.mxu0 %vm414_vm0, %v2954_v62 }
 0x12c   : > { %7970 = vmatprep.subr.msk.mxu0 %vm414_vm0, %v3393_v1 }
 0x12d   : > { %7929 = vmatmul.mubr.msk.f32.gmra.mxu1 %vm398_vm1, %v7908_v49  ;;  %7940 = vmatmul.mubr.msk.f32.gmra.mxu0 %vm398_vm1, %v7933_v2 }
 0x12e   : > { %2815 = vmatprep.mubr.f32.mxu1 %v12130_v0  ;;  %3059 = vmatprep.mubr.f32.mxu0 %v12130_v0 }
 0x131   : > { %7930 = vmatmul.mubr.msk.f32.gmra.mxu1 %vm398_vm1, %v7909_v50  ;;  %7941 = vmatmul.mubr.msk.f32.gmra.mxu0 %vm398_vm1, %v7934_v3  ;;  %v7962_v50 = vld [vmem:[%s12119_s1 + $0x138] sm:$0xff] }
 0x132   : > { %2821 = vmatprep.mubr.f32.mxu1 %v12130_v0  ;;  %3065 = vmatprep.mubr.f32.mxu0 %v12130_v0 }
 0x135   : > { %7931 = vmatmul.mubr.msk.f32.gmra.mxu1 %vm398_vm1, %v7910_v52  ;;  %7942 = vmatmul.mubr.msk.f32.gmra.mxu0 %vm398_vm1, %v7935_v4 }
 0x136   : > { %3071 = vmatprep.mubr.f32.mxu0 %v12130_v0  ;;  %3142 = vmatprep.mubr.f32.mxu1 %v12130_v0 }
 0x139   : > { %7943 = vmatmul.mubr.msk.f32.gmra.mxu0 %vm398_vm1, %v7936_v6  ;;  %7946 = vmatmul.mubr.msk.f32.vlgmr.msra.gmra.mxu1 %vm398_vm1, %v7932_v57 }
 0x13a   : > { %3148 = vmatprep.mubr.f32.mxu1 %v12130_v0  ;;  %3237 = vmatprep.mubr.f32.mxu0 %v12130_v0 }
 0x13b   : > { %7964 = vmatpush1.msk.msra.mxu1 %vm414_vm0, %v3390_v12 }
 0x13c   : > { %7977 = vmatprep.subr.msk.mxu1 %vm414_vm0, %v3395_v15 }
 0x13d   : > { %7947 = vmatmul.mubr.msk.f32.gmra.mxu1 %vm398_vm1, %v7933_v2  ;;  %7953 = vmatmul.mubr.msk.f32.vlgmr.msra.gmra.mxu0 %vm398_vm1, %v7932_v57 }
 0x13e   : > { %3154 = vmatprep.mubr.f32.mxu1 %v12130_v0  ;;  %3243 = vmatprep.mubr.f32.mxu0 %v12130_v0 }
 0x13f   : > { %7971 = vmatpush1.msk.msra.mxu0 %vm414_vm0, %v3392_v19 }
 0x140   : > { %7989 = vmatprep.subr.msk.mxu0 %vm414_vm0, %v3831_v23 }
 0x141   : > { %7948 = vmatmul.mubr.msk.f32.gmra.mxu1 %vm398_vm1, %v7934_v3  ;;  %7954 = vmatmul.mubr.msk.f32.gmra.mxu0 %vm398_vm1, %v7933_v2  ;;  %v3834_v2 = vsel %vm3829_vm10, %v9163_v29, %v3826_v39  ;;  %v9303_v29 = vld [vmem:[%s12119_s1 + $0x158] sm:$0xff] }
 0x142   : > { %3160 = vmatprep.mubr.f32.mxu1 %v12130_v0  ;;  %3249 = vmatprep.mubr.f32.mxu0 %v12130_v0 }
 0x145   : > { %7949 = vmatmul.mubr.msk.f32.gmra.mxu1 %vm398_vm1, %v7935_v4  ;;  %7955 = vmatmul.mubr.msk.f32.gmra.mxu0 %vm398_vm1, %v7934_v3 }
 0x146   : > { %3166 = vmatprep.mubr.f32.mxu1 %v12130_v0  ;;  %3255 = vmatprep.mubr.f32.mxu0 %v12130_v0 }
 0x149   : > { %7950 = vmatmul.mubr.msk.f32.gmra.mxu1 %vm398_vm1, %v7936_v6  ;;  %7956 = vmatmul.mubr.msk.f32.gmra.mxu0 %vm398_vm1, %v7935_v4 }
 0x14a   : > { %3261 = vmatprep.mubr.f32.mxu0 %v12130_v0  ;;  %3487 = vmatprep.mubr.f32.mxu1 %v12130_v0 }
 0x14d   : > { %7957 = vmatmul.mubr.msk.f32.gmra.mxu0 %vm398_vm1, %v7936_v6  ;;  %7965 = vmatmul.mubr.msk.f32.vlgmr.msra.gmra.mxu1 %vm398_vm1, %v7958_v31  ;;  %v9266_v6 = vld [vmem:[%s12119_s1 + $0x148] sm:$0xff] }
 0x14e   : > { %3493 = vmatprep.mubr.f32.mxu1 %v12130_v0  ;;  %3582 = vmatprep.mubr.f32.mxu0 %v12130_v0 }
 0x14f   : > { %7978 = vmatpush1.msk.msra.mxu1 %vm414_vm0, %v3394_v35  ;;  %v1093_v35 = vld [vmem:[#allocation2 + $0x28] sm:$0xff] }
 0x150   : > { %7996 = vmatprep.subr.msk.mxu1 %vm414_vm0, %v3833_v37 }
 0x151   : > { %7966 = vmatmul.mubr.msk.f32.gmra.mxu1 %vm398_vm1, %v7959_v38  ;;  %7972 = vmatmul.mubr.msk.f32.vlgmr.msra.gmra.mxu0 %vm398_vm1, %v7958_v31 }
 0x152   : > { %3499 = vmatprep.mubr.f32.mxu1 %v12130_v0  ;;  %3588 = vmatprep.mubr.f32.mxu0 %v12130_v0 }
 0x153   : > { %7990 = vmatpush1.msk.msra.mxu0 %vm414_vm0, %v3830_v43 }
 0x154   : > { %8003 = vmatprep.subr.msk.mxu0 %vm414_vm0, %v3835_v44 }
 0x155   : > { %7967 = vmatmul.mubr.msk.f32.gmra.mxu1 %vm398_vm1, %v7960_v45  ;;  %7973 = vmatmul.mubr.msk.f32.gmra.mxu0 %vm398_vm1, %v7959_v38 }
 0x156   : > { %3505 = vmatprep.mubr.f32.mxu1 %v12130_v0  ;;  %3594 = vmatprep.mubr.f32.mxu0 %v12130_v0 }
 0x159   : > { %v869_v49 = vpop.f32.mrf.mxu1  ;;  %7968 = vmatmul.mubr.msk.f32.gmra.mxu1 %vm398_vm1, %v7961_v47  ;;  %7974 = vmatmul.mubr.msk.f32.gmra.mxu0 %vm398_vm1, %v7960_v45 }
 0x15a   : > { %3511 = vmatprep.mubr.f32.mxu1 %v12130_v0  ;;  %3600 = vmatprep.mubr.f32.mxu0 %v12130_v0  ;;  %v1118_v37 = vadd.f32 %v869_v49, %v8909_v60  ;;  %v9321_v60 = vld [vmem:[%s12119_s1 + $0x160] sm:$0xff] }
 0x15b   : > { %v9218_v51 = vpop.f32.mrf.mxu1 }
 0x15d   : > { %v9220_v52 = vpop.f32.mrf.mxu1  ;;  %v9222_v53 = vpop.f32.mrf.mxu0  ;;  %7969 = vmatmul.mubr.msk.f32.gmra.mxu1 %vm398_vm1, %v7962_v50  ;;  %7975 = vmatmul.mubr.msk.f32.gmra.mxu0 %vm398_vm1, %v7961_v47 }
 0x15e   : > { %3606 = vmatprep.mubr.f32.mxu0 %v12130_v0  ;;  %3677 = vmatprep.mubr.f32.mxu1 %v12130_v0  ;;  %v1124_v49 = vadd.f32 %v9220_v52, %v8919_v63  ;;  %v1105_v63 = vld [vmem:[#allocation2 + $0x88] sm:$0xff] }
 0x15f   : > { %v9228_v54 = vpop.f32.mrf.mxu1  ;;  %v9230_v55 = vpop.f32.mrf.mxu0 }
 0x161   : > { %v9234_v57 = vpop.f32.mrf.mxu1  ;;  %v9236_v58 = vpop.f32.mrf.mxu0  ;;  %7976 = vmatmul.mubr.msk.f32.gmra.mxu0 %vm398_vm1, %v7962_v50  ;;  %7979 = vmatmul.mubr.msk.f32.vlgmr.msra.gmra.mxu1 %vm398_vm1, %v7958_v31 }
 0x162   : > { %3683 = vmatprep.mubr.f32.mxu1 %v12130_v0  ;;  %3927 = vmatprep.mubr.f32.mxu0 %v12130_v0 }
 0x163   : > { %v9247_v62 = vpop.f32.mrf.mxu1  ;;  %v9249_v1 = vpop.f32.mrf.mxu0  ;;  %7997 = vmatpush1.msk.msra.mxu1 %vm414_vm0, %v3832_v56 }
 0x165   : > { %v9254_v3 = vpop.f32.mrf.mxu1  ;;  %v9256_v4 = vpop.f32.mrf.mxu0  ;;  %7980 = vmatmul.mubr.msk.f32.gmra.mxu1 %vm398_vm1, %v7959_v38  ;;  %7991 = vmatmul.mubr.msk.f32.vlgmr.msra.gmra.mxu0 %vm398_vm1, %v9245_v59 }
 0x166   : > { %3689 = vmatprep.mubr.f32.mxu1 %v12130_v0  ;;  %3933 = vmatprep.mubr.f32.mxu0 %v12130_v0 }
 0x167   : > { %v9268_v8 = vpop.f32.mrf.mxu1  ;;  %v9270_v9 = vpop.f32.mrf.mxu0  ;;  %8004 = vmatpush1.msk.msra.mxu0 %vm414_vm0, %v3834_v2  ;;  %vm5738_vm0 = vcmask 941056  }
 0x169   : > { %v9273_v12 = vpop.f32.mrf.mxu1  ;;  %v9275_v15 = vpop.f32.mrf.mxu0  ;;  %7981 = vmatmul.mubr.msk.f32.gmra.mxu1 %vm398_vm1, %v7960_v45  ;;  %7992 = vmatmul.mubr.msk.f32.gmra.mxu0 %vm398_vm1, %v9266_v6  ;;  %v1099_v45 = vld [vmem:[#allocation2 + $0x58] sm:$0xff] }
 0x16a   : > { %3695 = vmatprep.mubr.f32.mxu1 %v12130_v0  ;;  %3939 = vmatprep.mubr.f32.mxu0 %v12130_v0 }
 0x16b   : > { %v9287_v19 = vpop.f32.mrf.mxu1  ;;  %v9289_v21 = vpop.f32.mrf.mxu0 }
 0x16c   : > { %12143 = vst [vmem:[#allocation10_spill] sm:$0xff] %v9289_v21 }
 0x16d   : > { %v9291_v23 = vpop.f32.mrf.mxu0  ;;  %v9293_v26 = vpop.f32.mrf.mxu1  ;;  %7982 = vmatmul.mubr.msk.f32.gmra.mxu1 %vm398_vm1, %v7961_v47  ;;  %7993 = vmatmul.mubr.msk.f32.gmra.mxu0 %vm398_vm1, %v9285_v17 }
 0x16e   : > { %3701 = vmatprep.mubr.f32.mxu1 %v12130_v0  ;;  %3945 = vmatprep.mubr.f32.mxu0 %v12130_v0 }
 0x16f   : > { %v9305_v31 = vpop.f32.mrf.mxu0  ;;  %v1061_v32 = vpop.f32.mrf.mxu1 }
 0x170   : > { %12144 = vst [vmem:[#allocation11_spill] sm:$0xff] %v9305_v31  ;;  %v1123_v38 = vadd.f32 %v1093_v35, %v1061_v32 }
 0x171   : > { %v9308_v39 = vpop.f32.mrf.mxu1  ;;  %v1304_v40 = vpop.f32.mrf.mxu0  ;;  %7983 = vmatmul.mubr.msk.f32.gmra.mxu1 %vm398_vm1, %v7962_v50  ;;  %7994 = vmatmul.mubr.msk.f32.gmra.mxu0 %vm398_vm1, %v9303_v29 }
 0x172   : > { %1153 = vst.msk [vmem:[#allocation2 + $0x28] sm:$0xff] %vm717_vm8, %v1123_v38  ;;  %v9314_v43 = vadd.f32 %v1304_v40, %v1118_v37  ;;  %3951 = vmatprep.mubr.f32.mxu0 %v12130_v0  ;;  %4022 = vmatprep.mubr.f32.mxu1 %v12130_v0  ;;  %v1130_v37 = vadd.f32 %v9234_v57, %v8938_v7  ;;  %v1111_v7 = vld [vmem:[#allocation2 + $0xb8] sm:$0xff] }
 0x173   : > { %v1067_v44 = vpop.f32.mrf.mxu1  ;;  %v9323_v47 = vpop.f32.mrf.mxu0 }
 0x174   : > { %v1129_v50 = vadd.f32 %v1099_v45, %v1067_v44 }
 0x175   : > { %v9327_v56 = vpop.f32.mrf.mxu1  ;;  %v1310_v2 = vpop.f32.mrf.mxu0  ;;  %7995 = vmatmul.mubr.msk.f32.gmra.mxu0 %vm398_vm1, %v9321_v60  ;;  %7998 = vmatmul.mubr.msk.f32.vlgmr.msra.gmra.mxu1 %vm398_vm1, %v9245_v59 }
 0x176   : > { %1159 = vst.msk [vmem:[#allocation2 + $0x58] sm:$0xff] %vm717_vm8, %v1129_v50  ;;  %v9334_v32 = vadd.f32 %v1310_v2, %v1124_v49  ;;  %4028 = vmatprep.mubr.f32.mxu1 %v12130_v0  ;;  %4117 = vmatprep.mubr.f32.mxu0 %v12130_v0  ;;  %v1136_v50 = vadd.f32 %v9254_v3, %v8953_v11  ;;  %v1117_v11 = vld [vmem:[#allocation2 + $0xe8] sm:$0xff] }
 0x177   : > { %v1073_v35 = vpop.f32.mrf.mxu1  ;;  %v9338_v52 = vpop.f32.mrf.mxu0 }
 0x178   : > { %v1135_v38 = vadd.f32 %v1105_v63, %v1073_v35 }
 0x179   : > { %v9342_v40 = vpop.f32.mrf.mxu1  ;;  %v1316_v44 = vpop.f32.mrf.mxu0  ;;  %7999 = vmatmul.mubr.msk.f32.gmra.mxu1 %vm398_vm1, %v9266_v6  ;;  %8005 = vmatmul.mubr.msk.f32.vlgmr.msra.gmra.mxu0 %vm398_vm1, %v9245_v59 }
 0x17a   : > { %1165 = vst.msk [vmem:[#allocation2 + $0x88] sm:$0xff] %vm717_vm8, %v1135_v38  ;;  %v9349_v45 = vadd.f32 %v1316_v44, %v1130_v37  ;;  %4034 = vmatprep.mubr.f32.mxu1 %v12130_v0  ;;  %4123 = vmatprep.mubr.f32.mxu0 %v12130_v0  ;;  %v1120_v38 = vadd.f32 %v9222_v53, %v8975_v18 }
 0x17b   : > { %v1079_v49 = vpop.f32.mrf.mxu1  ;;  %v9353_v57 = vpop.f32.mrf.mxu0  ;;  %v1142_v44 = vadd.f32 %v9273_v12, %v8964_v14  ;;  %v1126_v53 = vadd.f32 %v9236_v58, %v8988_v22  ;;  %v1122_v12 = vadd.f32 %v9293_v26, %v9002_v27  ;;  %v1528_v22 = vld [vmem:[#allocation2 + $0x28] sm:$0xff]  ;;  %v1132_v27 = vadd.f32 %v9256_v4, %v9155_v25 }
 0x17c   : > { %v1141_v2 = vadd.f32 %v1111_v7, %v1079_v49  ;;  %v1128_v58 = vadd.f32 %v9308_v39, %v9013_v30  ;;  %v1138_v25 = vadd.f32 %v9275_v15, %v9172_v34  ;;  %v1134_v30 = vadd.f32 %v9327_v56, %v9020_v33 }
 0x17d   : > { %v9357_v35 = vpop.f32.mrf.mxu1  ;;  %v1322_v63 = vpop.f32.mrf.mxu0  ;;  %8000 = vmatmul.mubr.msk.f32.gmra.mxu1 %vm398_vm1, %v9285_v17  ;;  %8006 = vmatmul.mubr.msk.f32.gmra.mxu0 %vm398_vm1, %v9266_v6  ;;  %v1140_v34 = vadd.f32 %v9342_v40, %v9029_v36 }
 0x17e   : > { %1171 = vst.msk [vmem:[#allocation2 + $0xb8] sm:$0xff] %vm717_vm8, %v1141_v2  ;;  %v9364_v59 = vadd.f32 %v1322_v63, %v1136_v50  ;;  %4040 = vmatprep.mubr.f32.mxu1 %v12130_v0  ;;  %4129 = vmatprep.mubr.f32.mxu0 %v12130_v0 }
 0x17f   : > { %v1085_v37 = vpop.f32.mrf.mxu1  ;;  %v9368_v3 = vpop.f32.mrf.mxu0 }
 0x180   : > { %v1147_v49 = vadd.f32 %v1117_v11, %v1085_v37 }
 0x181   : > { %v1328_v6 = vpop.f32.mrf.mxu0  ;;  %v1399_v7 = vpop.f32.mrf.mxu1  ;;  %8001 = vmatmul.mubr.msk.f32.gmra.mxu1 %vm398_vm1, %v9303_v29  ;;  %8007 = vmatmul.mubr.msk.f32.gmra.mxu0 %vm398_vm1, %v9285_v17 }
 0x182   : > { %1177 = vst.msk [vmem:[#allocation2 + $0xe8] sm:$0xff] %vm717_vm8, %v1147_v49  ;;  %v9379_v50 = vadd.f32 %v1328_v6, %v1142_v44  ;;  %v9381_v2 = vadd.f32 %v1399_v7, %v1120_v38  ;;  %4046 = vmatprep.mubr.f32.mxu1 %v12130_v0  ;;  %4135 = vmatprep.mubr.f32.mxu0 %v12130_v0 }
 0x183   : > { %v9385_v14 = vpop.f32.mrf.mxu0  ;;  %v9387_v18 = vpop.f32.mrf.mxu1 }
 0x185   : > { %v1405_v17 = vpop.f32.mrf.mxu1  ;;  %v1494_v63 = vpop.f32.mrf.mxu0  ;;  %8002 = vmatmul.mubr.msk.f32.gmra.mxu1 %vm398_vm1, %v9321_v60  ;;  %8008 = vmatmul.mubr.msk.f32.gmra.mxu0 %vm398_vm1, %v9303_v29 }
 0x186   : > { %v1561_v37 = vadd.f32 %v1405_v17, %v1126_v53  ;;  %v9397_v11 = vadd.f32 %v1494_v63, %v1122_v12  ;;  %4141 = vmatprep.mubr.f32.mxu0 %v12130_v0  ;;  %v1534_v17 = vld [vmem:[#allocation2 + $0x58] sm:$0xff] }
 0x187   : > { %v9400_v38 = vpop.f32.mrf.mxu1  ;;  %v1496_v44 = vpop.f32.mrf.mxu0 }
 0x188   : > { %12145 = vst [vmem:[#allocation12_spill] sm:$0xff] %v9400_v38  ;;  %v1558_v26 = vadd.f32 %v1528_v22, %v1496_v44 }
 0x189   : > { %v1411_v49 = vpop.f32.mrf.mxu1  ;;  %v1500_v6 = vpop.f32.mrf.mxu0  ;;  %8009 = vmatmul.mubr.msk.f32.gmra.mxu0 %vm398_vm1, %v9321_v60  ;;  %vm6142_vm1 = vcmask 924672  }
 0x18a   : > { %1588 = vst.msk [vmem:[#allocation2 + $0x28] sm:$0xff] %vm717_vm8, %v1558_v26  ;;  %v1567_v29 = vadd.f32 %v1411_v49, %v1132_v27  ;;  %v9409_v7 = vadd.f32 %v1500_v6, %v1128_v58  ;;  %v1540_v58 = vld [vmem:[#allocation2 + $0x88] sm:$0xff]  ;;  %v1144_v26 = vadd.f32 %v9291_v23, %v9198_v46 }
 0x18b   : > { %v9411_v53 = vpop.f32.mrf.mxu1  ;;  %v1502_v12 = vpop.f32.mrf.mxu0 }
 0x18c   : > { %12146 = vst [vmem:[#allocation13_spill] sm:$0xff] %v9411_v53  ;;  %v1564_v4 = vadd.f32 %v1534_v17, %v1502_v12 }
 0x18d   : > { %v1417_v39 = vpop.f32.mrf.mxu1  ;;  %v1506_v63 = vpop.f32.mrf.mxu0 }
 0x18e   : > { %1594 = vst.msk [vmem:[#allocation2 + $0x58] sm:$0xff] %vm717_vm8, %v1564_v4  ;;  %v1573_v60 = vadd.f32 %v1417_v39, %v1138_v25  ;;  %v9418_v44 = vadd.f32 %v1506_v63, %v1134_v30  ;;  %v1546_v25 = vld [vmem:[#allocation2 + $0xb8] sm:$0xff]  ;;  %v1146_v30 = vadd.f32 %v9357_v35, %v9041_v41  ;;  %v1552_v63 = vld [vmem:[#allocation2 + $0xe8] sm:$0xff] }
 0x18f   : > { %v9420_v22 = vpop.f32.mrf.mxu1  ;;  %v1508_v27 = vpop.f32.mrf.mxu0 }
 0x190   : > { %12147 = vst [vmem:[#allocation14_spill] sm:$0xff] %v9420_v22  ;;  %v1570_v15 = vadd.f32 %v1540_v58, %v1508_v27 }
 0x191   : > { %v1423_v33 = vpop.f32.mrf.mxu1  ;;  %v1512_v56 = vpop.f32.mrf.mxu0 }
 0x192   : > { %1600 = vst.msk [vmem:[#allocation2 + $0x88] sm:$0xff] %vm717_vm8, %v1570_v15  ;;  %v1579_v49 = vadd.f32 %v1423_v33, %v1144_v26  ;;  %v9427_v6 = vadd.f32 %v1512_v56, %v1140_v34 }
 0x193   : > { %v9429_v12 = vpop.f32.mrf.mxu1  ;;  %v1514_v17 = vpop.f32.mrf.mxu0 }
 0x194   : > { %12148 = vst [vmem:[#allocation15_spill] sm:$0xff] %v9429_v12  ;;  %v1576_v4 = vadd.f32 %v1546_v25, %v1514_v17 }
 0x195   : > { %v1518_v46 = vpop.f32.mrf.mxu0  ;;  %v1739_v23 = vpop.f32.mrf.mxu1 }
 0x196   : > { %1606 = vst.msk [vmem:[#allocation2 + $0xb8] sm:$0xff] %vm717_vm8, %v1576_v4  ;;  %v9434_v36 = vadd.f32 %v1518_v46, %v1146_v30  ;;  %v1988_v40 = vadd.f32 %v1739_v23, %v9314_v43 }
 0x197   : > { %v1520_v39 = vpop.f32.mrf.mxu0  ;;  %v9437_v27 = vpop.f32.mrf.mxu1 }
 0x198   : > { %v1582_v58 = vadd.f32 %v1552_v63, %v1520_v39 }
 0x199   : > { %v1745_v26 = vpop.f32.mrf.mxu1  ;;  %v1834_v34 = vpop.f32.mrf.mxu0 }
 0x19a   : > { %1612 = vst.msk [vmem:[#allocation2 + $0xe8] sm:$0xff] %vm717_vm8, %v1582_v58  ;;  %v1994_v41 = vadd.f32 %v1745_v26, %v9334_v32  ;;  %v9442_v35 = vadd.f32 %v1834_v34, %v9381_v2 }
 0x19b   : > { %v9444_v15 = vpop.f32.mrf.mxu1  ;;  %v9446_v33 = vpop.f32.mrf.mxu0 }
 0x19d   : > { %v1751_v56 = vpop.f32.mrf.mxu1  ;;  %v1840_v43 = vpop.f32.mrf.mxu0 }
 0x19e   : > { %v2000_v17 = vadd.f32 %v1751_v56, %v9349_v45  ;;  %v9449_v25 = vadd.f32 %v1840_v43, %v1561_v37 }
 0x19f   : > { %v9451_v30 = vpop.f32.mrf.mxu1  ;;  %v9453_v4 = vpop.f32.mrf.mxu0 }
 0x1a0   : > { %12149 = vst [vmem:[#allocation16_spill] sm:$0xff] %v9453_v4  ;;  %v1981_v4 = vld [vmem:[#allocation2 + $0xb8] sm:$0xff] }
 0x1a1   : > { %v1757_v46 = vpop.f32.mrf.mxu1  ;;  %v1846_v23 = vpop.f32.mrf.mxu0  ;;  %v1987_v31 = vld [vmem:[#allocation2 + $0xe8] sm:$0xff] }
 0x1a2   : > { %v2006_v32 = vadd.f32 %v1757_v46, %v9364_v59  ;;  %v9456_v2 = vadd.f32 %v1846_v23, %v1567_v29  ;;  %v1963_v23 = vld [vmem:[#allocation2 + $0x28] sm:$0xff] }
 0x1a3   : > { %v9458_v39 = vpop.f32.mrf.mxu1  ;;  %v9460_v63 = vpop.f32.mrf.mxu0 }
 0x1a4   : > { %12150 = vst [vmem:[#allocation17_spill] sm:$0xff] %v9460_v63 }
 0x1a5   : > { %v1763_v58 = vpop.f32.mrf.mxu1  ;;  %v1852_v26 = vpop.f32.mrf.mxu0 }
 0x1a6   : > { %v2012_v45 = vadd.f32 %v1763_v58, %v9379_v50  ;;  %v9463_v37 = vadd.f32 %v1852_v26, %v1573_v60  ;;  %v1969_v26 = vld [vmem:[#allocation2 + $0x58] sm:$0xff] }
 0x1a7   : > { %v9465_v34 = vpop.f32.mrf.mxu1  ;;  %v9467_v56 = vpop.f32.mrf.mxu0 }
 0x1a8   : > { %12151 = vst [vmem:[#allocation18_spill] sm:$0xff] %v9467_v56 }
 0x1a9   : > { %v1858_v43 = vpop.f32.mrf.mxu0  ;;  %v1929_v0 = vpop.f32.mrf.mxu1 }
 0x1aa   : > { %v9469_v12 = vadd.f32 %v1858_v43, %v1579_v49  ;;  %v1992_v59 = vadd.f32 %v1929_v0, %v9397_v11 }
 0x1ab   : > { %v9472_v29 = vpop.f32.mrf.mxu0  ;;  %v1931_v46 = vpop.f32.mrf.mxu1 }
 0x1ac   : > { %12152 = vst [vmem:[#allocation19_spill] sm:$0xff] %v9472_v29  ;;  %v1993_v22 = vadd.f32 %v1963_v23, %v1931_v46  ;;  %v1975_v29 = vld [vmem:[#allocation2 + $0x88] sm:$0xff] }
 0x1ad   : > { %v1935_v63 = vpop.f32.mrf.mxu1  ;;  %v2174_v53 = vpop.f32.mrf.mxu0 }
 0x1ae   : > { %2023 = vst.msk [vmem:[#allocation2 + $0x28] sm:$0xff] %vm717_vm8, %v1993_v22  ;;  %v1998_v50 = vadd.f32 %v1935_v63, %v9409_v7  ;;  %v9476_v60 = vadd.f32 %v2174_v53, %v1988_v40 }
 0x1af   : > { %v1937_v58 = vpop.f32.mrf.mxu1  ;;  %v9478_v56 = vpop.f32.mrf.mxu0 }
 0x1b0   : > { %v1999_v49 = vadd.f32 %v1969_v26, %v1937_v58 }
 0x1b1   : > { %v1941_v43 = vpop.f32.mrf.mxu1  ;;  %v2180_v0 = vpop.f32.mrf.mxu0 }
 0x1b2   : > { %2029 = vst.msk [vmem:[#allocation2 + $0x58] sm:$0xff] %vm717_vm8, %v1999_v49  ;;  %v2004_v11 = vadd.f32 %v1941_v43, %v9418_v44  ;;  %v9482_v46 = vadd.f32 %v2180_v0, %v1994_v41 }
 0x1b3   : > { %v1943_v23 = vpop.f32.mrf.mxu1  ;;  %v9484_v22 = vpop.f32.mrf.mxu0 }
 0x1b4   : > { %v2005_v7 = vadd.f32 %v1975_v29, %v1943_v23 }
 0x1b5   : > { %v1947_v53 = vpop.f32.mrf.mxu1  ;;  %v2186_v40 = vpop.f32.mrf.mxu0 }
 0x1b6   : > { %2035 = vst.msk [vmem:[#allocation2 + $0x88] sm:$0xff] %vm717_vm8, %v2005_v7  ;;  %v2010_v63 = vadd.f32 %v1947_v53, %v9427_v6  ;;  %v9488_v58 = vadd.f32 %v2186_v40, %v2000_v17 }
 0x1b7   : > { %v1949_v26 = vpop.f32.mrf.mxu1  ;;  %v9490_v49 = vpop.f32.mrf.mxu0 }
 0x1b8   : > { %v2011_v44 = vadd.f32 %v1981_v4, %v1949_v26 }
 0x1b9   : > { %v1953_v41 = vpop.f32.mrf.mxu1  ;;  %v2192_v43 = vpop.f32.mrf.mxu0 }
 0x1ba   : > { %2041 = vst.msk [vmem:[#allocation2 + $0xb8] sm:$0xff] %vm717_vm8, %v2011_v44  ;;  %v2016_v0 = vadd.f32 %v1953_v41, %v9434_v36  ;;  %v9494_v29 = vadd.f32 %v2192_v43, %v2006_v32 }
 0x1bb   : > { %v1955_v23 = vpop.f32.mrf.mxu1  ;;  %v9496_v7 = vpop.f32.mrf.mxu0 }
 0x1bc   : > { %v2017_v6 = vadd.f32 %v1987_v31, %v1955_v23  ;;  %v2398_v23 = vld [vmem:[#allocation2 + $0x28] sm:$0xff] }
 0x1bd   : > { %v2198_v17 = vpop.f32.mrf.mxu0  ;;  %v2269_v53 = vpop.f32.mrf.mxu1 }
 0x1be   : > { %2047 = vst.msk [vmem:[#allocation2 + $0xe8] sm:$0xff] %vm717_vm8, %v2017_v6  ;;  %v9499_v40 = vadd.f32 %v2198_v17, %v2012_v45  ;;  %v2425_v4 = vadd.f32 %v2269_v53, %v9442_v35 }
 0x1bf   : > { %v9502_v26 = vpop.f32.mrf.mxu0  ;;  %v9504_v44 = vpop.f32.mrf.mxu1 }
 0x1c0   : > { %12153 = vst [vmem:[#allocation20_spill] sm:$0xff] %v9502_v26  ;;  %12154 = vst [vmem:[#allocation21_spill] sm:$0xff] %v9504_v44  ;;  %v2404_v26 = vld [vmem:[#allocation2 + $0x58] sm:$0xff] }
 0x1c1   : > { %v2275_v36 = vpop.f32.mrf.mxu1  ;;  %v2364_v32 = vpop.f32.mrf.mxu0 }
 0x1c2   : > { %v2431_v41 = vadd.f32 %v2275_v36, %v9449_v25  ;;  %v9507_v43 = vadd.f32 %v2364_v32, %v1992_v59 }
 0x1c3   : > { %v9509_v48 = vpop.f32.mrf.mxu1  ;;  %v2366_v31 = vpop.f32.mrf.mxu0 }
 0x1c4   : > { %12155 = vst [vmem:[#allocation22_spill] sm:$0xff] %v9509_v48  ;;  %v2428_v38 = vadd.f32 %v2398_v23, %v2366_v31  ;;  %v2410_v48 = vld [vmem:[#allocation2 + $0x88] sm:$0xff] }
 0x1c5   : > { %v2281_v6 = vpop.f32.mrf.mxu1  ;;  %v2370_v45 = vpop.f32.mrf.mxu0 }
 0x1c6   : > { %2458 = vst.msk [vmem:[#allocation2 + $0x28] sm:$0xff] %vm717_vm8, %v2428_v38  ;;  %v2437_v35 = vadd.f32 %v2281_v6, %v9456_v2  ;;  %v9513_v17 = vadd.f32 %v2370_v45, %v1998_v50 }
 0x1c7   : > { %v9515_v53 = vpop.f32.mrf.mxu1  ;;  %v2372_v44 = vpop.f32.mrf.mxu0 }
 0x1c8   : > { %12156 = vst [vmem:[#allocation23_spill] sm:$0xff] %v9515_v53  ;;  %v2434_v25 = vadd.f32 %v2404_v26, %v2372_v44  ;;  %v2416_v53 = vld [vmem:[#allocation2 + $0xb8] sm:$0xff] }
 0x1c9   : > { %v2287_v59 = vpop.f32.mrf.mxu1  ;;  %v2376_v36 = vpop.f32.mrf.mxu0 }
 0x1ca   : > { %2464 = vst.msk [vmem:[#allocation2 + $0x58] sm:$0xff] %vm717_vm8, %v2434_v25  ;;  %v2443_v32 = vadd.f32 %v2287_v59, %v9463_v37  ;;  %v9519_v31 = vadd.f32 %v2376_v36, %v2004_v11 }
 0x1cb   : > { %v9521_v23 = vpop.f32.mrf.mxu1  ;;  %v2378_v38 = vpop.f32.mrf.mxu0 }
 0x1cc   : > { %12157 = vst [vmem:[#allocation24_spill] sm:$0xff] %v9521_v23  ;;  %v2440_v2 = vadd.f32 %v2410_v48, %v2378_v38 }
 0x1cd   : > { %v2293_v50 = vpop.f32.mrf.mxu1  ;;  %v2382_v6 = vpop.f32.mrf.mxu0 }
 0x1ce   : > { %2470 = vst.msk [vmem:[#allocation2 + $0x88] sm:$0xff] %vm717_vm8, %v2440_v2  ;;  %v2449_v45 = vadd.f32 %v2293_v50, %v9469_v12  ;;  %v9525_v26 = vadd.f32 %v2382_v6, %v2010_v63  ;;  %v2422_v2 = vld [vmem:[#allocation2 + $0xe8] sm:$0xff] }
 0x1cf   : > { %v9527_v44 = vpop.f32.mrf.mxu1  ;;  %v2384_v25 = vpop.f32.mrf.mxu0 }
 0x1d0   : > { %12158 = vst [vmem:[#allocation25_spill] sm:$0xff] %v9527_v44  ;;  %v2446_v37 = vadd.f32 %v2416_v53, %v2384_v25 }
 0x1d1   : > { %v2388_v11 = vpop.f32.mrf.mxu0  ;;  %v2609_v59 = vpop.f32.mrf.mxu1 }
 0x1d2   : > { %2476 = vst.msk [vmem:[#allocation2 + $0xb8] sm:$0xff] %vm717_vm8, %v2446_v37  ;;  %v9530_v36 = vadd.f32 %v2388_v11, %v2016_v0  ;;  %v9533_v48 = vadd.f32 %v2609_v59, %v9476_v60 }
 0x1d3   : > { %v2390_v38 = vpop.f32.mrf.mxu0  ;;  %v9535_v23 = vpop.f32.mrf.mxu1 }
 0x1d4   : > { %v2452_v12 = vadd.f32 %v2422_v2, %v2390_v38 }
 0x1d5   : > { %v2615_v63 = vpop.f32.mrf.mxu1  ;;  %v2704_v50 = vpop.f32.mrf.mxu0 }
 0x1d6   : > { %2482 = vst.msk [vmem:[#allocation2 + $0xe8] sm:$0xff] %vm717_vm8, %v2452_v12  ;;  %v9539_v53 = vadd.f32 %v2615_v63, %v9482_v46  ;;  %v9541_v6 = vadd.f32 %v2704_v50, %v2425_v4 }
 0x1d7   : > { %v9543_v25 = vpop.f32.mrf.mxu1  ;;  %v9545_v0 = vpop.f32.mrf.mxu0 }
 0x1d8   : > { %12159 = vst [vmem:[#allocation26_spill] sm:$0xff] %v9541_v6  ;;  %12160 = vst [vmem:[#allocation27_spill] sm:$0xff] %v9545_v0 }
 0x1d9   : > { %v2621_v60 = vpop.f32.mrf.mxu1  ;;  %v2710_v37 = vpop.f32.mrf.mxu0 }
 0x1da   : > { %v9548_v11 = vadd.f32 %v2621_v60, %v9488_v58  ;;  %v9550_v59 = vadd.f32 %v2710_v37, %v2431_v41 }
 0x1db   : > { %v9552_v38 = vpop.f32.mrf.mxu1  ;;  %v9554_v2 = vpop.f32.mrf.mxu0 }
 0x1dc   : > { %12161 = vst [vmem:[#allocation28_spill] sm:$0xff] %v9550_v59  ;;  %12162 = vst [vmem:[#allocation29_spill] sm:$0xff] %v9554_v2 }
 0x1dd   : > { %v2627_v12 = vpop.f32.mrf.mxu1  ;;  %v2716_v46 = vpop.f32.mrf.mxu0 }
 0x1de   : > { %v9557_v4 = vadd.f32 %v2627_v12, %v9494_v29  ;;  %v9559_v63 = vadd.f32 %v2716_v46, %v2437_v35 }
 0x1df   : > { %v9561_v50 = vpop.f32.mrf.mxu1  ;;  %v9563_v44 = vpop.f32.mrf.mxu0 }
 0x1e0   : > { %12163 = vst [vmem:[#allocation30_spill] sm:$0xff] %v9559_v63  ;;  %12164 = vst [vmem:[#allocation31_spill] sm:$0xff] %v9563_v44  ;;  %v2833_v44 = vld [vmem:[#allocation2 + $0x28] sm:$0xff] }
 0x1e1   : > { %v2633_v6 = vpop.f32.mrf.mxu1  ;;  %v2722_v58 = vpop.f32.mrf.mxu0 }
 0x1e2   : > { %v9566_v41 = vadd.f32 %v2633_v6, %v9499_v40  ;;  %v9568_v60 = vadd.f32 %v2722_v58, %v2443_v32 }
 0x1e3   : > { %v9570_v37 = vpop.f32.mrf.mxu1  ;;  %v9572_v59 = vpop.f32.mrf.mxu0 }
 0x1e4   : > { %12165 = vst [vmem:[#allocation32_spill] sm:$0xff] %v9566_v41  ;;  %12166 = vst [vmem:[#allocation33_spill] sm:$0xff] %v9568_v60  ;;  %v2839_v60 = vld [vmem:[#allocation2 + $0x58] sm:$0xff] }
 0x1e5   : > { %12167 = vst [vmem:[#allocation34_spill] sm:$0xff] %v9570_v37  ;;  %12168 = vst [vmem:[#allocation35_spill] sm:$0xff] %v9572_v59  ;;  %v2728_v2 = vpop.f32.mrf.mxu0  ;;  %v2799_v29 = vpop.f32.mrf.mxu1  ;;  %v2851_v59 = vld [vmem:[#allocation2 + $0xb8] sm:$0xff] }
 0x1e6   : > { %v9574_v12 = vadd.f32 %v2728_v2, %v2449_v45  ;;  %v9577_v35 = vadd.f32 %v2799_v29, %v9507_v43 }
 0x1e7   : > { %v9579_v46 = vpop.f32.mrf.mxu0  ;;  %v2801_v63 = vpop.f32.mrf.mxu1 }
 0x1e8   : > { %12169 = vst [vmem:[#allocation36_spill] sm:$0xff] %v9574_v12  ;;  %12170 = vst [vmem:[#allocation37_spill] sm:$0xff] %v9577_v35  ;;  %v2863_v0 = vadd.f32 %v2833_v44, %v2801_v63  ;;  %v2845_v12 = vld [vmem:[#allocation2 + $0x88] sm:$0xff] }
 0x1e9   : > { %12171 = vst [vmem:[#allocation38_spill] sm:$0xff] %v9579_v46  ;;  %v2805_v40 = vpop.f32.mrf.mxu1  ;;  %v9581_v6 = vpop.f32.mrf.mxu0 }
 0x1ea   : > { %2893 = vst.msk [vmem:[#allocation2 + $0x28] sm:$0xff] %vm717_vm8, %v2863_v0  ;;  %v9585_v32 = vadd.f32 %v2805_v40, %v9513_v17 }
 0x1eb   : > { %v2807_v58 = vpop.f32.mrf.mxu1  ;;  %v9587_v45 = vpop.f32.mrf.mxu0 }
 0x1ec   : > { %12172 = vst [vmem:[#allocation39_spill] sm:$0xff] %v9585_v32  ;;  %v2869_v2 = vadd.f32 %v2839_v60, %v2807_v58 }
 0x1ed   : > { %v2811_v43 = vpop.f32.mrf.mxu1  ;;  %v9589_v29 = vpop.f32.mrf.mxu0 }
 0x1ee   : > { %2899 = vst.msk [vmem:[#allocation2 + $0x58] sm:$0xff] %vm717_vm8, %v2869_v2  ;;  %v9593_v44 = vadd.f32 %v2811_v43, %v9519_v31 }
 0x1ef   : > { %v2813_v63 = vpop.f32.mrf.mxu1  ;;  %v9595_v46 = vpop.f32.mrf.mxu0 }
 0x1f0   : > { %12173 = vst [vmem:[#allocation40_spill] sm:$0xff] %v9593_v44  ;;  %v2875_v0 = vadd.f32 %v2845_v12, %v2813_v63  ;;  %v2857_v44 = vld [vmem:[#allocation2 + $0xe8] sm:$0xff] }
 0x1f1   : > { %v2817_v17 = vpop.f32.mrf.mxu1  ;;  %v9597_v40 = vpop.f32.mrf.mxu0 }
 0x1f2   : > { %2905 = vst.msk [vmem:[#allocation2 + $0x88] sm:$0xff] %vm717_vm8, %v2875_v0  ;;  %v9601_v60 = vadd.f32 %v2817_v17, %v9525_v26 }
 0x1f3   : > { %v2819_v58 = vpop.f32.mrf.mxu1  ;;  %v9603_v32 = vpop.f32.mrf.mxu0 }
 0x1f4   : > { %12174 = vst [vmem:[#allocation41_spill] sm:$0xff] %v9601_v60  ;;  %v2881_v2 = vadd.f32 %v2851_v59, %v2819_v58 }
 0x1f5   : > { %v2823_v31 = vpop.f32.mrf.mxu1  ;;  %v9605_v43 = vpop.f32.mrf.mxu0 }
 0x1f6   : > { %2911 = vst.msk [vmem:[#allocation2 + $0xb8] sm:$0xff] %vm717_vm8, %v2881_v2  ;;  %v9609_v12 = vadd.f32 %v2823_v31, %v9530_v36 }
 0x1f7   : > { %v2825_v63 = vpop.f32.mrf.mxu1  ;;  %v9611_v35 = vpop.f32.mrf.mxu0 }
 0x1f8   : > { %12175 = vst [vmem:[#allocation42_spill] sm:$0xff] %v9609_v12  ;;  %12176 = vst [vmem:[#allocation43_spill] sm:$0xff] %v9611_v35  ;;  %v2887_v0 = vadd.f32 %v2857_v44, %v2825_v63  ;;  %v3273_v12 = vld [vmem:[#allocation2 + $0x28] sm:$0xff] }
 0x1f9   : > { %v9613_v26 = vpop.f32.mrf.mxu0  ;;  %v9615_v17 = vpop.f32.mrf.mxu1 }
 0x1fa   : > { %12177 = vst [vmem:[#allocation44_spill] sm:$0xff] %v9613_v26  ;;  %12178 = vst [vmem:[#allocation45_spill] sm:$0xff] %v9615_v17  ;;  %v3279_v17 = vld [vmem:[#allocation2 + $0x58] sm:$0xff] }
 0x1fb   : > { %2917 = vst.msk [vmem:[#allocation2 + $0xe8] sm:$0xff] %vm717_vm8, %v2887_v0  ;;  %v9618_v59 = vpop.f32.mrf.mxu0  ;;  %v9620_v58 = vpop.f32.mrf.mxu1 }
 0x1fc   : > { %12179 = vst [vmem:[#allocation46_spill] sm:$0xff] %v9618_v59  ;;  %12180 = vst [vmem:[#allocation47_spill] sm:$0xff] %v9620_v58 }
 0x1fd   : > { %v9622_v60 = vpop.f32.mrf.mxu1  ;;  %v9624_v2 = vpop.f32.mrf.mxu0 }
 0x1fe   : > { %12181 = vst [vmem:[#allocation48_spill] sm:$0xff] %v9622_v60  ;;  %12182 = vst [vmem:[#allocation49_spill] sm:$0xff] %v9624_v2 }
 0x1ff   : > { %v9626_v36 = vpop.f32.mrf.mxu1  ;;  %v3241_v31 = vpop.f32.mrf.mxu0 }
 0x200   : > { %12183 = vst [vmem:[#allocation50_spill] sm:$0xff] %v9626_v36  ;;  %v3303_v41 = vadd.f32 %v3273_v12, %v3241_v31  ;;  %v3285_v31 = vld [vmem:[#allocation2 + $0x88] sm:$0xff] }
 0x201   : > { %v9628_v44 = vpop.f32.mrf.mxu1  ;;  %v9630_v63 = vpop.f32.mrf.mxu0 }
 0x202   : > { %12184 = vst [vmem:[#allocation51_spill] sm:$0xff] %v9628_v44  ;;  %12185 = vst [vmem:[#allocation52_spill] sm:$0xff] %v9630_v63 }
 0x203   : > { %3333 = vst.msk [vmem:[#allocation2 + $0x28] sm:$0xff] %vm717_vm8, %v3303_v41  ;;  %v9633_v0 = vpop.f32.mrf.mxu1  ;;  %v3247_v59 = vpop.f32.mrf.mxu0 }
 0x204   : > { %12186 = vst [vmem:[#allocation53_spill] sm:$0xff] %v9633_v0  ;;  %v3309_v58 = vadd.f32 %v3279_v17, %v3247_v59  ;;  %v3291_v59 = vld [vmem:[#allocation2 + $0xb8] sm:$0xff] }
 0x205   : > { %v9635_v26 = vpop.f32.mrf.mxu1  ;;  %v9637_v60 = vpop.f32.mrf.mxu0 }
 0x206   : > { %12187 = vst [vmem:[#allocation54_spill] sm:$0xff] %v9635_v26  ;;  %12188 = vst [vmem:[#allocation55_spill] sm:$0xff] %v9637_v60 }
 0x207   : > { %3339 = vst.msk [vmem:[#allocation2 + $0x58] sm:$0xff] %vm717_vm8, %v3309_v58  ;;  %v9640_v36 = vpop.f32.mrf.mxu1  ;;  %v3253_v12 = vpop.f32.mrf.mxu0 }
 0x208   : > { %12189 = vst [vmem:[#allocation56_spill] sm:$0xff] %v9640_v36  ;;  %v3315_v44 = vadd.f32 %v3285_v31, %v3253_v12  ;;  %v3297_v36 = vld [vmem:[#allocation2 + $0xe8] sm:$0xff] }
 0x209   : > { %v9642_v2 = vpop.f32.mrf.mxu1  ;;  %v9644_v63 = vpop.f32.mrf.mxu0 }
 0x20a   : > { %12190 = vst [vmem:[#allocation57_spill] sm:$0xff] %v9642_v2  ;;  %12191 = vst [vmem:[#allocation58_spill] sm:$0xff] %v9644_v63 }
 0x20b   : > { %3345 = vst.msk [vmem:[#allocation2 + $0x88] sm:$0xff] %vm717_vm8, %v3315_v44  ;;  %v9647_v41 = vpop.f32.mrf.mxu1  ;;  %v3259_v17 = vpop.f32.mrf.mxu0 }
 0x20c   : > { %12192 = vst [vmem:[#allocation59_spill] sm:$0xff] %v9647_v41  ;;  %v3321_v26 = vadd.f32 %v3291_v59, %v3259_v17 }
 0x20d   : > { %v9649_v0 = vpop.f32.mrf.mxu0  ;;  %v3489_v60 = vpop.f32.mrf.mxu1 }
 0x20e   : > { %12193 = vst [vmem:[#allocation60_spill] sm:$0xff] %v9649_v0  ;;  %3351 = vst.msk [vmem:[#allocation2 + $0xb8] sm:$0xff] %vm717_vm8, %v3321_v26 }
 0x20f   : > { %v3265_v58 = vpop.f32.mrf.mxu0  ;;  %v3491_v37 = vpop.f32.mrf.mxu1 }
 0x210   : > { %v3327_v12 = vadd.f32 %v3297_v36, %v3265_v58  ;;  %v1119_v36 = vadd.f32 %v9218_v51, %v8915_v61 }
 0x211   : > { %v3495_v31 = vpop.f32.mrf.mxu1  ;;  %v9652_v2 = vpop.f32.mrf.mxu0 }
 0x212   : > { %12194 = vst [vmem:[#allocation61_spill] sm:$0xff] %v9652_v2  ;;  %3357 = vst.msk [vmem:[#allocation2 + $0xe8] sm:$0xff] %vm717_vm8, %v3327_v12 }
 0x213   : > { %v3497_v44 = vpop.f32.mrf.mxu1  ;;  %v9655_v63 = vpop.f32.mrf.mxu0 }
 0x214   : > { %12195 = vst [vmem:[#allocation62_spill] sm:$0xff] %v9655_v63  ;;  %v1554_v63 = vadd.f32 %v9323_v47, %v1119_v36  ;;  %v1131_v47 = vadd.f32 %v9247_v62, %v8949_v10 }
 0x215   : > { %v9657_v41 = vpop.f32.mrf.mxu1  ;;  %v9659_v17 = vpop.f32.mrf.mxu0 }
 0x216   : > { %12196 = vst [vmem:[#allocation63_spill] sm:$0xff] %v9659_v17 }
 0x217   : > { %v9661_v59 = vpop.f32.mrf.mxu1  ;;  %v9663_v0 = vpop.f32.mrf.mxu0 }
 0x218   : > { %12197 = vst [vmem:[#allocation64_spill] sm:$0xff] %v9663_v0  ;;  %v1125_v0 = vadd.f32 %v9228_v54, %v8933_v5  ;;  %v3298_v54 = vadd.f32 %v9581_v6, %v9533_v48  ;;  %v3304_v6 = vadd.f32 %v9589_v29, %v9539_v53  ;;  %v1121_v53 = vadd.f32 %v9230_v55, %v8984_v20 }
 0x219   : > { %v9665_v26 = vpop.f32.mrf.mxu1  ;;  %v9667_v35 = vpop.f32.mrf.mxu0 }
 0x21a   : > { %12198 = vst [vmem:[#allocation65_spill] sm:$0xff] %v9665_v26  ;;  %12199 = vst [vmem:[#allocation66_spill] sm:$0xff] %v9667_v35  ;;  %v1989_v26 = vadd.f32 %v9437_v27, %v1554_v63  ;;  %v1560_v61 = vadd.f32 %v9338_v52, %v1125_v0  ;;  %v1566_v27 = vadd.f32 %v9353_v57, %v1131_v47 }
 0x21b   : > { %v9671_v58 = vpop.f32.mrf.mxu1  ;;  %v9673_v12 = vpop.f32.mrf.mxu0  ;;  %v3738_v62 = vadd.f32 %v3489_v60, %v3298_v54  ;;  %v3744_v47 = vadd.f32 %v3495_v31, %v3304_v6  ;;  %v1556_v55 = vadd.f32 %v9387_v18, %v1121_v53  ;;  %v12206_v6 = vld [vmem:[#allocation43_spill] sm:$0xff] }
 0x21c   : > { %12200 = vst [vmem:[#allocation67_spill] sm:$0xff] %v9673_v12  ;;  %v2424_v51 = vadd.f32 %v9478_v56, %v1989_v26  ;;  %v3713_v56 = vld [vmem:[#allocation2 + $0x28] sm:$0xff] }
 0x21d   : > { %v9676_v2 = vpop.f32.mrf.mxu1  ;;  %v9678_v17 = vpop.f32.mrf.mxu0  ;;  %v1991_v18 = vadd.f32 %v9446_v33, %v1556_v55 }
 0x21e   : > { %12201 = vst [vmem:[#allocation68_spill] sm:$0xff] %v9678_v17  ;;  %v1995_v17 = vadd.f32 %v9444_v15, %v1560_v61  ;;  %v2859_v5 = vadd.f32 %v9535_v23, %v2424_v51  ;;  %v1137_v15 = vadd.f32 %v9268_v8, %v8962_v13  ;;  %v2001_v23 = vadd.f32 %v9451_v30, %v1566_v27  ;;  %v3719_v8 = vld [vmem:[#allocation2 + $0x58] sm:$0xff] }
 0x21f   : > { %v9683_v21 = vpop.f32.mrf.mxu1  ;;  %v9685_v35 = vpop.f32.mrf.mxu0 }
 0x220   : > { %v2430_v0 = vadd.f32 %v9484_v22, %v1995_v17  ;;  %v3299_v10 = vadd.f32 %v9587_v45, %v2859_v5  ;;  %v1572_v45 = vadd.f32 %v9368_v3, %v1137_v15  ;;  %v2436_v60 = vadd.f32 %v9490_v49, %v2001_v23  ;;  %v12205_v15 = vld [vmem:[#allocation21_spill] sm:$0xff] }
 0x221   : > { %v9691_v36 = vpop.f32.mrf.mxu0  ;;  %v9693_v12 = vpop.f32.mrf.mxu1  ;;  %v2426_v23 = vadd.f32 %v12205_v15, %v1991_v18  ;;  %v12220_v18 = vld [vmem:[#allocation47_spill] sm:$0xff]  ;;  %v12223_v15 = vld [vmem:[#allocation29_spill] sm:$0xff] }
 0x222   : > { %v2865_v57 = vadd.f32 %v9543_v25, %v2430_v0  ;;  %v3739_v51 = vadd.f32 %v3491_v37, %v3299_v10  ;;  %v1143_v37 = vadd.f32 %v9287_v19, %v8973_v16  ;;  %v2007_v29 = vadd.f32 %v9458_v39, %v1572_v45  ;;  %v3725_v39 = vld [vmem:[#allocation2 + $0x88] sm:$0xff] }
 0x223   : > { %v9700_v63 = vpop.f32.mrf.mxu0  ;;  %v3681_v52 = vpop.f32.mrf.mxu1  ;;  %v2871_v54 = vadd.f32 %v9552_v38, %v2436_v60  ;;  %v12208_v60 = vld [vmem:[#allocation9_spill] sm:$0xff] }
 0x224   : > { %v3743_v26 = vadd.f32 %v3713_v56, %v3681_v52  ;;  %v3305_v17 = vadd.f32 %v9595_v46, %v2865_v57  ;;  %v3310_v46 = vadd.f32 %v9597_v40, %v9548_v11  ;;  %v1578_v20 = vadd.f32 %v9385_v14, %v1143_v37 }
 0x225   : > { %v9707_v61 = vpop.f32.mrf.mxu1  ;;  %v3929_v48 = vpop.f32.mrf.mxu0  ;;  %v2442_v16 = vadd.f32 %v9496_v7, %v2007_v29  ;;  %v3311_v56 = vadd.f32 %v9603_v32, %v2871_v54  ;;  %v1127_v40 = vadd.f32 %v9249_v1, %v8996_v24  ;;  %v1133_v14 = vadd.f32 %v9270_v9, %v9161_v28  ;;  %v12202_v28 = vld [vmem:[#allocation10_spill] sm:$0xff]  ;;  %v12203_v9 = vld [vmem:[#allocation12_spill] sm:$0xff] }
 0x226   : > { %3773 = vst.msk [vmem:[#allocation2 + $0x28] sm:$0xff] %vm717_vm8, %v3743_v26  ;;  %v9713_v22 = vadd.f32 %v3929_v48, %v3738_v62  ;;  %v3745_v31 = vadd.f32 %v3497_v44, %v3305_v17  ;;  %v3750_v38 = vadd.f32 %v9657_v41, %v3310_v46  ;;  %v2013_v7 = vadd.f32 %v9465_v34, %v1578_v20  ;;  %v12204_v34 = vld [vmem:[#allocation20_spill] sm:$0xff]  ;;  %v12211_v17 = vld [vmem:[#allocation27_spill] sm:$0xff]  ;;  %v12216_v20 = vld [vmem:[#allocation45_spill] sm:$0xff] }
 0x227   : > { %v3687_v13 = vpop.f32.mrf.mxu1  ;;  %v3931_v30 = vpop.f32.mrf.mxu0  ;;  %v2877_v32 = vadd.f32 %v9561_v50, %v2442_v16  ;;  %v3316_v41 = vadd.f32 %v9605_v43, %v9557_v4  ;;  %v3751_v62 = vadd.f32 %v9661_v59, %v3311_v56  ;;  %v1139_v1 = vadd.f32 %v12202_v28, %v9185_v42  ;;  %v3731_v50 = vld [vmem:[#allocation2 + $0xb8] sm:$0xff]  ;;  %v12218_v56 = vld [vmem:[#allocation22_spill] sm:$0xff] }
 0x228   : > { %v3749_v5 = vadd.f32 %v3719_v8, %v3687_v13  ;;  %v9718_v25 = vadd.f32 %v3931_v30, %v3739_v51  ;;  %v1562_v33 = vadd.f32 %v12203_v9, %v1127_v40  ;;  %v2448_v26 = vadd.f32 %v12204_v34, %v2013_v7  ;;  %v12207_v43 = vld [vmem:[#allocation65_spill] sm:$0xff]  ;;  %v12209_v13 = vld [vmem:[#allocation11_spill] sm:$0xff]  ;;  %v12210_v42 = vld [vmem:[#allocation16_spill] sm:$0xff] }
 0x229   : > { %v9725_v3 = vpop.f32.mrf.mxu1  ;;  %v3935_v49 = vpop.f32.mrf.mxu0  ;;  %v3317_v4 = vadd.f32 %v12206_v6, %v2877_v32  ;;  %v3756_v59 = vadd.f32 %v12207_v43, %v3316_v41  ;;  %v1145_v8 = vadd.f32 %v12209_v13, %v12208_v60  ;;  %v12214_v54 = vld [vmem:[#allocation44_spill] sm:$0xff]  ;;  %v3737_v32 = vld [vmem:[#allocation2 + $0xe8] sm:$0xff]  ;;  %v12222_v34 = vld [vmem:[#allocation17_spill] sm:$0xff] }
 0x22a   : > { %3779 = vst.msk [vmem:[#allocation2 + $0x58] sm:$0xff] %vm717_vm8, %v3749_v5  ;;  %v9731_v27 = vadd.f32 %v3935_v49, %v3744_v47  ;;  %v1997_v30 = vadd.f32 %v12210_v42, %v1562_v33  ;;  %v2861_v47 = vadd.f32 %v12211_v17, %v2426_v23  ;;  %v12212_v5 = vld [vmem:[#allocation34_spill] sm:$0xff]  ;;  %v12213_v49 = vld [vmem:[#allocation32_spill] sm:$0xff]  ;;  %v12227_v6 = vld [vmem:[#allocation49_spill] sm:$0xff] }
 0x22b   : > { %v3693_v19 = vpop.f32.mrf.mxu1  ;;  %v3937_v52 = vpop.f32.mrf.mxu0  ;;  %v2883_v53 = vadd.f32 %v12212_v5, %v2448_v26  ;;  %v3322_v46 = vadd.f32 %v12214_v54, %v12213_v49  ;;  %v3757_v16 = vadd.f32 %v9671_v58, %v3317_v4  ;;  %v12224_v23 = vld [vmem:[#allocation28_spill] sm:$0xff]  ;;  %v12232_v49 = vld [vmem:[#allocation63_spill] sm:$0xff] }
 0x22c   : > { %v3755_v0 = vadd.f32 %v3725_v39, %v3693_v19  ;;  %v9738_v11 = vadd.f32 %v3937_v52, %v3745_v31  ;;  %v12215_v31 = vld [vmem:[#allocation26_spill] sm:$0xff]  ;;  %v12217_v39 = vld [vmem:[#allocation13_spill] sm:$0xff]  ;;  %v3301_v7 = vadd.f32 %v12220_v18, %v2861_v47  ;;  %v12230_v47 = vld [vmem:[#allocation23_spill] sm:$0xff] }
 0x22d   : > { %v9746_v44 = vpop.f32.mrf.mxu1  ;;  %v3941_v10 = vpop.f32.mrf.mxu0  ;;  %v3300_v55 = vadd.f32 %v12216_v20, %v12215_v31  ;;  %v1568_v52 = vadd.f32 %v12217_v39, %v1133_v14  ;;  %v3762_v9 = vadd.f32 %v9676_v2, %v3322_v46  ;;  %v12233_v39 = vld [vmem:[#allocation18_spill] sm:$0xff]  ;;  %v12237_v18 = vld [vmem:[#allocation39_spill] sm:$0xff] }
 0x22e   : > { %3785 = vst.msk [vmem:[#allocation2 + $0x88] sm:$0xff] %vm717_vm8, %v3755_v0  ;;  %v9753_v24 = vadd.f32 %v3941_v10, %v3750_v38  ;;  %v2432_v38 = vadd.f32 %v12218_v56, %v1997_v30  ;;  %v12219_v0 = vld [vmem:[#allocation46_spill] sm:$0xff] }
 0x22f   : > { %v3699_v48 = vpop.f32.mrf.mxu1  ;;  %v3943_v57 = vpop.f32.mrf.mxu0  ;;  %v3323_v40 = vadd.f32 %v12219_v0, %v2883_v53  ;;  %v2003_v26 = vadd.f32 %v12222_v34, %v1568_v52  ;;  %v12229_v30 = vld [vmem:[#allocation14_spill] sm:$0xff]  ;;  %v12236_v0 = vld [vmem:[#allocation51_spill] sm:$0xff] }
 0x230   : > { %v3761_v51 = vadd.f32 %v3731_v50, %v3699_v48  ;;  %v9762_v45 = vadd.f32 %v3943_v57, %v3751_v62  ;;  %v12221_v62 = vld [vmem:[#allocation61_spill] sm:$0xff]  ;;  %v2867_v14 = vadd.f32 %v12223_v15, %v2432_v38  ;;  %v12225_v48 = vld [vmem:[#allocation48_spill] sm:$0xff]  ;;  %v1574_v17 = vadd.f32 %v12229_v30, %v1139_v1  ;;  %v12231_v53 = vld [vmem:[#allocation50_spill] sm:$0xff] }
 0x231   : > { %v9769_v37 = vpop.f32.mrf.mxu1  ;;  %v3947_v29 = vpop.f32.mrf.mxu0  ;;  %v3740_v28 = vadd.f32 %v12221_v62, %v3300_v55  ;;  %v3306_v50 = vadd.f32 %v12225_v48, %v12224_v23  ;;  %v12226_v57 = vld [vmem:[#allocation37_spill] sm:$0xff]  ;;  %v3763_v13 = vadd.f32 %v9683_v21, %v3323_v40  ;;  %v2438_v5 = vadd.f32 %v12230_v47, %v2003_v26  ;;  %v12234_v1 = vld [vmem:[#allocation31_spill] sm:$0xff]  ;;  %v12235_v38 = vld [vmem:[#allocation30_spill] sm:$0xff] }
 0x232   : > { %3791 = vst.msk [vmem:[#allocation2 + $0xb8] sm:$0xff] %vm717_vm8, %v3761_v51  ;;  %v9777_v19 = vadd.f32 %v3947_v29, %v3756_v59  ;;  %v3302_v4 = vadd.f32 %v12227_v6, %v12226_v57  ;;  %v12228_v51 = vld [vmem:[#allocation62_spill] sm:$0xff]  ;;  %v3307_v29 = vadd.f32 %v12231_v53, %v2867_v14  ;;  %v2009_v52 = vadd.f32 %v12233_v39, %v1574_v17  ;;  %v12240_v34 = vld [vmem:[#allocation15_spill] sm:$0xff]  ;;  %v12241_v15 = vld [vmem:[#allocation24_spill] sm:$0xff] }
 0x233   : > { %v3705_v10 = vpop.f32.mrf.mxu1  ;;  %v3949_v41 = vpop.f32.mrf.mxu0  ;;  %v3741_v60 = vadd.f32 %v12228_v51, %v3301_v7  ;;  %v3746_v54 = vadd.f32 %v12232_v49, %v3306_v50  ;;  %v2873_v56 = vadd.f32 %v12234_v1, %v2438_v5  ;;  %v3312_v40 = vadd.f32 %v12236_v0, %v12235_v38  ;;  %v12238_v7 = vld [vmem:[#allocation52_spill] sm:$0xff]  ;;  %v12242_v23 = vld [vmem:[#allocation53_spill] sm:$0xff]  ;;  %v12243_v50 = vld [vmem:[#allocation66_spill] sm:$0xff] }
 0x234   : > { %v3767_v58 = vadd.f32 %v3737_v32, %v3705_v10  ;;  %v9785_v33 = vadd.f32 %v3949_v41, %v3757_v16  ;;  %v3742_v20 = vadd.f32 %v9693_v12, %v3302_v4  ;;  %v3308_v10 = vadd.f32 %v12238_v7, %v12237_v18  ;;  %v12239_v12 = vld [vmem:[#allocation64_spill] sm:$0xff]  ;;  %v12245_v17 = vld [vmem:[#allocation35_spill] sm:$0xff]  ;;  %v12246_v5 = vld [vmem:[#allocation33_spill] sm:$0xff] }
 0x235   : > { %v3953_v43 = vpop.f32.mrf.mxu0  ;;  %v4024_v59 = vpop.f32.mrf.mxu1  ;;  %v3747_v62 = vadd.f32 %v12239_v12, %v3307_v29  ;;  %v1580_v26 = vadd.f32 %v12240_v34, %v1145_v8  ;;  %v2444_v14 = vadd.f32 %v12241_v15, %v2009_v52  ;;  %v3313_v48 = vadd.f32 %v12242_v23, %v2873_v56  ;;  %v12244_v8 = vld [vmem:[#allocation19_spill] sm:$0xff]  ;;  %v12247_v53 = vld [vmem:[#allocation54_spill] sm:$0xff]  ;;  %v12248_v49 = vld [vmem:[#allocation40_spill] sm:$0xff] }
 0x236   : > { %3797 = vst.msk [vmem:[#allocation2 + $0xe8] sm:$0xff] %vm717_vm8, %v3767_v58  ;;  %v9796_v2 = vadd.f32 %v3953_v43, %v3762_v9  ;;  %v9798_v42 = vadd.f32 %v4024_v59, %v3740_v28  ;;  %v3752_v57 = vadd.f32 %v12243_v50, %v3312_v40  ;;  %v4153_v43 = vld [vmem:[#allocation2 + $0x28] sm:$0xff]  ;;  %v3748_v59 = vadd.f32 %v9707_v61, %v3308_v10  ;;  %v12251_v56 = vld [vmem:[#allocation25_spill] sm:$0xff]  ;;  %v12252_v0 = vld [vmem:[#allocation56_spill] sm:$0xff] }
 0x237   : > { %v3955_v46 = vpop.f32.mrf.mxu0  ;;  %v4026_v31 = vpop.f32.mrf.mxu1  ;;  %v2015_v30 = vadd.f32 %v12244_v8, %v1580_v26  ;;  %v2879_v47 = vadd.f32 %v12245_v17, %v2444_v14  ;;  %v3318_v29 = vadd.f32 %v12247_v53, %v12246_v5  ;;  %v12253_v18 = vld [vmem:[#allocation68_spill] sm:$0xff]  ;;  %v12254_v26 = vld [vmem:[#allocation38_spill] sm:$0xff]  ;;  %v12256_v23 = vld [vmem:[#allocation57_spill] sm:$0xff] }
 0x238   : > { %v9805_v55 = vadd.f32 %v3955_v46, %v3763_v13  ;;  %v9807_v21 = vadd.f32 %v4026_v31, %v3741_v60  ;;  %v8287_v16 = vpack.i.bf16 %v9798_v42, %v9718_v25  ;;  %v12255_v14 = vld [vmem:[#allocation36_spill] sm:$0xff]  ;;  %v12257_v50 = vld [vmem:[#allocation41_spill] sm:$0xff]  ;;  %v12259_v8 = vld [vmem:[#allocation59_spill] sm:$0xff] }
 0x239   : > { %v4030_v32 = vpop.f32.mrf.mxu1  ;;  %v4119_v41 = vpop.f32.mrf.mxu0  ;;  %v2450_v38 = vadd.f32 %v12251_v56, %v2015_v30  ;;  %v3319_v40 = vadd.f32 %v12252_v0, %v2879_v47  ;;  %v3758_v7 = vadd.f32 %v12253_v18, %v3318_v29  ;;  %v4165_v53 = vld [vmem:[#allocation2 + $0x88] sm:$0xff] }
 0x23a   : > { %v9818_v28 = vadd.f32 %v4030_v32, %v3746_v54  ;;  %v9820_v9 = vadd.f32 %v4119_v41, %v3742_v20  ;;  %8288 = vrot.lane.b32.xlu1 %v8287_v16, %s12134_s15  ;;  %v8292_v58 = vpack.i.bf16 %v9713_v22, %v9807_v21  ;;  %v12249_v54 = vld [vmem:[#allocation55_spill] sm:$0xff]  ;;  %v4159_v41 = vld [vmem:[#allocation2 + $0x58] sm:$0xff] }
 0x23b   : > { %v4032_v6 = vpop.f32.mrf.mxu1  ;;  %v4121_v4 = vpop.f32.mrf.mxu0  ;;  %v3314_v46 = vadd.f32 %v12249_v54, %v12248_v49  ;;  %v12250_v20 = vld [vmem:[#allocation67_spill] sm:$0xff]  ;;  %v2885_v15 = vadd.f32 %v12254_v26, %v2450_v38 }
 0x23c   : > { %v9830_v51 = vadd.f32 %v4032_v6, %v3747_v62  ;;  %v4183_v60 = vadd.f32 %v4153_v43, %v4121_v4  ;;  %8293 = vrot.lane.b32.xlu0 %v8292_v58, %s12134_s15  ;;  %v8297_v13 = vpack.i.bf16 %v9818_v28, %v9738_v11  ;;  %v3753_v16 = vadd.f32 %v12250_v20, %v3313_v48 }
 0x23d   : > { %v4036_v31 = vpop.f32.mrf.mxu1  ;;  %v4125_v61 = vpop.f32.mrf.mxu0  ;;  %v3754_v12 = vadd.f32 %v9725_v3, %v3314_v46  ;;  %v3324_v48 = vadd.f32 %v12256_v23, %v12255_v14  ;;  %v3759_v3 = vadd.f32 %v9685_v35, %v3319_v40  ;;  %v3325_v30 = vadd.f32 %v12259_v8, %v2885_v15  ;;  %v12260_v46 = vld [vmem:[#allocation42_spill] sm:$0xff]  ;;  %v4171_v40 = vld [vmem:[#allocation2 + $0xb8] sm:$0xff]  ;;  %v4644_v8 = vld [vmem:[%s12121_s3 + $0xd0] sm:$0xff] }
 0x23e   : > { %4213 = vst.msk [vmem:[#allocation2 + $0x28] sm:$0xff] %vm717_vm8, %v4183_v60  ;;  %v9843_v39 = vadd.f32 %v4036_v31, %v3752_v57  ;;  %v9845_v52 = vadd.f32 %v4125_v61, %v3748_v59  ;;  %8298 = vrot.lane.b32.xlu1 %v8297_v13, %s12134_s15  ;;  %v8302_v1 = vpack.i.bf16 %v9731_v27, %v9830_v51  ;;  %v12258_v57 = vld [vmem:[#allocation58_spill] sm:$0xff]  ;;  %v12261_v31 = vld [vmem:[#allocation60_spill] sm:$0xff] }
 0x23f   : > { %v4038_v10 = vpop.f32.mrf.mxu1  ;;  %v4127_v32 = vpop.f32.mrf.mxu0  ;;  %v3320_v6 = vadd.f32 %v12258_v57, %v12257_v50  ;;  %v3764_v17 = vadd.f32 %v9691_v36, %v3324_v48  ;;  %v3326_v61 = vadd.f32 %v12261_v31, %v12260_v46  ;;  %v3765_v36 = vadd.f32 %v9700_v63, %v3325_v30  ;;  %v4649_v57 = vld [vmem:[%s12121_s3 + $0xf8] sm:$0xff]  ;;  %v4643_v30 = vld [vmem:[%s12121_s3 + $0xc8] sm:$0xff]  ;;  %v4710_v46 = vld [vmem:[%s12121_s3 + $0x2e0] sm:$0xff] }
 0x240   : > { %v9854_v62 = vadd.f32 %v4038_v10, %v3753_v16  ;;  %v4189_v58 = vadd.f32 %v4159_v41, %v4127_v32  ;;  %8303 = vrot.lane.b32.xlu0 %v8302_v1, %s12134_s15  ;;  %v8307_v34 = vpack.i.bf16 %v9843_v39, %v9762_v45  ;;  %v8332_v26 = vpack.i.bf16 %v9845_v52, %v9820_v9  ;;  %v4638_v31 = vld [vmem:[%s12121_s3 + $0xa0] sm:$0xff] }
 0x241   : > { %v4042_v4 = vpop.f32.mrf.mxu1  ;;  %v4131_v43 = vpop.f32.mrf.mxu0  ;;  %v3760_v35 = vadd.f32 %v9746_v44, %v3320_v6  ;;  %v3766_v18 = vadd.f32 %v9769_v37, %v3326_v61  ;;  %v4177_v37 = vld [vmem:[#allocation2 + $0xe8] sm:$0xff]  ;;  %v4648_v6 = vld [vmem:[%s12121_s3 + $0xf0] sm:$0xff]  ;;  %4847 = vmatprep.subr.mxu1 %v4649_v57  ;;  %v4709_v61 = vld [vmem:[%s12121_s3 + $0x2d8] sm:$0xff] }
 0x242   : > { %4219 = vst.msk [vmem:[#allocation2 + $0x58] sm:$0xff] %vm717_vm8, %v4189_v58  ;;  %v9866_v59 = vadd.f32 %v4042_v4, %v3758_v7  ;;  %v9868_v60 = vadd.f32 %v4131_v43, %v3754_v12  ;;  %8308 = vrot.lane.b32.xlu1 %v8307_v34, %s12134_s15  ;;  %v8312_v13 = vpack.i.bf16 %v9753_v24, %v9854_v62  ;;  %v4647_v4 = vld [vmem:[%s12121_s3 + $0xe8] sm:$0xff]  ;;  %v4629_v57 = vld [vmem:[%s12121_s3 + $0x58] sm:$0xff] }
 0x243   : > { %v4044_v47 = vpop.f32.mrf.mxu1  ;;  %v4133_v5 = vpop.f32.mrf.mxu0  ;;  %4848 = vmatpush1.msra.mxu1 %v4648_v6  ;;  %v4699_v6 = vld [vmem:[%s12121_s3 + $0x288] sm:$0xff] }
 0x244   : > { %v9876_v29 = vadd.f32 %v4044_v47, %v3759_v3  ;;  %v4195_v49 = vadd.f32 %v4165_v53, %v4133_v5  ;;  %8313 = vrot.lane.b32.xlu0 %v8312_v13, %s12134_s15  ;;  %v8317_v54 = vpack.i.bf16 %v9866_v59, %v9785_v33  ;;  %v4646_v3 = vld [vmem:[%s12121_s3 + $0xe0] sm:$0xff]  ;;  %v4645_v13 = vld [vmem:[%s12121_s3 + $0xd8] sm:$0xff]  ;;  %4849 = vmatprep.subr.mxu1 %v4647_v4  ;;  %v4640_v53 = vld [vmem:[%s12121_s3 + $0xb0] sm:$0xff] }
 0x245   : > { %v4048_v20 = vpop.f32.mrf.mxu1  ;;  %v4137_v16 = vpop.f32.mrf.mxu0  ;;  %v9909_v15 = vld [vmem:[#allocation2 + $0x28] sm:$0xff]  ;;  %4850 = vmatpush1.msra.mxu1 %v4646_v3  ;;  %v4641_v47 = vld [vmem:[%s12121_s3 + $0xb8] sm:$0xff]  ;;  %v4628_v4 = vld [vmem:[%s12121_s3 + $0x50] sm:$0xff] }
 0x246   : > { %4225 = vst.msk [vmem:[#allocation2 + $0x88] sm:$0xff] %vm717_vm8, %v4195_v49  ;;  %v9885_v1 = vadd.f32 %v4048_v20, %v3764_v17  ;;  %v9887_v44 = vadd.f32 %v4137_v16, %v3760_v35  ;;  %8318 = vrot.lane.b32.xlu1 %v8317_v54, %s12134_s15  ;;  %v8322_v56 = vpack.i.bf16 %v9777_v19, %v9876_v29  ;;  %v4642_v17 = vld [vmem:[%s12121_s3 + $0xc0] sm:$0xff]  ;;  %v4713_v5 = vld [vmem:[%s12121_s3 + $0x2f8] sm:$0xff]  ;;  %v4712_v35 = vld [vmem:[%s12121_s3 + $0x2f0] sm:$0xff] }
 0x247   : > { %v4050_v38 = vpop.f32.mrf.mxu1  ;;  %v4139_v0 = vpop.f32.mrf.mxu0  ;;  %4851 = vmatprep.subr.mxu1 %v4645_v13  ;;  %4942 = vmatprep.subr.mxu0 %v4713_v5  ;;  %v4639_v49 = vld [vmem:[%s12121_s3 + $0xa8] sm:$0xff]  ;;  %v4637_v20 = vld [vmem:[%s12121_s3 + $0x98] sm:$0xff]  ;;  %v4708_v16 = vld [vmem:[%s12121_s3 + $0x2d0] sm:$0xff] }
 0x248   : > { %v9893_v7 = vadd.f32 %v4050_v38, %v3765_v36  ;;  %v4201_v10 = vadd.f32 %v4171_v40, %v4139_v0  ;;  %8323 = vrot.lane.b32.xlu0 %v8322_v56, %s12134_s15  ;;  %v8327_v63 = vpack.i.bf16 %v9885_v1, %v9805_v55  ;;  %v8342_v23 = vpack.i.bf16 %v9887_v44, %v9868_v60  ;;  %v4711_v54 = vld [vmem:[%s12121_s3 + $0x2e8] sm:$0xff]  ;;  %v4636_v56 = vld [vmem:[%s12121_s3 + $0x90] sm:$0xff]  ;;  %v4706_v38 = vld [vmem:[%s12121_s3 + $0x2c0] sm:$0xff] }
 0x249   : > { %v4143_v32 = vpop.f32.mrf.mxu0  ;;  %v9913_v14 = vld [vmem:[#allocation2 + $0x58] sm:$0xff]  ;;  %4852 = vmatpush1.msra.mxu1 %v4644_v8  ;;  %4943 = vmatpush1.msra.mxu0 %v4712_v35  ;;  %v4707_v36 = vld [vmem:[%s12121_s3 + $0x2c8] sm:$0xff]  ;;  %v4698_v3 = vld [vmem:[%s12121_s3 + $0x280] sm:$0xff] }
 0x24a   : > { %4231 = vst.msk [vmem:[#allocation2 + $0xb8] sm:$0xff] %vm717_vm8, %v4201_v10  ;;  %v9899_v41 = vadd.f32 %v4143_v32, %v3766_v18  ;;  %8328 = vrot.lane.b32.xlu1 %v8327_v63, %s12134_s15  ;;  %v8337_v12 = vpack.i.bf16 %v9796_v2, %v9893_v7  ;;  %4853 = vmatprep.subr.mxu1 %v4643_v30  ;;  %v4635_v0 = vld [vmem:[%s12121_s3 + $0x88] sm:$0xff]  ;;  %v4705_v40 = vld [vmem:[%s12121_s3 + $0x2b8] sm:$0xff]  ;;  %v4634_v18 = vld [vmem:[%s12121_s3 + $0x80] sm:$0xff] }
 0x24b   : > { %v4145_v58 = vpop.f32.mrf.mxu0  ;;  %4854 = vmatpush1.msra.mxu1 %v4642_v17  ;;  %4944 = vmatprep.subr.mxu0 %v4711_v54  ;;  %v4704_v10 = vld [vmem:[%s12121_s3 + $0x2b0] sm:$0xff]  ;;  %v4633_v63 = vld [vmem:[%s12121_s3 + $0x78] sm:$0xff]  ;;  %v4703_v32 = vld [vmem:[%s12121_s3 + $0x2a8] sm:$0xff] }
 0x24c   : > { %v4207_v34 = vadd.f32 %v4177_v37, %v4145_v58  ;;  %8338 = vrot.lane.b32.xlu0 %v8337_v12, %s12134_s15  ;;  %4855 = vmatprep.subr.mxu1 %v4641_v47  ;;  %v4632_v12 = vld [vmem:[%s12121_s3 + $0x70] sm:$0xff]  ;;  %v4702_v58 = vld [vmem:[%s12121_s3 + $0x2a0] sm:$0xff]  ;;  %v4631_v37 = vld [vmem:[%s12121_s3 + $0x68] sm:$0xff] }
 0x24d   : > { %v9920_v48 = vld [vmem:[#allocation2 + $0x88] sm:$0xff]  ;;  %4856 = vmatpush1.msra.mxu1 %v4640_v53  ;;  %4945 = vmatpush1.msra.mxu0 %v4710_v46  ;;  %v4697_v8 = vld [vmem:[%s12121_s3 + $0x278] sm:$0xff]  ;;  %v4626_v30 = vld [vmem:[%s12121_s3 + $0x40] sm:$0xff] }
 0x24e   : > { %4237 = vst.msk [vmem:[#allocation2 + $0xe8] sm:$0xff] %vm717_vm8, %v4207_v34  ;;  %8333 = vrot.lane.b32.xlu1 %v8332_v26, %s12134_s15  ;;  %4857 = vmatprep.subr.mxu1 %v4639_v49  ;;  %v4701_v34 = vld [vmem:[%s12121_s3 + $0x298] sm:$0xff]  ;;  %v4630_v26 = vld [vmem:[%s12121_s3 + $0x60] sm:$0xff]  ;;  %v4627_v13 = vld [vmem:[%s12121_s3 + $0x48] sm:$0xff]  ;;  %vm7497_vm8 = vcmask 130048  }
 0x24f   : > { %4946 = vmatprep.subr.mxu0 %v4709_v61  ;;  %4858 = vmatpush1.msra.mxu1 %v4638_v31  ;;  %v4696_v17 = vld [vmem:[%s12121_s3 + $0x270] sm:$0xff]  ;;  %v4625_v47 = vld [vmem:[%s12121_s3 + $0x38] sm:$0xff]  ;;  %v4695_v5 = vld [vmem:[%s12121_s3 + $0x268] sm:$0xff] }
 0x250   : > { %4308 = vrot.lane.b32.xlu0 %v9909_v15, %s12134_s15  ;;  %4947 = vmatpush1.msra.mxu0 %v4708_v16  ;;  %v4624_v53 = vld [vmem:[%s12121_s3 + $0x30] sm:$0xff]  ;;  %v4694_v35 = vld [vmem:[%s12121_s3 + $0x260] sm:$0xff]  ;;  %v4623_v49 = vld [vmem:[%s12121_s3 + $0x28] sm:$0xff] }
 0x251   : > { %v9924_v50 = vld [vmem:[#allocation2 + $0xb8] sm:$0xff]  ;;  %4859 = vmatprep.subr.mxu1 %v4637_v20  ;;  %4948 = vmatprep.subr.mxu0 %v4707_v36  ;;  %v4622_v46 = vld [vmem:[%s12121_s3 + $0x20] sm:$0xff]  ;;  %v4692_v31 = vld [vmem:[%s12121_s3 + $0x250] sm:$0xff] }
 0x252   : > { %4320 = vrot.lane.b32.xlu1 %v9913_v14, %s12134_s15  ;;  %4860 = vmatpush1.msra.mxu1 %v4636_v56  ;;  %v4693_v54 = vld [vmem:[%s12121_s3 + $0x258] sm:$0xff]  ;;  %v4691_v20 = vld [vmem:[%s12121_s3 + $0x248] sm:$0xff]  ;;  %v4620_v16 = vld [vmem:[%s12121_s3 + $0x10] sm:$0xff] }
 0x253   : > { %4949 = vmatpush1.msra.mxu0 %v4706_v38  ;;  %4861 = vmatprep.subr.mxu1 %v4635_v0  ;;  %v4621_v61 = vld [vmem:[%s12121_s3 + $0x18] sm:$0xff]  ;;  %v4690_v36 = vld [vmem:[%s12121_s3 + $0x240] sm:$0xff]  ;;  %v4619_v56 = vld [vmem:[%s12121_s3 + $0x8] sm:$0xff] }
 0x254   : > { %8343 = vrot.lane.b32.xlu0 %v8342_v23, %s12134_s15  ;;  %4950 = vmatprep.subr.mxu0 %v4705_v40  ;;  %v4700_v23 = vld [vmem:[%s12121_s3 + $0x290] sm:$0xff]  ;;  %v4689_v38 = vld [vmem:[%s12121_s3 + $0x238] sm:$0xff]  ;;  %v4618_v0 = vld [vmem:[%s12121_s3] sm:$0xff] }
 0x255   : > { %v9939_v43 = vld [vmem:[#allocation2 + $0xe8] sm:$0xff]  ;;  %4862 = vmatpush1.msra.mxu1 %v4634_v18  ;;  %4951 = vmatpush1.msra.mxu0 %v4704_v10  ;;  %v4688_v40 = vld [vmem:[%s12121_s3 + $0x230] sm:$0xff]  ;;  %v4681_v18 = vld [vmem:[%s12121_s3 + $0x1f8] sm:$0xff] }
 0x256   : > { %4332 = vrot.lane.b32.xlu1 %v9920_v48, %s12134_s15  ;;  %4863 = vmatprep.subr.mxu1 %v4633_v63  ;;  %v4687_v10 = vld [vmem:[%s12121_s3 + $0x228] sm:$0xff]  ;;  %v4680_v63 = vld [vmem:[%s12121_s3 + $0x1f0] sm:$0xff] }
 0x257   : > { %4952 = vmatprep.subr.mxu0 %v4703_v32  ;;  %4864 = vmatpush1.msra.mxu1 %v4632_v12  ;;  %v4686_v32 = vld [vmem:[%s12121_s3 + $0x220] sm:$0xff]  ;;  %v4679_v12 = vld [vmem:[%s12121_s3 + $0x1e8] sm:$0xff] }
 0x258   : > { %4344 = vrot.lane.b32.xlu0 %v9924_v50, %s12134_s15  ;;  %4953 = vmatpush1.msra.mxu0 %v4702_v58  ;;  %v4685_v58 = vld [vmem:[%s12121_s3 + $0x218] sm:$0xff] }
 0x259   : > { %4865 = vmatprep.subr.mxu1 %v4631_v37  ;;  %4954 = vmatprep.subr.mxu0 %v4701_v34  ;;  %v4678_v37 = vld [vmem:[%s12121_s3 + $0x1e0] sm:$0xff]  ;;  %v4684_v34 = vld [vmem:[%s12121_s3 + $0x210] sm:$0xff] }
 0x25a   : > { %4354 = vrot.lane.b32.xlu1 %v9899_v41, %s12134_s15  ;;  %4866 = vmatpush1.msra.mxu1 %v4630_v26  ;;  %v4677_v26 = vld [vmem:[%s12121_s3 + $0x1d8] sm:$0xff] }
 0x25b   : > { %4955 = vmatpush1.msra.mxu0 %v4700_v23  ;;  %4867 = vmatprep.subr.mxu1 %v4629_v57  ;;  %v4683_v23 = vld [vmem:[%s12121_s3 + $0x208] sm:$0xff]  ;;  %v4676_v57 = vld [vmem:[%s12121_s3 + $0x1d0] sm:$0xff] }
 0x25c   : > { %4356 = vrot.lane.b32.xlu0 %v9939_v43, %s12134_s15  ;;  %4956 = vmatprep.subr.mxu0 %v4699_v6  ;;  %v4682_v6 = vld [vmem:[%s12121_s3 + $0x200] sm:$0xff]  ;;  %s12265_s15 = smov 126  }
 0x25d   : > { %4868 = vmatpush1.msra.mxu1 %v4628_v4  ;;  %4957 = vmatpush1.msra.mxu0 %v4698_v3  ;;  %v4675_v4 = vld [vmem:[%s12121_s3 + $0x1c8] sm:$0xff]  ;;  %v4745_v3 = vld [vmem:[%s12121_s3 + $0x3f8] sm:$0xff] }
 0x25e   : > { %4869 = vmatprep.subr.mxu1 %v4627_v13  ;;  %4958 = vmatprep.subr.mxu0 %v4697_v8  ;;  %v4674_v13 = vld [vmem:[%s12121_s3 + $0x1c0] sm:$0xff]  ;;  %v4744_v8 = vld [vmem:[%s12121_s3 + $0x3f0] sm:$0xff] }
 0x25f   : > { %4870 = vmatpush1.msra.mxu1 %v4626_v30  ;;  %4959 = vmatpush1.msra.mxu0 %v4696_v17  ;;  %v4673_v30 = vld [vmem:[%s12121_s3 + $0x1b8] sm:$0xff]  ;;  %v4743_v17 = vld [vmem:[%s12121_s3 + $0x3e8] sm:$0xff] }
 0x260   : > { %4871 = vmatprep.subr.mxu1 %v4625_v47  ;;  %4960 = vmatprep.subr.mxu0 %v4695_v5  ;;  %v4672_v47 = vld [vmem:[%s12121_s3 + $0x1b0] sm:$0xff]  ;;  %v4742_v5 = vld [vmem:[%s12121_s3 + $0x3e0] sm:$0xff] }
 0x261   : > { %4872 = vmatpush1.msra.mxu1 %v4624_v53  ;;  %4961 = vmatpush1.msra.mxu0 %v4694_v35  ;;  %v4671_v53 = vld [vmem:[%s12121_s3 + $0x1a8] sm:$0xff]  ;;  %v4741_v35 = vld [vmem:[%s12121_s3 + $0x3d8] sm:$0xff] }
 0x262   : > { %4873 = vmatprep.subr.mxu1 %v4623_v49  ;;  %4962 = vmatprep.subr.mxu0 %v4693_v54  ;;  %v4670_v49 = vld [vmem:[%s12121_s3 + $0x1a0] sm:$0xff]  ;;  %v4740_v54 = vld [vmem:[%s12121_s3 + $0x3d0] sm:$0xff] }
 0x263   : > { %4874 = vmatpush1.msra.mxu1 %v4622_v46  ;;  %4963 = vmatpush1.msra.mxu0 %v4692_v31  ;;  %v4669_v46 = vld [vmem:[%s12121_s3 + $0x198] sm:$0xff]  ;;  %v4668_v31 = vld [vmem:[%s12121_s3 + $0x190] sm:$0xff] }
 0x264   : > { %4875 = vmatprep.subr.mxu1 %v4621_v61  ;;  %4964 = vmatprep.subr.mxu0 %v4691_v20  ;;  %v4667_v61 = vld [vmem:[%s12121_s3 + $0x188] sm:$0xff]  ;;  %v4666_v20 = vld [vmem:[%s12121_s3 + $0x180] sm:$0xff] }
 0x265   : > { %4876 = vmatpush1.msra.mxu1 %v4620_v16  ;;  %4965 = vmatpush1.msra.mxu0 %v4690_v36  ;;  %v4665_v16 = vld [vmem:[%s12121_s3 + $0x178] sm:$0xff]  ;;  %v4664_v36 = vld [vmem:[%s12121_s3 + $0x170] sm:$0xff] }
 0x266   : > { %4877 = vmatprep.subr.mxu1 %v4619_v56  ;;  %4966 = vmatprep.subr.mxu0 %v4689_v38  ;;  %v4663_v56 = vld [vmem:[%s12121_s3 + $0x168] sm:$0xff]  ;;  %v4662_v38 = vld [vmem:[%s12121_s3 + $0x160] sm:$0xff] }
 0x267   : > { %4878 = vmatpush1.msra.mxu1 %v4618_v0  ;;  %4967 = vmatpush1.msra.mxu0 %v4688_v40  ;;  %v4661_v0 = vld [vmem:[%s12121_s3 + $0x158] sm:$0xff]  ;;  %v4660_v40 = vld [vmem:[%s12121_s3 + $0x150] sm:$0xff] }
 0x268   : > { %4879 = vmatprep.subr.mxu1 %v4681_v18  ;;  %4968 = vmatprep.subr.mxu0 %v4687_v10  ;;  %v4659_v18 = vld [vmem:[%s12121_s3 + $0x148] sm:$0xff]  ;;  %v4658_v10 = vld [vmem:[%s12121_s3 + $0x140] sm:$0xff] }
 0x269   : > { %4880 = vmatpush2.msra.mxu1 %v4680_v63  ;;  %4969 = vmatpush1.msra.mxu0 %v4686_v32  ;;  %v4657_v63 = vld [vmem:[%s12121_s3 + $0x138] sm:$0xff]  ;;  %v4656_v32 = vld [vmem:[%s12121_s3 + $0x130] sm:$0xff] }
 0x26a   : > { %4881 = vmatprep.subr.mxu1 %v4679_v12  ;;  %4970 = vmatprep.subr.mxu0 %v4685_v58  ;;  %v4739_v12 = vld [vmem:[%s12121_s3 + $0x3c8] sm:$0xff] }
 0x26b   : > { %4882 = vmatpush2.msra.mxu1 %v4678_v37  ;;  %4971 = vmatpush1.msra.mxu0 %v4684_v34  ;;  %v4655_v58 = vld [vmem:[%s12121_s3 + $0x128] sm:$0xff]  ;;  %v4738_v37 = vld [vmem:[%s12121_s3 + $0x3c0] sm:$0xff] }
 0x26c   : > { %4883 = vmatprep.subr.mxu1 %v4677_v26  ;;  %4972 = vmatprep.subr.mxu0 %v4683_v23  ;;  %v4654_v34 = vld [vmem:[%s12121_s3 + $0x120] sm:$0xff]  ;;  %v4737_v26 = vld [vmem:[%s12121_s3 + $0x3b8] sm:$0xff] }
 0x26d   : > { %4884 = vmatpush2.msra.mxu1 %v4676_v57  ;;  %4973 = vmatpush1.msra.mxu0 %v4682_v6  ;;  %v4653_v23 = vld [vmem:[%s12121_s3 + $0x118] sm:$0xff]  ;;  %v4736_v57 = vld [vmem:[%s12121_s3 + $0x3b0] sm:$0xff] }
 0x26e   : > { %4885 = vmatprep.subr.mxu1 %v4675_v4  ;;  %4974 = vmatprep.subr.mxu0 %v4745_v3  ;;  %v4652_v6 = vld [vmem:[%s12121_s3 + $0x110] sm:$0xff]  ;;  %v4735_v4 = vld [vmem:[%s12121_s3 + $0x3a8] sm:$0xff] }
 0x26f   : > { %4886 = vmatpush2.msra.mxu1 %v4674_v13  ;;  %4975 = vmatpush2.msra.mxu0 %v4744_v8  ;;  %v4651_v3 = vld [vmem:[%s12121_s3 + $0x108] sm:$0xff]  ;;  %v4734_v13 = vld [vmem:[%s12121_s3 + $0x3a0] sm:$0xff] }
 0x270   : > { %4887 = vmatprep.subr.mxu1 %v4673_v30  ;;  %4976 = vmatprep.subr.mxu0 %v4743_v17  ;;  %v4650_v30 = vld [vmem:[%s12121_s3 + $0x100] sm:$0xff]  ;;  %v4733_v17 = vld [vmem:[%s12121_s3 + $0x398] sm:$0xff] }
 0x271   : > { %4888 = vmatpush2.msra.mxu1 %v4672_v47  ;;  %4977 = vmatpush2.msra.mxu0 %v4742_v5 }
 0x272   : > { %4889 = vmatprep.subr.mxu1 %v4671_v53  ;;  %4978 = vmatprep.subr.mxu0 %v4741_v35  ;;  %v4732_v53 = vld [vmem:[%s12121_s3 + $0x390] sm:$0xff]  ;;  %v4777_v35 = vld [vmem:[%s12121_s3 + $0x4f8] sm:$0xff] }
 0x273   : > { %4890 = vmatpush2.msra.mxu1 %v4670_v49  ;;  %4979 = vmatpush2.msra.mxu0 %v4740_v54  ;;  %v4731_v54 = vld [vmem:[%s12121_s3 + $0x388] sm:$0xff] }
 0x274   : > { %4891 = vmatprep.subr.mxu1 %v4669_v46  ;;  %4980 = vmatprep.subr.mxu0 %v4739_v12  ;;  %v4728_v12 = vld [vmem:[%s12121_s3 + $0x370] sm:$0xff] }
 0x275   : > { %4892 = vmatpush2.msra.mxu1 %v4668_v31  ;;  %4981 = vmatpush2.msra.mxu0 %v4738_v37 }
 0x276   : > { %4893 = vmatprep.subr.mxu1 %v4667_v61  ;;  %4982 = vmatprep.subr.mxu0 %v4737_v26  ;;  %v4726_v26 = vld [vmem:[%s12121_s3 + $0x360] sm:$0xff] }
 0x277   : > { %4894 = vmatpush2.msra.mxu1 %v4666_v20  ;;  %4983 = vmatpush2.msra.mxu0 %v4736_v57 }
 0x278   : > { %4895 = vmatprep.subr.mxu1 %v4665_v16  ;;  %4984 = vmatprep.subr.mxu0 %v4735_v4  ;;  %v4730_v16 = vld [vmem:[%s12121_s3 + $0x380] sm:$0xff] }
 0x279   : > { %4896 = vmatpush2.msra.mxu1 %v4664_v36  ;;  %4985 = vmatpush2.msra.mxu0 %v4734_v13 }
 0x27a   : > { %4897 = vmatprep.subr.mxu1 %v4663_v56  ;;  %4986 = vmatprep.subr.mxu0 %v4733_v17  ;;  %v4724_v17 = vld [vmem:[%s12121_s3 + $0x350] sm:$0xff] }
 0x27b   : > { %4898 = vmatpush2.msra.mxu1 %v4662_v38  ;;  %4987 = vmatpush2.msra.mxu0 %v4732_v53 }
 0x27c   : > { %4899 = vmatprep.subr.mxu1 %v4661_v0  ;;  %4988 = vmatprep.subr.mxu0 %v4731_v54 }
 0x27d   : > { %4900 = vmatpush2.msra.mxu1 %v4660_v40  ;;  %4989 = vmatpush2.msra.mxu0 %v4730_v16  ;;  %v4729_v40 = vld [vmem:[%s12121_s3 + $0x378] sm:$0xff] }
 0x27e   : > { %4901 = vmatprep.subr.mxu1 %v4659_v18  ;;  %4990 = vmatprep.subr.mxu0 %v4729_v40 }
 0x27f   : > { %4902 = vmatpush2.msra.mxu1 %v4658_v10  ;;  %4991 = vmatpush2.msra.mxu0 %v4728_v12  ;;  %v4720_v12 = vld [vmem:[%s12121_s3 + $0x330] sm:$0xff] }
 0x280   : > { %4903 = vmatprep.subr.mxu1 %v4657_v63 }
 0x281   : > { %4904 = vmatpush2.msra.mxu1 %v4656_v32 }
 0x282   : > { %4905 = vmatprep.subr.mxu1 %v4655_v58 }
 0x283   : > { %4906 = vmatpush2.msra.mxu1 %v4654_v34 }
 0x284   : > { %4907 = vmatprep.subr.mxu1 %v4653_v23 }
 0x285   : > { %4908 = vmatpush2.msra.mxu1 %v4652_v6 }
 0x286   : > { %4909 = vmatprep.subr.mxu1 %v4651_v3  ;;  %v4725_v3 = vld [vmem:[%s12121_s3 + $0x358] sm:$0xff] }
 0x287   : > { %4910 = vmatpush2.msra.mxu1 %v4650_v30 }
 0x288   : > { %5037 = vmatprep.subr.mxu1 %v4777_v35 }
 0x2ac   : > { %v8289_v8 = vpop.permute.xlu1 %8288 }
 0x2ad   : > { %v8291_v47 = vunpack.i.h.bf16 %v8289_v8  ;;  %v8290_v5 = vunpack.i.l.bf16 %v8289_v8 }
 0x2ae   : > { %v10267_v49 = vpop.permute.xlu0 %8293 }
 0x2af   : > { %v8296_v46 = vunpack.i.h.bf16 %v10267_v49  ;;  %v8295_v31 = vunpack.i.l.bf16 %v10267_v49  ;;  %v4359_v61 = vsel %vm770_vm2, %v8290_v5, %v8291_v47 }
 0x2b0   : > { %v8299_v20 = vpop.permute.xlu1 %8298  ;;  %v10291_v63 = vmax.f32 %v9718_v25, %v4359_v61  ;;  %v4722_v61 = vld [vmem:[%s12121_s3 + $0x340] sm:$0xff] }
 0x2b1   : > { %v8301_v36 = vunpack.i.h.bf16 %v8299_v20  ;;  %v8300_v56 = vunpack.i.l.bf16 %v8299_v20  ;;  %v4358_v38 = vsel %vm770_vm2, %v8296_v46, %v8290_v5  ;;  %v4360_v0 = vsel %vm770_vm2, %v8291_v47, %v8295_v31 }
 0x2b2   : > { %v10285_v18 = vpop.permute.xlu0 %8303  ;;  %v10288_v10 = vmax.f32 %v9713_v22, %v4358_v38  ;;  %v10294_v32 = vmax.f32 %v9798_v42, %v4360_v0  ;;  %v4727_v22 = vld [vmem:[%s12121_s3 + $0x368] sm:$0xff] }
 0x2b3   : > { %v8306_v58 = vunpack.i.h.bf16 %v10285_v18  ;;  %v8305_v37 = vunpack.i.l.bf16 %v10285_v18  ;;  %v4364_v34 = vsel %vm770_vm2, %v8300_v56, %v8301_v36  ;;  %4992 = vmatprep.subr.mxu0 %v4727_v22 }
 0x2b4   : > { %v8309_v25 = vpop.permute.xlu1 %8308  ;;  %4473 = vrot.lane.b32.xlu0 %v10288_v10, %s12262_s25  ;;  %v8347_v42 = vpack.i.bf16 %v10294_v32, %v10291_v63  ;;  %4993 = vmatpush2.msra.mxu0 %v4726_v26  ;;  %v10323_v8 = vmax.f32 %v9738_v11, %v4364_v34  ;;  %v4723_v11 = vld [vmem:[%s12121_s3 + $0x348] sm:$0xff] }
 0x2b5   : > { %v8311_v23 = vunpack.i.h.bf16 %v8309_v25  ;;  %v8310_v57 = vunpack.i.l.bf16 %v8309_v25  ;;  %v4365_v6 = vsel %vm770_vm2, %v8301_v36, %v8305_v37  ;;  %v4363_v4 = vsel %vm770_vm2, %v8306_v58, %v8300_v56  ;;  %4994 = vmatprep.subr.mxu0 %v4725_v3 }
 0x2b6   : > { %v10319_v13 = vpop.permute.xlu0 %8313  ;;  %8348 = vrot.lane.b32.xlu1 %v8347_v42, %s12262_s25  ;;  %v10326_v30 = vmax.f32 %v9818_v28, %v4365_v6  ;;  %4995 = vmatpush2.msra.mxu0 %v4724_v17  ;;  %v10340_v54 = vmax.f32 %v9731_v27, %v4363_v4  ;;  %v4721_v27 = vld [vmem:[%s12121_s3 + $0x338] sm:$0xff]  ;;  %v4718_v42 = vld [vmem:[%s12121_s3 + $0x320] sm:$0xff] }
 0x2b7   : > { %v8316_v47 = vunpack.i.h.bf16 %v10319_v13  ;;  %v8315_v5 = vunpack.i.l.bf16 %v10319_v13  ;;  %v4369_v53 = vsel %vm770_vm2, %v8310_v57, %v8311_v23  ;;  %4996 = vmatprep.subr.mxu0 %v4723_v11  ;;  %v4717_v4 = vld [vmem:[%s12121_s3 + $0x318] sm:$0xff] }
 0x2b8   : > { %v8319_v35 = vpop.permute.xlu1 %8318  ;;  %v8352_v28 = vpack.i.bf16 %v10326_v30, %v10323_v8  ;;  %v10343_v46 = vmax.f32 %v9762_v45, %v4369_v53  ;;  %4997 = vmatpush2.msra.mxu0 %v4722_v61  ;;  %v4716_v53 = vld [vmem:[%s12121_s3 + $0x310] sm:$0xff] }
 0x2b9   : > { %v8321_v20 = vunpack.i.h.bf16 %v8319_v35  ;;  %v8320_v16 = vunpack.i.l.bf16 %v8319_v35  ;;  %v4368_v36 = vsel %vm770_vm2, %v8316_v47, %v8310_v57  ;;  %v4370_v56 = vsel %vm770_vm2, %v8311_v23, %v8315_v5  ;;  %4998 = vmatprep.subr.mxu0 %v4721_v27 }
 0x2ba   : > { %v10355_v45 = vpop.permute.xlu0 %8323  ;;  %8353 = vrot.lane.b32.xlu1 %v8352_v28, %s12262_s25  ;;  %v8357_v38 = vpack.i.bf16 %v10343_v46, %v10340_v54  ;;  %v10361_v0 = vmax.f32 %v9753_v24, %v4368_v36  ;;  %v10364_v40 = vmax.f32 %v9843_v39, %v4370_v56  ;;  %4999 = vmatpush2.msra.mxu0 %v4720_v12  ;;  %v4719_v24 = vld [vmem:[%s12121_s3 + $0x328] sm:$0xff]  ;;  %v4714_v36 = vld [vmem:[%s12121_s3 + $0x300] sm:$0xff] }
 0x2bb   : > { %v8326_v58 = vunpack.i.h.bf16 %v10355_v45  ;;  %v8325_v34 = vunpack.i.l.bf16 %v10355_v45  ;;  %v4374_v22 = vsel %vm770_vm2, %v8320_v16, %v8321_v20  ;;  %5000 = vmatprep.subr.mxu0 %v4719_v24 }
 0x2bc   : > { %v8329_v25 = vpop.permute.xlu1 %8328  ;;  %8358 = vrot.lane.b32.xlu0 %v8357_v38, %s12262_s25  ;;  %v8362_v39 = vpack.i.bf16 %v10361_v0, %v10364_v40  ;;  %5001 = vmatpush2.msra.mxu0 %v4718_v42  ;;  %v10392_v17 = vmax.f32 %v9785_v33, %v4374_v22  ;;  %v4715_v33 = vld [vmem:[%s12121_s3 + $0x308] sm:$0xff] }
 0x2bd   : > { %v8331_v26 = vunpack.i.h.bf16 %v8329_v25  ;;  %v8330_v23 = vunpack.i.l.bf16 %v8329_v25  ;;  %v4375_v57 = vsel %vm770_vm2, %v8321_v20, %v8325_v34  ;;  %v4373_v6 = vsel %vm770_vm2, %v8326_v58, %v8320_v16  ;;  %5002 = vmatprep.subr.mxu0 %v4717_v4 }
 0x2be   : > { %8363 = vrot.lane.b32.xlu1 %v8362_v39, %s12262_s25  ;;  %v10389_v3 = vpop.permute.xlu0 %8338  ;;  %v10395_v47 = vmax.f32 %v9866_v59, %v4375_v57  ;;  %5003 = vmatpush2.msra.mxu0 %v4716_v53  ;;  %v10409_v20 = vmax.f32 %v9777_v19, %v4373_v6 }
 0x2bf   : > { %v8341_v11 = vunpack.i.h.bf16 %v10389_v3  ;;  %v8340_v35 = vunpack.i.l.bf16 %v10389_v3  ;;  %v4379_v28 = vsel %vm770_vm2, %v8330_v23, %v8331_v26  ;;  %5004 = vmatprep.subr.mxu0 %v4715_v33 }
 0x2c0   : > { %v8334_v61 = vpop.permute.xlu1 %8333  ;;  %v8367_v59 = vpack.i.bf16 %v10395_v47, %v10392_v17  ;;  %v10412_v16 = vmax.f32 %v9805_v55, %v4379_v28  ;;  %5005 = vmatpush2.msra.mxu0 %v4714_v36 }
 0x2c1   : > { %v8336_v56 = vunpack.i.h.bf16 %v8334_v61  ;;  %v8335_v27 = vunpack.i.l.bf16 %v8334_v61  ;;  %v4378_v38 = vsel %vm770_vm2, %v8341_v11, %v8330_v23  ;;  %v4380_v12 = vsel %vm770_vm2, %v8331_v26, %v8340_v35 }
 0x2c2   : > { %v4309_v58 = vpop.permute.xlu0 %4308  ;;  %8368 = vrot.lane.b32.xlu0 %v8367_v59, %s12262_s25  ;;  %v8372_v19 = vpack.i.bf16 %v10412_v16, %v10409_v20  ;;  %v10423_v55 = vmax.f32 %v9796_v2, %v4378_v38  ;;  %v10426_v22 = vmax.f32 %v9885_v1, %v4380_v12 }
 0x2c3   : > { %v4362_v24 = vsel %vm770_vm2, %v8335_v27, %v4309_v58  ;;  %v4361_v25 = vsel %vm770_vm2, %v8295_v31, %v8335_v27  ;;  %v4366_v49 = vsel %vm770_vm2, %v8305_v37, %v8336_v56  ;;  %v10452_v6 = vmax.f32 %v9909_v15, %v4309_v58  ;;  %v4795_v27 = vld [vmem:[%s12120_s2 + $0x8] sm:$0xff] }
 0x2c4   : > { %v10433_v39 = vmax.f32 %v9820_v9, %v4362_v24  ;;  %v4321_v42 = vpop.permute.xlu1 %4320  ;;  %8373 = vrot.lane.b32.xlu1 %v8372_v19, %s12262_s25  ;;  %v8377_v26 = vpack.i.bf16 %v10423_v55, %v10426_v22  ;;  %v10439_v2 = vmax.f32 %v9807_v21, %v4361_v25  ;;  %v10456_v18 = vmax.f32 %v9830_v51, %v4366_v49 }
 0x2c5   : > { %v4367_v1 = vsel %vm770_vm2, %v8336_v56, %v4321_v42  ;;  %v10474_v28 = vmax.f32 %v9913_v14, %v4321_v42  ;;  %v4796_v56 = vld [vmem:[%s12120_s2 + $0x10] sm:$0xff] }
 0x2c6   : > { %v10446_v31 = vmax.f32 %v9845_v52, %v4367_v1  ;;  %v8344_v9 = vpop.permute.xlu0 %8343  ;;  %8378 = vrot.lane.b32.xlu0 %v8377_v26, %s12262_s25  ;;  %v8382_v23 = vpack.i.bf16 %v10433_v39, %v10439_v2 }
 0x2c7   : > { %v8345_v57 = vunpack.i.l.bf16 %v8344_v9  ;;  %v8346_v37 = vunpack.i.h.bf16 %v8344_v9 }
 0x2c8   : > { %v4333_v21 = vpop.permute.xlu1 %4332  ;;  %8383 = vrot.lane.b32.xlu1 %v8382_v23, %s12262_s25  ;;  %v8387_v15 = vpack.i.bf16 %v10446_v31, %v10456_v18  ;;  %v4776_v23 = vld [vmem:[%s12121_s3 + $0x4f0] sm:$0xff] }
 0x2c9   : > { %v4372_v52 = vsel %vm770_vm2, %v8345_v57, %v4333_v21  ;;  %v4371_v4 = vsel %vm770_vm2, %v8315_v5, %v8345_v57  ;;  %v10489_v61 = vmax.f32 %v9920_v48, %v4333_v21  ;;  %v4775_v21 = vld [vmem:[%s12121_s3 + $0x4e8] sm:$0xff] }
 0x2ca   : > { %v10463_v3 = vmax.f32 %v9868_v60, %v4372_v52  ;;  %v4345_v53 = vpop.permute.xlu0 %4344  ;;  %4483 = vrot.lane.b32.xlu0 %v10452_v6, %s12262_s25  ;;  %v10470_v51 = vmax.f32 %v9854_v62, %v4371_v4  ;;  %v4376_v60 = vsel %vm770_vm2, %v8325_v34, %v8346_v37 }
 0x2cb   : > { %v4377_v11 = vsel %vm770_vm2, %v8346_v37, %v4345_v53  ;;  %v10493_v45 = vmax.f32 %v9876_v29, %v4376_v60  ;;  %v10504_v36 = vmax.f32 %v9924_v50, %v4345_v53  ;;  %v4798_v50 = vld [vmem:[%s12120_s2 + $0x20] sm:$0xff]  ;;  %v4773_v53 = vld [vmem:[%s12121_s3 + $0x4d8] sm:$0xff] }
 0x2cc   : > { %8388 = vrot.lane.b32.xlu1 %v8387_v15, %s12262_s25  ;;  %v10481_v13 = vmax.f32 %v9887_v44, %v4377_v11  ;;  %v4355_v5 = vpop.permute.xlu1 %4354  ;;  %v8392_v33 = vpack.i.bf16 %v10463_v3, %v10470_v51 }
 0x2cd   : > { %v4381_v44 = vsel %vm770_vm2, %v8340_v35, %v4355_v5  ;;  %v8507_v35 = vmov 0  }
 0x2ce   : > { %4495 = vrot.lane.b32.xlu0 %v10474_v28, %s12262_s25  ;;  %v4357_v62 = vpop.permute.xlu0 %4356  ;;  %v8397_v59 = vpack.i.bf16 %v10481_v13, %v10493_v45  ;;  %v10507_v48 = vmax.f32 %v9893_v7, %v4381_v44  ;;  %v4797_v7 = vld [vmem:[%s12120_s2 + $0x18] sm:$0xff]  ;;  %8407 = vset.pattern.permute.xlu1 %v8507_v35 }
 0x2cf   : > { %v4382_v14 = vsel %vm770_vm2, %v4355_v5, %v4357_v62  ;;  %8408 = vset.pattern.permute.xlu0 %v8507_v35 }
 0x2d0   : > { %8393 = vrot.lane.b32.xlu1 %v8392_v33, %s12262_s25  ;;  %v10497_v34 = vmax.f32 %v9899_v41, %v4382_v14  ;;  %v10515_v41 = vmax.f32 %v9939_v43, %v4357_v62  ;;  %v4794_v43 = vld [vmem:[%s12120_s2] sm:$0xff]  ;;  %v4772_v62 = vld [vmem:[%s12121_s3 + $0x4d0] sm:$0xff] }
 0x2d1   : > { %v4770_v14 = vld [vmem:[%s12121_s3 + $0x4c0] sm:$0xff] }
 0x2d2   : > { %4507 = vrot.lane.b32.xlu0 %v10489_v61, %s12262_s25  ;;  %v8402_v29 = vpack.i.bf16 %v10497_v34, %v10507_v48 }
 0x2d4   : > { %8398 = vrot.lane.b32.xlu1 %v8397_v59, %s12262_s25 }
 0x2d6   : > { %4519 = vrot.lane.b32.xlu0 %v10504_v36, %s12262_s25 }
 0x2d8   : > { %8403 = vrot.lane.b32.xlu1 %v8402_v29, %s12262_s25 }
 0x2da   : > { %4531 = vrot.lane.b32.xlu0 %v10515_v41, %s12262_s25 }
 0x2dc   : > { %4821 = vperm.xlu1 %8407, %v4798_v50  }
 0x2de   : > { %4816 = vperm.xlu0 %8408, %v4797_v7  }
 0x2e0   : > { %4811 = vperm.xlu1 %8407, %v4796_v56  }
 0x2e2   : > { %4801 = vperm.xlu0 %8408, %v4794_v43   ;;  %v4768_v43 = vld [vmem:[%s12121_s3 + $0x4b0] sm:$0xff] }
 0x2e4   : > { %4806 = vperm.xlu1 %8407, %v4795_v27  }
 0x326   : > { %v4474_v19 = vpop.permute.xlu0 %4473 }
 0x328   : > { %v10535_v38 = vpop.permute.xlu1 %8348 }
 0x329   : > { %v8351_v12 = vunpack.i.h.bf16 %v10535_v38  ;;  %v8350_v58 = vunpack.i.l.bf16 %v10535_v38 }
 0x32b   : > { %v4533_v24 = vsel %vm1640_vm4, %v4474_v19, %v8350_v58  ;;  %v4534_v25 = vsel %vm1640_vm4, %v8350_v58, %v8351_v12  ;;  %v4766_v19 = vld [vmem:[%s12121_s3 + $0x4a0] sm:$0xff] }
 0x32c   : > { %v4588_v42 = vmax.f32 %v10288_v10, %v4533_v24  ;;  %v10544_v26 = vpop.permute.xlu1 %8353  ;;  %v4589_v1 = vmax.f32 %v10291_v63, %v4534_v25  ;;  %v4774_v10 = vld [vmem:[%s12121_s3 + $0x4e0] sm:$0xff] }
 0x32d   : > { %v8356_v49 = vunpack.i.h.bf16 %v10544_v26  ;;  %v8355_v9 = vunpack.i.l.bf16 %v10544_v26 }
 0x32e   : > { %4911 = vmatprep.mubr.f32.mxu1 %v4589_v1  ;;  %v8359_v57 = vpop.permute.xlu0 %8358  ;;  %v4765_v1 = vld [vmem:[%s12121_s3 + $0x498] sm:$0xff] }
 0x32f   : > { %v8360_v37 = vunpack.i.l.bf16 %v8359_v57  ;;  %4912 = vmatmul.mubr.f32.vlgmr.msra.gmra.mxu1 %v4588_v42  ;;  %v4539_v63 = vsel %vm1640_vm4, %v8355_v9, %v8356_v49  ;;  %v8361_v15 = vunpack.i.h.bf16 %v8359_v57 }
 0x330   : > { %5038 = vmatpush1.msra.mxu1 %v4776_v23  ;;  %v10561_v52 = vpop.permute.xlu1 %8363  ;;  %v4595_v4 = vmax.f32 %v10323_v8, %v4539_v63  ;;  %v4771_v8 = vld [vmem:[%s12121_s3 + $0x4c8] sm:$0xff] }
 0x331   : > { %v4538_v11 = vsel %vm1640_vm4, %v8360_v37, %v8355_v9  ;;  %v8366_v60 = vunpack.i.h.bf16 %v10561_v52  ;;  %v8365_v5 = vunpack.i.l.bf16 %v10561_v52  ;;  %5039 = vmatprep.subr.mxu1 %v4775_v21  ;;  %v4764_v21 = vld [vmem:[%s12121_s3 + $0x490] sm:$0xff] }
 0x332   : > { %5040 = vmatpush1.msra.mxu1 %v4774_v10  ;;  %4917 = vmatprep.mubr.f32.mxu1 %v4595_v4  ;;  %v4594_v33 = vmax.f32 %v10340_v54, %v4538_v11  ;;  %v4769_v54 = vld [vmem:[%s12121_s3 + $0x4b8] sm:$0xff] }
 0x333   : > { %5041 = vmatprep.subr.mxu1 %v4773_v53  ;;  %v4544_v44 = vsel %vm1640_vm4, %v8361_v15, %v8365_v5  ;;  %v4543_v59 = vsel %vm1640_vm4, %v8366_v60, %v8361_v15  ;;  %v4762_v53 = vld [vmem:[%s12121_s3 + $0x480] sm:$0xff] }
 0x334   : > { %5042 = vmatpush1.msra.mxu1 %v4772_v62  ;;  %v10584_v29 = vpop.permute.xlu0 %8368  ;;  %v4601_v7 = vmax.f32 %v10343_v46, %v4544_v44  ;;  %v4767_v46 = vld [vmem:[%s12121_s3 + $0x4a8] sm:$0xff]  ;;  %v4600_v58 = vmax.f32 %v10361_v0, %v4543_v59 }
 0x335   : > { %5043 = vmatprep.subr.mxu1 %v4771_v8  ;;  %v8371_v50 = vunpack.i.h.bf16 %v10584_v29  ;;  %v8370_v35 = vunpack.i.l.bf16 %v10584_v29  ;;  %4918 = vmatmul.mubr.f32.gmra.mxu1 %v4594_v33  ;;  %v4760_v8 = vld [vmem:[%s12121_s3 + $0x470] sm:$0xff] }
 0x336   : > { %5044 = vmatpush1.msra.mxu1 %v4770_v14  ;;  %v8374_v56 = vpop.permute.xlu1 %8373  ;;  %4923 = vmatprep.mubr.f32.mxu1 %v4601_v7 }
 0x337   : > { %v8375_v27 = vunpack.i.l.bf16 %v8374_v56  ;;  %5045 = vmatprep.subr.mxu1 %v4769_v54  ;;  %v4549_v24 = vsel %vm1640_vm4, %v8370_v35, %v8371_v50  ;;  %v8376_v9 = vunpack.i.h.bf16 %v8374_v56  ;;  %v4758_v54 = vld [vmem:[%s12121_s3 + $0x460] sm:$0xff]  ;;  %v4756_v56 = vld [vmem:[%s12121_s3 + $0x450] sm:$0xff] }
 0x338   : > { %5046 = vmatpush1.msra.mxu1 %v4768_v43  ;;  %v10605_v25 = vpop.permute.xlu0 %8378  ;;  %v4607_v42 = vmax.f32 %v10392_v17, %v4549_v24  ;;  %v4763_v17 = vld [vmem:[%s12121_s3 + $0x488] sm:$0xff]  ;;  %v4753_v24 = vld [vmem:[%s12121_s3 + $0x438] sm:$0xff] }
 0x339   : > { %v4548_v0 = vsel %vm1640_vm4, %v8375_v27, %v8370_v35  ;;  %5047 = vmatprep.subr.mxu1 %v4767_v46  ;;  %v8381_v23 = vunpack.i.h.bf16 %v10605_v25  ;;  %v8380_v57 = vunpack.i.l.bf16 %v10605_v25  ;;  %4924 = vmatmul.mubr.f32.gmra.mxu1 %v4600_v58  ;;  %v4755_v58 = vld [vmem:[%s12121_s3 + $0x448] sm:$0xff] }
 0x33a   : > { %5048 = vmatpush1.msra.mxu1 %v4766_v19  ;;  %v10617_v37 = vpop.permute.xlu1 %8383  ;;  %4929 = vmatprep.mubr.f32.mxu1 %v4607_v42  ;;  %v4606_v10 = vmax.f32 %v10409_v20, %v4548_v0  ;;  %v4761_v20 = vld [vmem:[%s12121_s3 + $0x478] sm:$0xff]  ;;  %v4754_v19 = vld [vmem:[%s12121_s3 + $0x440] sm:$0xff]  ;;  %v4752_v42 = vld [vmem:[%s12121_s3 + $0x430] sm:$0xff] }
 0x33b   : > { %v8386_v63 = vunpack.i.h.bf16 %v10617_v37  ;;  %v8385_v4 = vunpack.i.l.bf16 %v10617_v37  ;;  %5049 = vmatprep.subr.mxu1 %v4765_v1  ;;  %v4554_v15 = vsel %vm1640_vm4, %v8376_v9, %v8380_v57  ;;  %v4553_v60 = vsel %vm1640_vm4, %v8381_v23, %v8376_v9  ;;  %v4751_v23 = vld [vmem:[%s12121_s3 + $0x428] sm:$0xff] }
 0x33c   : > { %5050 = vmatpush1.msra.mxu1 %v4764_v21  ;;  %v4613_v11 = vmax.f32 %v10412_v16, %v4554_v15  ;;  %v10643_v14 = vpop.permute.xlu0 %4483  ;;  %v4612_v7 = vmax.f32 %v10423_v55, %v4553_v60  ;;  %v4750_v21 = vld [vmem:[%s12121_s3 + $0x420] sm:$0xff]  ;;  %v4793_v60 = vld [vmem:[%s12121_s3 + $0x578] sm:$0x1] }
 0x33d   : > { %v4535_v62 = vsel %vm1640_vm4, %v8351_v12, %v8385_v4  ;;  %5051 = vmatprep.subr.mxu1 %v4763_v17  ;;  %4930 = vmatmul.mubr.f32.gmra.mxu1 %v4606_v10  ;;  %v4536_v38 = vsel %vm1640_vm4, %v8385_v4, %v8386_v63  ;;  %v4759_v12 = vld [vmem:[%s12121_s3 + $0x468] sm:$0xff]  ;;  %v4593_v35 = vmax.f32 %v10452_v6, %v10643_v14  ;;  %v4749_v17 = vld [vmem:[%s12121_s3 + $0x418] sm:$0xff]  ;;  %v4748_v10 = vld [vmem:[%s12121_s3 + $0x410] sm:$0xff] }
 0x33e   : > { %v4590_v33 = vmax.f32 %v10294_v32, %v4535_v62  ;;  %5052 = vmatpush1.msra.mxu1 %v4762_v53  ;;  %v10645_v16 = vpop.permute.xlu1 %8388  ;;  %4935 = vmatprep.mubr.f32.mxu1 %v4613_v11  ;;  %v4591_v32 = vmax.f32 %v10439_v2, %v4536_v38  ;;  %v4757_v2 = vld [vmem:[%s12121_s3 + $0x458] sm:$0xff]  ;;  %v4747_v11 = vld [vmem:[%s12121_s3 + $0x408] sm:$0xff] }
 0x33f   : > { %v8391_v44 = vunpack.i.h.bf16 %v10645_v16  ;;  %v8390_v59 = vunpack.i.l.bf16 %v10645_v16  ;;  %5053 = vmatprep.subr.mxu1 %v4761_v20  ;;  %v4746_v20 = vld [vmem:[%s12121_s3 + $0x400] sm:$0xff]  ;;  %v4787_v38 = vld [vmem:[%s12121_s3 + $0x548] sm:$0xff] }
 0x340   : > { %5054 = vmatpush1.msra.mxu1 %v4760_v8  ;;  %5006 = vmatprep.mubr.f32.mxu0 %v4591_v32  ;;  %v4791_v8 = vld [vmem:[%s12121_s3 + $0x568] sm:$0xff]  ;;  %v4785_v32 = vld [vmem:[%s12121_s3 + $0x538] sm:$0xff] }
 0x341   : > { %v4540_v43 = vsel %vm1640_vm4, %v8356_v49, %v8390_v59  ;;  %5055 = vmatprep.subr.mxu1 %v4759_v12  ;;  %4936 = vmatmul.mubr.f32.gmra.mxu1 %v4612_v7  ;;  %v4541_v6 = vsel %vm1640_vm4, %v8390_v59, %v8391_v44  ;;  %v12263_v12 = vmov 0.0   ;;  %v4786_v59 = vld [vmem:[%s12121_s3 + $0x540] sm:$0xff]  ;;  %v4496_v7 = vpop.permute.xlu0 %4495 }
 0x342   : > { %5007 = vmatmul.mubr.f32.vlgmr.msra.gmra.mxu0 %v4590_v33  ;;  %v10668_v55 = vpop.permute.xlu1 %8393  ;;  %v4596_v26 = vmax.f32 %v10326_v30, %v4540_v43  ;;  %5056 = vmatpush1.msra.mxu1 %v4758_v54  ;;  %v4597_v27 = vmax.f32 %v10456_v18, %v4541_v6  ;;  %v4790_v33 = vld [vmem:[%s12121_s3 + $0x560] sm:$0xff]  ;;  %v4784_v54 = vld [vmem:[%s12121_s3 + $0x530] sm:$0xff]  ;;  %v4537_v6 = vsel %vm1640_vm4, %v8386_v63, %v10643_v14 }
 0x343   : > { %8012 = vmatprep.mubr.msk.f32.mxu1 %vm4824_vm11, %v4593_v35  ;;  %v8396_v49 = vunpack.i.h.bf16 %v10668_v55  ;;  %v8395_v46 = vunpack.i.l.bf16 %v10668_v55  ;;  %5057 = vmatprep.subr.mxu1 %v4757_v2  ;;  %v4783_v35 = vld [vmem:[%s12121_s3 + $0x528] sm:$0xff]  ;;  %v4782_v43 = vld [vmem:[%s12121_s3 + $0x520] sm:$0xff]  ;;  %v4781_v2 = vld [vmem:[%s12121_s3 + $0x518] sm:$0xff]  ;;  %v4542_v37 = vsel %vm1640_vm4, %v8391_v44, %v4496_v7  ;;  %v4599_v63 = vmax.f32 %v10474_v28, %v4496_v7 }
 0x344   : > { %5058 = vmatpush1.msra.mxu1 %v4756_v56  ;;  %5012 = vmatprep.mubr.f32.mxu0 %v4597_v27  ;;  %v4780_v56 = vld [vmem:[%s12121_s3 + $0x510] sm:$0xff]  ;;  %v4778_v27 = vld [vmem:[%s12121_s3 + $0x500] sm:$0xff]  ;;  %v4598_v14 = vmax.f32 %v10446_v31, %v4542_v37 }
 0x345   : > { %v4545_v30 = vsel %vm1640_vm4, %v8365_v5, %v8395_v46  ;;  %5059 = vmatprep.subr.mxu1 %v4755_v58  ;;  %v4546_v52 = vsel %vm1640_vm4, %v8395_v46, %v8396_v49  ;;  %v4508_v46 = vpop.permute.xlu0 %4507  ;;  %v4592_v58 = vmax.f32 %v10433_v39, %v4537_v6 }
 0x346   : > { %5013 = vmatmul.mubr.f32.gmra.mxu0 %v4596_v26  ;;  %v10693_v18 = vpop.permute.xlu1 %8398  ;;  %v4602_v5 = vmax.f32 %v10364_v40, %v4545_v30  ;;  %5060 = vmatpush1.msra.mxu1 %v4754_v19  ;;  %v4603_v0 = vmax.f32 %v10470_v51, %v4546_v52  ;;  %v4779_v26 = vld [vmem:[%s12121_s3 + $0x508] sm:$0xff]  ;;  %v4547_v30 = vsel %vm1640_vm4, %v8396_v49, %v4508_v46 }
 0x347   : > { %v8401_v1 = vunpack.i.h.bf16 %v10693_v18  ;;  %v8400_v9 = vunpack.i.l.bf16 %v10693_v18  ;;  %5061 = vmatprep.subr.mxu1 %v4753_v24  ;;  %v4605_v39 = vmax.f32 %v10489_v61, %v4508_v46  ;;  %v4604_v16 = vmax.f32 %v10463_v3, %v4547_v30 }
 0x348   : > { %5062 = vmatpush1.msra.mxu1 %v4752_v42  ;;  %5018 = vmatprep.mubr.f32.mxu0 %v4603_v0 }
 0x349   : > { %v4550_v40 = vsel %vm1640_vm4, %v8371_v50, %v8400_v9  ;;  %5063 = vmatprep.subr.mxu1 %v4751_v23  ;;  %v4551_v29 = vsel %vm1640_vm4, %v8400_v9, %v8401_v1  ;;  %v4520_v19 = vpop.permute.xlu0 %4519 }
 0x34a   : > { %5019 = vmatmul.mubr.f32.gmra.mxu0 %v4602_v5  ;;  %v10717_v51 = vpop.permute.xlu1 %8403  ;;  %v4608_v50 = vmax.f32 %v10395_v47, %v4550_v40  ;;  %5064 = vmatpush1.msra.mxu1 %v4750_v21  ;;  %v4609_v15 = vmax.f32 %v10493_v45, %v4551_v29  ;;  %v4792_v45 = vld [vmem:[%s12121_s3 + $0x570] sm:$0x1]  ;;  %v4552_v28 = vsel %vm1640_vm4, %v8401_v1, %v4520_v19 }
 0x34b   : > { %v8406_v4 = vunpack.i.h.bf16 %v10717_v51  ;;  %v8405_v53 = vunpack.i.l.bf16 %v10717_v51  ;;  %5065 = vmatprep.subr.mxu1 %v4749_v17  ;;  %v4611_v44 = vmax.f32 %v10504_v36, %v4520_v19  ;;  %v4610_v31 = vmax.f32 %v10481_v13, %v4552_v28 }
 0x34c   : > { %5066 = vmatpush1.msra.mxu1 %v4748_v10  ;;  %5024 = vmatprep.mubr.f32.mxu0 %v4609_v15 }
 0x34d   : > { %v4555_v47 = vsel %vm1640_vm4, %v8380_v57, %v8405_v53  ;;  %5067 = vmatprep.subr.mxu1 %v4747_v11  ;;  %v4556_v62 = vsel %vm1640_vm4, %v8405_v53, %v8406_v4  ;;  %v4532_v24 = vpop.permute.xlu0 %4531 }
 0x34e   : > { %5025 = vmatmul.mubr.f32.gmra.mxu0 %v4608_v50  ;;  %v4614_v25 = vmax.f32 %v10426_v22, %v4555_v47  ;;  %5068 = vmatpush1.msra.mxu1 %v4746_v20  ;;  %v4615_v57 = vmax.f32 %v10507_v48, %v4556_v62  ;;  %v4789_v22 = vld [vmem:[%s12121_s3 + $0x558] sm:$0xff]  ;;  %v4788_v48 = vld [vmem:[%s12121_s3 + $0x550] sm:$0xff]  ;;  %v4557_v61 = vsel %vm1640_vm4, %v8406_v4, %v4532_v24 }
 0x34f   : > { %8010 = vmatprep.subr.msk.mxu1 %vm4840_vm12, %v4793_v60  ;;  %v4617_v55 = vmax.f32 %v10515_v41, %v4532_v24  ;;  %v4616_v3 = vmax.f32 %v10497_v34, %v4557_v61 }
 0x350   : > { %8011 = vmatpush2.msk.msra.mxu1 %vm4840_vm12, %v4792_v45  ;;  %5030 = vmatprep.mubr.f32.mxu0 %v4615_v57 }
 0x351   : > { %5087 = vmatprep.subr.mxu1 %v4791_v8 }
 0x352   : > { %5031 = vmatmul.mubr.f32.gmra.mxu0 %v4614_v25  ;;  %5088 = vmatpush2.msra.mxu1 %v4790_v33 }
 0x353   : > { %5248 = vmatprep.mubr.f32.mxu0 %v12263_v12  ;;  %5089 = vmatprep.subr.mxu1 %v4789_v22 }
 0x354   : > { %5090 = vmatpush2.msra.mxu1 %v4788_v48 }
 0x355   : > { %5091 = vmatprep.subr.mxu1 %v4787_v38 }
 0x356   : > { %5092 = vmatpush2.msra.mxu1 %v4786_v59 }
 0x357   : > { %5093 = vmatprep.subr.mxu1 %v4785_v32  ;;  %v10824_v9 = vpop.permute.xlu1 %4821 }
 0x358   : > { %5094 = vmatpush2.msra.mxu1 %v4784_v54 }
 0x359   : > { %5095 = vmatprep.subr.mxu1 %v4783_v35  ;;  %v4817_v23 = vpop.permute.xlu0 %4816 }
 0x35a   : > { %5096 = vmatpush2.msra.mxu1 %v4782_v43 }
 0x35b   : > { %5097 = vmatprep.subr.mxu1 %v4781_v2  ;;  %v4812_v17 = vpop.permute.xlu1 %4811 }
 0x35c   : > { %5098 = vmatpush2.msra.mxu1 %v4780_v56 }
 0x35d   : > { %5099 = vmatprep.subr.mxu1 %v4779_v26  ;;  %v4802_v34 = vpop.permute.xlu0 %4801 }
 0x35e   : > { %5100 = vmatpush2.msra.mxu1 %v4778_v27 }
 0x35f   : > { %5102 = vmatmul.mubr.f32.vlgmr.msra.gmra.mxu1 %v4592_v58  ;;  %v4807_v29 = vpop.permute.xlu1 %4806 }
 0x360   : > { %8013 = vmatprep.mubr.msk.f32.mxu1 %vm4824_vm11, %v4599_v63 }
 0x363   : > { %5108 = vmatmul.mubr.f32.gmra.mxu1 %v4598_v14 }
 0x364   : > { %8014 = vmatprep.mubr.msk.f32.mxu1 %vm4824_vm11, %v4605_v39 }
 0x367   : > { %5114 = vmatmul.mubr.f32.gmra.mxu1 %v4604_v16 }
 0x368   : > { %8015 = vmatprep.mubr.msk.f32.mxu1 %vm4824_vm11, %v4611_v44 }
 0x36b   : > { %5120 = vmatmul.mubr.f32.gmra.mxu1 %v4610_v31 }
 0x36c   : > { %8016 = vmatprep.mubr.msk.f32.mxu1 %vm4824_vm11, %v4617_v55 }
 0x36f   : > { %5126 = vmatmul.mubr.f32.gmra.mxu1 %v4616_v3 }
 0x370   : > { %5631 = vmatprep.mubr.f32.mxu1 %v12263_v12 }
 0x3ef   : > { %v4913_v36 = vpop.f32.mrf.mxu1 }
 0x3f0   : > { %v4914_v50 = vadd.f32 %v4913_v36, %v4802_v34 }
 0x3f1   : > { %v4915_v49 = vpop.f32.mrf.mxu1 }
 0x3f2   : > { %v4916_v15 = vadd.f32 %v4915_v49, %v4802_v34 }
 0x3f5   : > { %v4919_v18 = vpop.f32.mrf.mxu1 }
 0x3f6   : > { %v4920_v47 = vadd.f32 %v4919_v18, %v4807_v29 }
 0x3f7   : > { %v4921_v42 = vpop.f32.mrf.mxu1 }
 0x3f8   : > { %v4922_v57 = vadd.f32 %v4921_v42, %v4807_v29  ;;  %v5164_v29 = vld [vmem:[%s12122_s4 + $0x8] sm:$0xff] }
 0x3f9   : > { %v4925_v52 = vpop.f32.mrf.mxu1 }
 0x3fa   : > { %v4926_v38 = vadd.f32 %v4925_v52, %v4812_v17 }
 0x3fb   : > { %v4927_v5 = vpop.f32.mrf.mxu1 }
 0x3fc   : > { %v4928_v43 = vadd.f32 %v4927_v5, %v4812_v17 }
 0x3fd   : > { %v4931_v0 = vpop.f32.mrf.mxu1 }
 0x3fe   : > { %v4932_v46 = vadd.f32 %v4931_v0, %v4817_v23 }
 0x3ff   : > { %v4933_v21 = vpop.f32.mrf.mxu1 }
 0x400   : > { %v4934_v19 = vadd.f32 %v4933_v21, %v4817_v23 }
 0x401   : > { %v4937_v51 = vpop.f32.mrf.mxu1 }
 0x402   : > { %v5008_v13 = vpop.f32.mrf.mxu0  ;;  %v4938_v44 = vadd.f32 %v4937_v51, %v10824_v9 }
 0x403   : > { %v4939_v4 = vpop.f32.mrf.mxu1  ;;  %v5009_v11 = vadd.f32 %v5008_v13, %v4914_v50  ;;  %v5165_v50 = vld [vmem:[%s12122_s4 + $0x10] sm:$0xff] }
 0x404   : > { %v5010_v1 = vpop.f32.mrf.mxu0  ;;  %v4940_v49 = vadd.f32 %v4939_v4, %v10824_v9  ;;  %v5166_v4 = vld [vmem:[%s12122_s4 + $0x18] sm:$0xff] }
 0x405   : > { %v5011_v60 = vadd.f32 %v5010_v1, %v4916_v15 }
 0x406   : > { %v5014_v41 = vpop.f32.mrf.mxu0 }
 0x407   : > { %v5015_v8 = vadd.f32 %v5014_v41, %v4920_v47 }
 0x408   : > { %v5016_v40 = vpop.f32.mrf.mxu0 }
 0x409   : > { %v5017_v59 = vadd.f32 %v5016_v40, %v4922_v57 }
 0x40a   : > { %v5020_v10 = vpop.f32.mrf.mxu0 }
 0x40b   : > { %v5021_v2 = vadd.f32 %v5020_v10, %v4926_v38  ;;  %v5163_v10 = vld [vmem:[%s12122_s4] sm:$0xff] }
 0x40c   : > { %v5022_v53 = vpop.f32.mrf.mxu0 }
 0x40d   : > { %v5023_v27 = vadd.f32 %v5022_v53, %v4928_v43  ;;  %v5167_v53 = vld [vmem:[%s12122_s4 + $0x20] sm:$0xff] }
 0x40e   : > { %v5026_v62 = vpop.f32.mrf.mxu0 }
 0x40f   : > { %v5027_v30 = vadd.f32 %v5026_v62, %v4932_v46 }
 0x410   : > { %v5028_v54 = vpop.f32.mrf.mxu0 }
 0x411   : > { %v5029_v24 = vadd.f32 %v5028_v54, %v4934_v19 }
 0x412   : > { %v5032_v63 = vpop.f32.mrf.mxu0 }
 0x413   : > { %v5033_v18 = vadd.f32 %v5032_v63, %v4938_v44 }
 0x414   : > { %v5034_v55 = vpop.f32.mrf.mxu0 }
 0x415   : > { %v5035_v5 = vadd.f32 %v5034_v55, %v4940_v49 }
 0x41f   : > { %v5103_v20 = vpop.f32.mrf.mxu1 }
 0x420   : > { %v5104_v45 = vadd.f32 %v5103_v20, %v5009_v11 }
 0x421   : > { %v5105_v25 = vpop.f32.mrf.mxu1 }
 0x422   : > { %v10826_v33 = vmax.f32 %v5104_v45, 0.0  ;;  %v5106_v22 = vadd.f32 %v5105_v25, %v5011_v60 }
 0x423   : > { %v5109_v48 = vpop.f32.mrf.mxu1 }
 0x424   : > { %v5133_v32 = vmax.f32 %v5106_v22, 0.0  ;;  %v5110_v7 = vadd.f32 %v5109_v48, %v5015_v8  ;;  %5316 = vrot.lane.b32.xlu1 %v10826_v33, %s12264_s0 }
 0x425   : > { %v5111_v35 = vpop.f32.mrf.mxu1 }
 0x426   : > { %5144 = vst.msk [vmem:[#allocation3 + $0x8] sm:$0xff] %vm5143_vm13, %v5133_v32  ;;  %v10831_v56 = vmax.f32 %v5110_v7, 0.0  ;;  %v5112_v6 = vadd.f32 %v5111_v35, %v5017_v59 }
 0x427   : > { %v5115_v26 = vpop.f32.mrf.mxu1 }
 0x428   : > { %v5135_v58 = vmax.f32 %v5112_v6, 0.0  ;;  %v5116_v37 = vadd.f32 %v5115_v26, %v5021_v2  ;;  %5517 = vrot.lane.b32.xlu1 %v10826_v33, %s12265_s15 }
 0x429   : > { %v5117_v14 = vpop.f32.mrf.mxu1 }
 0x42a   : > { %5146 = vst.msk [vmem:[#allocation3 + $0x18] sm:$0xff] %vm5143_vm13, %v5135_v58  ;;  %v10836_v39 = vmax.f32 %v5116_v37, 0.0  ;;  %v5118_v16 = vadd.f32 %v5117_v14, %v5023_v27 }
 0x42b   : > { %v5121_v28 = vpop.f32.mrf.mxu1 }
 0x42c   : > { %v5137_v31 = vmax.f32 %v5118_v16, 0.0  ;;  %v5122_v61 = vadd.f32 %v5121_v28, %v5027_v30  ;;  %5718 = vrot.lane.b32.xlu1 %v10826_v33, %s8508_s22 }
 0x42d   : > { %v5123_v3 = vpop.f32.mrf.mxu1  ;;  %v10841_v36 = vld [vmem:[#allocation3 + $0x8] sm:$0xff] }
 0x42e   : > { %5148 = vst.msk [vmem:[#allocation3 + $0x28] sm:$0xff] %vm5143_vm13, %v5137_v31  ;;  %v10845_v42 = vmax.f32 %v5122_v61, 0.0  ;;  %v5124_v52 = vadd.f32 %v5123_v3, %v5029_v24  ;;  %5318 = vrot.lane.b32.xlu0 %v10841_v36, %s12264_s0 }
 0x42f   : > { %v5127_v13 = vpop.f32.mrf.mxu1 }
 0x430   : > { %v5139_v1 = vmax.f32 %v5124_v52, 0.0  ;;  %v5128_v0 = vadd.f32 %v5127_v13, %v5033_v18  ;;  %5920 = vrot.lane.b32.xlu1 %v10826_v33, %s8509_s12 }
 0x431   : > { %v5129_v41 = vpop.f32.mrf.mxu1  ;;  %v10869_v17 = vld [vmem:[#allocation3 + $0x18] sm:$0xff] }
 0x432   : > { %5150 = vst.msk [vmem:[#allocation3 + $0x38] sm:$0xff] %vm5143_vm13, %v5139_v1  ;;  %v10852_v9 = vmax.f32 %v5128_v0, 0.0  ;;  %v5130_v23 = vadd.f32 %v5129_v41, %v5035_v5  ;;  %5519 = vrot.lane.b32.xlu0 %v10841_v36, %s12265_s15 }
 0x434   : > { %v5141_v21 = vmax.f32 %v5130_v23, 0.0  ;;  %5320 = vrot.lane.b32.xlu1 %v10831_v56, %s12264_s0 }
 0x435   : > { %v10881_v51 = vld [vmem:[#allocation3 + $0x28] sm:$0xff] }
 0x436   : > { %5152 = vst.msk [vmem:[#allocation3 + $0x48] sm:$0xff] %vm5143_vm13, %v5141_v21  ;;  %5720 = vrot.lane.b32.xlu0 %v10841_v36, %s8508_s22 }
 0x438   : > { %5521 = vrot.lane.b32.xlu1 %v10831_v56, %s12265_s15 }
 0x439   : > { %v10875_v34 = vld [vmem:[#allocation3 + $0x38] sm:$0xff] }
 0x43a   : > { %5922 = vrot.lane.b32.xlu0 %v10841_v36, %s8509_s12 }
 0x43c   : > { %5722 = vrot.lane.b32.xlu1 %v10831_v56, %s8508_s22 }
 0x43d   : > { %v10867_v40 = vld [vmem:[#allocation3 + $0x48] sm:$0xff] }
 0x43e   : > { %5206 = vmatprep.subr.mxu0 %v10867_v40  ;;  %5322 = vrot.lane.b32.xlu0 %v10869_v17, %s12264_s0 }
 0x43f   : > { %5207 = vmatpush1.msra.mxu0 %v10852_v9 }
 0x440   : > { %5208 = vmatprep.subr.mxu0 %v10875_v34  ;;  %5924 = vrot.lane.b32.xlu1 %v10831_v56, %s8509_s12 }
 0x441   : > { %5209 = vmatpush1.msra.mxu0 %v10845_v42 }
 0x442   : > { %5210 = vmatprep.subr.mxu0 %v10881_v51  ;;  %5523 = vrot.lane.b32.xlu0 %v10869_v17, %s12265_s15 }
 0x443   : > { %5211 = vmatpush1.msra.mxu0 %v10836_v39 }
 0x444   : > { %5212 = vmatprep.subr.mxu0 %v10869_v17  ;;  %6126 = vrot.lane.b32.xlu1 %v10831_v56, %s8510_s13 }
 0x445   : > { %5213 = vmatpush1.msra.mxu0 %v10831_v56 }
 0x446   : > { %5724 = vrot.lane.b32.xlu0 %v10869_v17, %s8508_s22  ;;  %5214 = vmatprep.subr.mxu0 %v10841_v36 }
 0x447   : > { %5215 = vmatpush1.msra.mxu0 %v10826_v33 }
 0x448   : > { %5324 = vrot.lane.b32.xlu1 %v10836_v39, %s12264_s0  ;;  %8017 = vmatmul.mubr.msk.f32.vlgmr.msra.gmra.mxu0 %vm5168_vm14, %v5163_v10 }
 0x449   : > { %5254 = vmatprep.mubr.f32.mxu0 %v12263_v12 }
 0x44a   : > { %5926 = vrot.lane.b32.xlu0 %v10869_v17, %s8509_s12 }
 0x44c   : > { %5525 = vrot.lane.b32.xlu1 %v10836_v39, %s12265_s15  ;;  %8018 = vmatmul.mubr.msk.f32.gmra.mxu0 %vm5168_vm14, %v5164_v29 }
 0x44d   : > { %5260 = vmatprep.mubr.f32.mxu0 %v12263_v12 }
 0x44e   : > { %6128 = vrot.lane.b32.xlu0 %v10869_v17, %s8510_s13 }
 0x450   : > { %5726 = vrot.lane.b32.xlu1 %v10836_v39, %s8508_s22  ;;  %8019 = vmatmul.mubr.msk.f32.gmra.mxu0 %vm5168_vm14, %v5165_v50  ;;  %v8024_v50 = vld [vmem:[%s12122_s4 + $0x38] sm:$0xff] }
 0x451   : > { %5266 = vmatprep.mubr.f32.mxu0 %v12263_v12 }
 0x452   : > { %5326 = vrot.lane.b32.xlu0 %v10881_v51, %s12264_s0 }
 0x454   : > { %5928 = vrot.lane.b32.xlu1 %v10836_v39, %s8509_s12  ;;  %8020 = vmatmul.mubr.msk.f32.gmra.mxu0 %vm5168_vm14, %v5166_v4 }
 0x455   : > { %5272 = vmatprep.mubr.f32.mxu0 %v12263_v12 }
 0x456   : > { %5527 = vrot.lane.b32.xlu0 %v10881_v51, %s12265_s15 }
 0x458   : > { %6130 = vrot.lane.b32.xlu1 %v10836_v39, %s8510_s13  ;;  %8021 = vmatmul.mubr.msk.f32.gmra.mxu0 %vm5168_vm14, %v5167_v53 }
 0x459   : > { %5430 = vmatprep.mubr.f32.mxu0 %v12263_v12 }
 0x45a   : > { %5728 = vrot.lane.b32.xlu0 %v10881_v51, %s8508_s22 }
 0x45c   : > { %5328 = vrot.lane.b32.xlu1 %v10845_v42, %s12264_s0 }
 0x45e   : > { %5930 = vrot.lane.b32.xlu0 %v10881_v51, %s8509_s12 }
 0x460   : > { %5529 = vrot.lane.b32.xlu1 %v10845_v42, %s12265_s15 }
 0x462   : > { %6132 = vrot.lane.b32.xlu0 %v10881_v51, %s8510_s13 }
 0x464   : > { %5730 = vrot.lane.b32.xlu1 %v10845_v42, %s8508_s22 }
 0x466   : > { %5330 = vrot.lane.b32.xlu0 %v10875_v34, %s12264_s0 }
 0x468   : > { %5932 = vrot.lane.b32.xlu1 %v10845_v42, %s8509_s12 }
 0x46a   : > { %5531 = vrot.lane.b32.xlu0 %v10875_v34, %s12265_s15 }
 0x46c   : > { %6134 = vrot.lane.b32.xlu1 %v10845_v42, %s8510_s13 }
 0x46e   : > { %5732 = vrot.lane.b32.xlu0 %v10875_v34, %s8508_s22 }
 0x470   : > { %5332 = vrot.lane.b32.xlu1 %v10852_v9, %s12264_s0 }
 0x472   : > { %5934 = vrot.lane.b32.xlu0 %v10875_v34, %s8509_s12 }
 0x474   : > { %6122 = vrot.lane.b32.xlu1 %v10826_v33, %s8510_s13 }
 0x476   : > { %6136 = vrot.lane.b32.xlu0 %v10875_v34, %s8510_s13 }
 0x478   : > { %5533 = vrot.lane.b32.xlu1 %v10852_v9, %s12265_s15 }
 0x47a   : > { %5334 = vrot.lane.b32.xlu0 %v10867_v40, %s12264_s0 }
 0x47c   : > { %5734 = vrot.lane.b32.xlu1 %v10852_v9, %s8508_s22 }
 0x47e   : > { %6124 = vrot.lane.b32.xlu0 %v10841_v36, %s8510_s13 }
 0x480   : > { %5936 = vrot.lane.b32.xlu1 %v10852_v9, %s8509_s12 }
 0x482   : > { %6338 = vrot.lane.b32.xlu0 %v10875_v34, %s8511_s16 }
 0x484   : > { %6138 = vrot.lane.b32.xlu1 %v10852_v9, %s8510_s13 }
 0x486   : > { %5535 = vrot.lane.b32.xlu0 %v10867_v40, %s12265_s15  ;;  %s8512_s15 = smov 101  }
 0x488   : > { %6340 = vrot.lane.b32.xlu1 %v10852_v9, %s8511_s16 }
 0x48a   : > { %6334 = vrot.lane.b32.xlu0 %v10881_v51, %s8511_s16 }
 0x48c   : > { %6336 = vrot.lane.b32.xlu1 %v10845_v42, %s8511_s16 }
 0x48e   : > { %5736 = vrot.lane.b32.xlu0 %v10867_v40, %s8508_s22 }
 0x490   : > { %6332 = vrot.lane.b32.xlu1 %v10836_v39, %s8511_s16 }
 0x492   : > { %6330 = vrot.lane.b32.xlu0 %v10869_v17, %s8511_s16 }
 0x494   : > { %6328 = vrot.lane.b32.xlu1 %v10831_v56, %s8511_s16 }
 0x496   : > { %6326 = vrot.lane.b32.xlu0 %v10841_v36, %s8511_s16  ;;  %v11000_v15 = vpop.permute.xlu1 %5316 }
 0x498   : > { %6324 = vrot.lane.b32.xlu1 %v10826_v33, %s8511_s16 }
 0x49a   : > { %5938 = vrot.lane.b32.xlu0 %v10867_v40, %s8509_s12  ;;  %v11006_v11 = vpop.permute.xlu1 %5517 }
 0x49c   : > { %6542 = vrot.lane.b32.xlu1 %v10852_v9, %s8512_s15 }
 0x49e   : > { %6540 = vrot.lane.b32.xlu0 %v10875_v34, %s8512_s15  ;;  %v11010_v20 = vpop.permute.xlu1 %5718 }
 0x4a0   : > { %v11012_v47 = vpop.permute.xlu0 %5318  ;;  %6538 = vrot.lane.b32.xlu1 %v10845_v42, %s8512_s15 }
 0x4a1   : > { %v5336_v23 = vsel %vm770_vm2, %v11000_v15, %v11012_v47 }
 0x4a2   : > { %6140 = vrot.lane.b32.xlu0 %v10867_v40, %s8510_s13  ;;  %v11017_v60 = vpop.permute.xlu1 %5920 }
 0x4a4   : > { %v11019_v45 = vpop.permute.xlu0 %5519  ;;  %6534 = vrot.lane.b32.xlu1 %v10836_v39, %s8512_s15 }
 0x4a6   : > { %6536 = vrot.lane.b32.xlu0 %v10881_v51, %s8512_s15  ;;  %v5321_v62 = vpop.permute.xlu1 %5320 }
 0x4a8   : > { %v11023_v25 = vpop.permute.xlu0 %5720  ;;  %6530 = vrot.lane.b32.xlu1 %v10831_v56, %s8512_s15 }
 0x4aa   : > { %6532 = vrot.lane.b32.xlu0 %v10869_v17, %s8512_s15  ;;  %v11027_v57 = vpop.permute.xlu1 %5521 }
 0x4ac   : > { %v11029_v8 = vpop.permute.xlu0 %5922  ;;  %6526 = vrot.lane.b32.xlu1 %v10826_v33, %s8512_s15 }
 0x4ae   : > { %6342 = vrot.lane.b32.xlu0 %v10867_v40, %s8511_s16  ;;  %v11034_v22 = vpop.permute.xlu1 %5722 }
 0x4b0   : > { %v5323_v48 = vpop.permute.xlu0 %5322  ;;  %6744 = vrot.lane.b32.xlu1 %v10852_v9, %s12262_s25  ;;  %v8022_v9 = vld [vmem:[%s12122_s4 + $0x28] sm:$0xff] }
 0x4b1   : > { %v5337_v38 = vsel %vm770_vm2, %v5321_v62, %v5323_v48  ;;  %v8025_v62 = vld [vmem:[%s12122_s4 + $0x40] sm:$0xff] }
 0x4b2   : > { %6528 = vrot.lane.b32.xlu0 %v10841_v36, %s8512_s15  ;;  %v11040_v59 = vpop.permute.xlu1 %5924 }
 0x4b4   : > { %v11042_v32 = vpop.permute.xlu0 %5523  ;;  %6740 = vrot.lane.b32.xlu1 %v10845_v42, %s12262_s25 }
 0x4b5   : > { %v5538_v15 = vsel %vm1205_vm3, %v11027_v57, %v11042_v32  ;;  %v5537_v57 = vsel %vm1205_vm3, %v11006_v11, %v11019_v45  ;;  %v8033_v11 = vld [vmem:[%s12122_s4 + $0x58] sm:$0xff] }
 0x4b6   : > { %6544 = vrot.lane.b32.xlu0 %v10867_v40, %s8512_s15  ;;  %v11047_v7 = vpop.permute.xlu1 %6126  ;;  %s8123_s15 = sshll.u32 %s8596_s21, 4  ;;  %s8514_s21 = smov [#allocation6]  }
 0x4b7   : > { %s12083_s30 = scalar_lea.hbm %s12129_s11, %s8123_s15  ;;  %s8440_s16 = sshll.u32 %s8514_s21, 4  ;;  %s8441_s16 = int_to_ptr.vmem [resolvable:$false] %s8440_s16 }
 0x4b8   : > { %v11049_v54 = vpop.permute.xlu0 %5724  ;;  %6736 = vrot.lane.b32.xlu1 %v10836_v39, %s12262_s25 }
 0x4ba   : > { %6742 = vrot.lane.b32.xlu0 %v10875_v34, %s12262_s25  ;;  %v5325_v35 = vpop.permute.xlu1 %5324 }
 0x4bc   : > { %v11055_v43 = vpop.permute.xlu0 %5926  ;;  %6732 = vrot.lane.b32.xlu1 %v10831_v56, %s12262_s25 }
 0x4be   : > { %6738 = vrot.lane.b32.xlu0 %v10881_v51, %s12262_s25  ;;  %v11061_v2 = vpop.permute.xlu1 %5525 }
 0x4c0   : > { %v11063_v6 = vpop.permute.xlu0 %6128  ;;  %6728 = vrot.lane.b32.xlu1 %v10826_v33, %s12262_s25 }
 0x4c2   : > { %6746 = vrot.lane.b32.xlu0 %v10867_v40, %s12262_s25  ;;  %v11069_v26 = vpop.permute.xlu1 %5726 }
 0x4c4   : > { %v5327_v46 = vpop.permute.xlu0 %5326 }
 0x4c5   : > { %v5338_v1 = vsel %vm770_vm2, %v5325_v35, %v5327_v46 }
 0x4c6   : > { %6734 = vrot.lane.b32.xlu0 %v10869_v17, %s12262_s25  ;;  %v5929_v56 = vpop.permute.xlu1 %5928  ;;  %v8023_v17 = vld [vmem:[%s12122_s4 + $0x30] sm:$0xff] }
 0x4c8   : > { %v5528_v27 = vpop.permute.xlu0 %5527 }
 0x4c9   : > { %v5539_v4 = vsel %vm1205_vm3, %v11061_v2, %v5528_v27 }
 0x4ca   : > { %6730 = vrot.lane.b32.xlu0 %v10841_v36, %s12262_s25  ;;  %v11075_v58 = vpop.permute.xlu1 %6130  ;;  %s378_s25 = scalar_lea.vmem [#allocation6], %s377_s14 }
 0x4cb   : > { %s7721_s12 = sshll.u32 %s378_s25, 4  ;;  %s7722_s12 = int_to_ptr.vmem [resolvable:$true] %s7721_s12 }
 0x4cc   : > { %v11077_v37 = vpop.permute.xlu0 %5728  ;;  %s8436_s29 = scalar_lea.vmem %s7722_s12, 16  ;;  %p8443_p0 = scmp.lt.s32.totalorder %s7722_s12, %s8441_s16 }
 0x4cd   : > { %p8437_p11 = scmp.ne.s32.totalorder %s7722_s12, %s8436_s29 }
 0x4ce   : > { %v5329_v63 = vpop.permute.xlu1 %5328 }
 0x4cf   : > { %p8438_p12 = pnand %p8437_p11, %p8613_p5 }
 0x4d0   : > { %v11079_v33 = vpop.permute.xlu0 %5930 }
 0x4d1   : > { %v11083_v14 = vsel %vm5940_vm15, %v5929_v56, %v11079_v33  ;;  %p8439_p13 = pneg %p8438_p12 }
 0x4d2   : > { %v5530_v19 = vpop.permute.xlu1 %5529 }
 0x4d4   : > { %v11085_v30 = vpop.permute.xlu0 %6132 }
 0x4d6   : > { %v11087_v39 = vpop.permute.xlu1 %5730 }
 0x4d8   : > { %v5331_v16 = vpop.permute.xlu0 %5330 }
 0x4d9   : > { %v5339_v13 = vsel %vm770_vm2, %v5329_v63, %v5331_v16 }
 0x4da   : > { %v11089_v28 = vpop.permute.xlu1 %5932 }
 0x4dc   : > { %v5532_v44 = vpop.permute.xlu0 %5531 }
 0x4dd   : > { %v5540_v10 = vsel %vm1205_vm3, %v5530_v19, %v5532_v44 }
 0x4de   : > { %v11091_v24 = vpop.permute.xlu1 %6134 }
 0x4e0   : > { %v11093_v31 = vpop.permute.xlu0 %5732 }
 0x4e1   : > { %v5742_v35 = vsel %vm5738_vm0, %v11087_v39, %v11093_v31  ;;  %v8035_v39 = vld [vmem:[%s12122_s4 + $0x68] sm:$0xff] }
 0x4e2   : > { %v5333_v61 = vpop.permute.xlu1 %5332 }
 0x4e4   : > { %v11095_v55 = vpop.permute.xlu0 %5934 }
 0x4e6   : > { %v11097_v3 = vpop.permute.xlu1 %6122 }
 0x4e8   : > { %v11099_v36 = vpop.permute.xlu0 %6136 }
 0x4ea   : > { %v5534_v49 = vpop.permute.xlu1 %5533 }
 0x4ec   : > { %v5335_v18 = vpop.permute.xlu0 %5334 }
 0x4ed   : > { %v5340_v42 = vsel %vm770_vm2, %v5333_v61, %v5335_v18  ;;  %5388 = vmatprep.subr.mxu0 %v5335_v18  ;;  %v8036_v61 = vld [vmem:[%s12122_s4 + $0x70] sm:$0xff]  ;;  %v5941_v18 = vsel %vm5940_vm15, %v11017_v60, %v11029_v8  ;;  %v6146_v60 = vsel %vm6142_vm1, %v11091_v24, %v11099_v36 }
 0x4ee   : > { %5389 = vmatpush1.msra.mxu0 %v5340_v42  ;;  %v5735_v52 = vpop.permute.xlu1 %5734  ;;  %v8045_v42 = vld [vmem:[%s12122_s4 + $0x90] sm:$0xff] }
 0x4ef   : > { %5390 = vmatprep.subr.mxu0 %v5331_v16 }
 0x4f0   : > { %v11103_v5 = vpop.permute.xlu0 %6124  ;;  %5391 = vmatpush1.msra.mxu0 %v5339_v13  ;;  %v6145_v13 = vsel %vm6142_vm1, %v11075_v58, %v11085_v30 }
 0x4f1   : > { %5392 = vmatprep.subr.mxu0 %v5327_v46  ;;  %v5741_v46 = vsel %vm5738_vm0, %v11069_v26, %v11077_v37  ;;  %v8034_v26 = vld [vmem:[%s12122_s4 + $0x60] sm:$0xff] }
 0x4f2   : > { %5393 = vmatpush1.msra.mxu0 %v5338_v1  ;;  %v11106_v0 = vpop.permute.xlu1 %5936  ;;  %v6144_v1 = vsel %vm6142_vm1, %v11047_v7, %v11063_v6 }
 0x4f3   : > { %5394 = vmatprep.subr.mxu0 %v5323_v48  ;;  %v8032_v48 = vld [vmem:[%s12122_s4 + $0x50] sm:$0xff] }
 0x4f4   : > { %v11108_v41 = vpop.permute.xlu0 %6338  ;;  %5395 = vmatpush1.msra.mxu0 %v5337_v38 }
 0x4f5   : > { %5396 = vmatprep.subr.mxu0 %v11012_v47 }
 0x4f6   : > { %5397 = vmatpush1.msra.mxu0 %v5336_v23  ;;  %v11117_v21 = vpop.permute.xlu1 %6138 }
 0x4f7   : > { %8027 = vmatmul.mubr.msk.f32.vlgmr.msra.gmra.mxu0 %vm5168_vm14, %v8022_v9 }
 0x4f8   : > { %v5536_v40 = vpop.permute.xlu0 %5535  ;;  %5436 = vmatprep.mubr.f32.mxu0 %v12263_v12 }
 0x4f9   : > { %v5541_v34 = vsel %vm1205_vm3, %v5534_v49, %v5536_v40  ;;  %5589 = vmatprep.subr.mxu1 %v5536_v40  ;;  %v5942_v49 = vsel %vm5940_vm15, %v11040_v59, %v11055_v43  ;;  %vm6344_vm3 = vcmask 834560   ;;  %v8063_v40 = vld [vmem:[%s12122_s4 + $0xd0] sm:$0xff] }
 0x4fa   : > { %5590 = vmatpush1.msra.mxu1 %v5541_v34  ;;  %v11125_v51 = vpop.permute.xlu1 %6340 }
 0x4fb   : > { %8028 = vmatmul.mubr.msk.f32.gmra.mxu0 %vm5168_vm14, %v8023_v17  ;;  %5591 = vmatprep.subr.mxu1 %v5532_v44  ;;  %v5944_v44 = vsel %vm5940_vm15, %v11089_v28, %v11095_v55  ;;  %v8044_v28 = vld [vmem:[%s12122_s4 + $0x88] sm:$0xff] }
 0x4fc   : > { %v11129_v29 = vpop.permute.xlu0 %6334  ;;  %5592 = vmatpush1.msra.mxu1 %v5540_v10  ;;  %5442 = vmatprep.mubr.f32.mxu0 %v12263_v12 }
 0x4fd   : > { %5593 = vmatprep.subr.mxu1 %v5528_v27  ;;  %v5740_v27 = vsel %vm5738_vm0, %v11034_v22, %v11049_v54  ;;  %v5739_v22 = vsel %vm5738_vm0, %v11010_v20, %v11023_v25  ;;  %v8043_v20 = vld [vmem:[%s12122_s4 + $0x80] sm:$0xff] }
 0x4fe   : > { %5594 = vmatpush1.msra.mxu1 %v5539_v4  ;;  %v11137_v53 = vpop.permute.xlu1 %6336 }
 0x4ff   : > { %8029 = vmatmul.mubr.msk.f32.gmra.mxu0 %vm5168_vm14, %v8024_v50  ;;  %5595 = vmatprep.subr.mxu1 %v11042_v32 }
 0x500   : > { %v5737_v47 = vpop.permute.xlu0 %5736  ;;  %5596 = vmatpush1.msra.mxu1 %v5538_v15  ;;  %5448 = vmatprep.mubr.f32.mxu0 %v12263_v12 }
 0x501   : > { %v5743_v38 = vsel %vm5738_vm0, %v5735_v52, %v5737_v47  ;;  %5597 = vmatprep.subr.mxu1 %v11019_v45  ;;  %5791 = vmatprep.subr.mxu0 %v5737_v47  ;;  %v8026_v45 = vld [vmem:[%s12122_s4 + $0x48] sm:$0xff] }
 0x502   : > { %5598 = vmatpush1.msra.mxu1 %v5537_v57  ;;  %5792 = vmatpush1.msra.mxu0 %v5743_v38  ;;  %v11156_v32 = vpop.permute.xlu1 %6332  ;;  %v8053_v52 = vld [vmem:[%s12122_s4 + $0xa8] sm:$0xff] }
 0x503   : > { %8030 = vmatmul.mubr.msk.f32.gmra.mxu0 %vm5168_vm14, %v8025_v62  ;;  %8037 = vmatmul.mubr.msk.f32.vlgmr.msra.gmra.mxu1 %vm5168_vm14, %v8032_v48  ;;  %v6347_v50 = vsel %vm6344_vm3, %v11156_v32, %v11129_v29  ;;  %v8072_v48 = vld [vmem:[%s12122_s4 + $0xf0] sm:$0xff]  ;;  %v8065_v32 = vld [vmem:[%s12122_s4 + $0xe0] sm:$0xff] }
 0x504   : > { %5793 = vmatprep.subr.mxu0 %v11093_v31  ;;  %v11164_v2 = vpop.permute.xlu0 %6330  ;;  %5637 = vmatprep.mubr.f32.mxu1 %v12263_v12 }
 0x505   : > { %5794 = vmatpush1.msra.mxu0 %v5742_v35  ;;  %5454 = vmatprep.mubr.f32.mxu0 %v12263_v12 }
 0x506   : > { %5795 = vmatprep.subr.mxu0 %v11077_v37  ;;  %v11178_v56 = vpop.permute.xlu1 %6328  ;;  %v8042_v37 = vld [vmem:[%s12122_s4 + $0x78] sm:$0xff] }
 0x507   : > { %5796 = vmatpush1.msra.mxu0 %v5741_v46  ;;  %8038 = vmatmul.mubr.msk.f32.gmra.mxu1 %vm5168_vm14, %v8033_v11  ;;  %v6346_v4 = vsel %vm6344_vm3, %v11178_v56, %v11164_v2  ;;  %v8066_v56 = vld [vmem:[%s12122_s4 + $0xe8] sm:$0xff] }
 0x508   : > { %8031 = vmatmul.mubr.msk.f32.gmra.mxu0 %vm5168_vm14, %v8026_v45  ;;  %5797 = vmatprep.subr.mxu0 %v11049_v54  ;;  %v11186_v63 = vpop.permute.xlu0 %6326  ;;  %v11310_v23 = vpop.f32.mrf.mxu0  ;;  %v8073_v45 = vld [vmem:[%s12122_s4 + $0xf8] sm:$0xff] }
 0x509   : > { %5798 = vmatpush1.msra.mxu0 %v5740_v27  ;;  %5643 = vmatprep.mubr.f32.mxu1 %v12263_v12 }
 0x50a   : > { %5799 = vmatprep.subr.mxu0 %v11023_v25  ;;  %5833 = vmatprep.mubr.f32.mxu0 %v12263_v12  ;;  %v11200_v54 = vpop.permute.xlu1 %6324  ;;  %v5252_v10 = vpop.f32.mrf.mxu0 }
 0x50b   : > { %5800 = vmatpush1.msra.mxu0 %v5739_v22  ;;  %8039 = vmatmul.mubr.msk.f32.gmra.mxu1 %vm5168_vm14, %v8034_v26  ;;  %5281 = vst.msk [vmem:[#allocation4 + $0x8] sm:$0xff] %vm5280_vm5, %v5252_v10  ;;  %v6345_v47 = vsel %vm6344_vm3, %v11200_v54, %v11186_v63  ;;  %v8074_v22 = vld [vmem:[%s12122_s4 + $0x100] sm:$0xff] }
 0x50c   : > { %v5939_v19 = vpop.permute.xlu0 %5938  ;;  %8047 = vmatmul.mubr.msk.f32.vlgmr.msra.gmra.mxu0 %vm5168_vm14, %v8042_v37  ;;  %5649 = vmatprep.mubr.f32.mxu1 %v12263_v12 }
 0x50d   : > { %v5945_v16 = vsel %vm5940_vm15, %v11106_v0, %v5939_v19  ;;  %5993 = vmatprep.subr.mxu1 %v5939_v19  ;;  %5839 = vmatprep.mubr.f32.mxu0 %v12263_v12  ;;  %v6143_v0 = vsel %vm6142_vm1, %v11097_v3, %v11103_v5  ;;  %v8055_v3 = vld [vmem:[%s12122_s4 + $0xb8] sm:$0xff] }
 0x50e   : > { %5994 = vmatpush1.msra.mxu1 %v5945_v16  ;;  %v11214_v25 = vpop.permute.xlu1 %6542 }
 0x50f   : > { %8040 = vmatmul.mubr.msk.f32.gmra.mxu1 %vm5168_vm14, %v8035_v39  ;;  %5995 = vmatprep.subr.mxu1 %v11095_v55  ;;  %v8082_v39 = vld [vmem:[%s12122_s4 + $0x118] sm:$0xff] }
 0x510   : > { %v11221_v31 = vpop.permute.xlu0 %6540  ;;  %5996 = vmatpush1.msra.mxu1 %v5944_v44  ;;  %8048 = vmatmul.mubr.msk.f32.gmra.mxu0 %vm5168_vm14, %v8043_v20  ;;  %v8075_v44 = vld [vmem:[%s12122_s4 + $0x108] sm:$0xff] }
 0x511   : > { %5997 = vmatprep.subr.mxu1 %v11079_v33  ;;  %5655 = vmatprep.mubr.f32.mxu1 %v12263_v12 }
 0x512   : > { %5998 = vmatpush1.msra.mxu1 %v11083_v14  ;;  %5845 = vmatprep.mubr.f32.mxu0 %v12263_v12  ;;  %v11234_v55 = vpop.permute.xlu1 %6538  ;;  %v8052_v14 = vld [vmem:[%s12122_s4 + $0xa0] sm:$0xff] }
 0x513   : > { %8041 = vmatmul.mubr.msk.f32.gmra.mxu1 %vm5168_vm14, %v8036_v61  ;;  %5999 = vmatprep.subr.mxu1 %v11055_v43  ;;  %v6550_v35 = vsel %vm6546_vm6, %v11234_v55, %v11221_v31 }
 0x514   : > { %v6141_v33 = vpop.permute.xlu0 %6140  ;;  %6000 = vmatpush1.msra.mxu1 %v5942_v49  ;;  %8049 = vmatmul.mubr.msk.f32.gmra.mxu0 %vm5168_vm14, %v8044_v28  ;;  %v8083_v28 = vld [vmem:[%s12122_s4 + $0x120] sm:$0xff] }
 0x515   : > { %v6147_v59 = vsel %vm6142_vm1, %v11117_v21, %v6141_v33  ;;  %6001 = vmatprep.subr.mxu1 %v11029_v8  ;;  %6195 = vmatprep.subr.mxu0 %v6141_v33  ;;  %v6348_v21 = vsel %vm6344_vm3, %v11137_v53, %v11108_v41  ;;  %v8076_v33 = vld [vmem:[%s12122_s4 + $0x110] sm:$0xff] }
 0x516   : > { %6002 = vmatpush1.msra.mxu1 %v5941_v18  ;;  %6035 = vmatprep.mubr.f32.mxu1 %v12263_v12  ;;  %v11252_v43 = vpop.permute.xlu1 %6534  ;;  %v8084_v18 = vld [vmem:[%s12122_s4 + $0x128] sm:$0xff] }
 0x517   : > { %6196 = vmatpush1.msra.mxu0 %v6147_v59  ;;  %8057 = vmatmul.mubr.msk.f32.vlgmr.msra.gmra.mxu1 %vm5168_vm14, %v8052_v14 }
 0x518   : > { %6197 = vmatprep.subr.mxu0 %v11099_v36  ;;  %v11262_v8 = vpop.permute.xlu0 %6536  ;;  %5851 = vmatprep.mubr.f32.mxu0 %v12263_v12  ;;  %v8046_v36 = vld [vmem:[%s12122_s4 + $0x98] sm:$0xff] }
 0x519   : > { %6198 = vmatpush1.msra.mxu0 %v6146_v60  ;;  %6041 = vmatprep.mubr.f32.mxu1 %v12263_v12  ;;  %v6549_v46 = vsel %vm6546_vm6, %v11252_v43, %v11262_v8 }
 0x51a   : > { %8050 = vmatmul.mubr.msk.f32.gmra.mxu0 %vm5168_vm14, %v8045_v42  ;;  %6199 = vmatprep.subr.mxu0 %v11085_v30  ;;  %v11274_v24 = vpop.permute.xlu1 %6530  ;;  %v8054_v30 = vld [vmem:[%s12122_s4 + $0xb0] sm:$0xff] }
 0x51b   : > { %6200 = vmatpush1.msra.mxu0 %v6145_v13  ;;  %8058 = vmatmul.mubr.msk.f32.gmra.mxu1 %vm5168_vm14, %v8053_v52  ;;  %v8085_v52 = vld [vmem:[%s12122_s4 + $0x130] sm:$0xff]  ;;  %v8093_v13 = vld [vmem:[%s12122_s4 + $0x148] sm:$0xff] }
 0x51c   : > { %6201 = vmatprep.subr.mxu0 %v11063_v6  ;;  %v11284_v58 = vpop.permute.xlu0 %6532  ;;  %5857 = vmatprep.mubr.f32.mxu0 %v12263_v12  ;;  %v8062_v6 = vld [vmem:[%s12122_s4 + $0xc8] sm:$0xff] }
 0x51d   : > { %6202 = vmatpush1.msra.mxu0 %v6144_v1  ;;  %6047 = vmatprep.mubr.f32.mxu1 %v12263_v12  ;;  %v8095_v1 = vld [vmem:[%s12122_s4 + $0x158] sm:$0xff] }
 0x51e   : > { %8051 = vmatmul.mubr.msk.f32.gmra.mxu0 %vm5168_vm14, %v8046_v36  ;;  %6203 = vmatprep.subr.mxu0 %v11103_v5  ;;  %v11296_v7 = vpop.permute.xlu1 %6526  ;;  %v8094_v36 = vld [vmem:[%s12122_s4 + $0x150] sm:$0xff] }
 0x51f   : > { %6204 = vmatpush1.msra.mxu0 %v6143_v0  ;;  %8059 = vmatmul.mubr.msk.f32.gmra.mxu1 %vm5168_vm14, %v8054_v30 }
 0x520   : > { %v6343_v9 = vpop.permute.xlu0 %6342  ;;  %6237 = vmatprep.mubr.f32.mxu0 %v12263_v12  ;;  %6053 = vmatprep.mubr.f32.mxu1 %v12263_v12 }
 0x521   : > { %v6349_v5 = vsel %vm6344_vm3, %v11125_v51, %v6343_v9  ;;  %6397 = vmatprep.subr.mxu1 %v6343_v9  ;;  %v8056_v51 = vld [vmem:[%s12122_s4 + $0xc0] sm:$0xff] }
 0x522   : > { %8067 = vmatmul.mubr.msk.f32.vlgmr.msra.gmra.mxu0 %vm5168_vm14, %v8062_v6  ;;  %6398 = vmatpush1.msra.mxu1 %v6349_v5  ;;  %v11320_v17 = vpop.permute.xlu1 %6744 }
 0x523   : > { %8060 = vmatmul.mubr.msk.f32.gmra.mxu1 %vm5168_vm14, %v8055_v3  ;;  %6399 = vmatprep.subr.mxu1 %v11108_v41  ;;  %v11333_v41 = vpop.f32.mrf.mxu0 }
 0x524   : > { %v6529_v34 = vpop.permute.xlu0 %6528  ;;  %6243 = vmatprep.mubr.f32.mxu0 %v12263_v12  ;;  %6400 = vmatpush1.msra.mxu1 %v6348_v21 }
 0x525   : > { %6401 = vmatprep.subr.mxu1 %v11129_v29  ;;  %6059 = vmatprep.mubr.f32.mxu1 %v12263_v12  ;;  %v8064_v29 = vld [vmem:[%s12122_s4 + $0xd8] sm:$0xff]  ;;  %v5258_v15 = vpop.f32.mrf.mxu0  ;;  %v6547_v19 = vsel %vm6546_vm6, %v11296_v7, %v6529_v34  ;;  %v5462_v7 = vld [vmem:[#allocation4 + $0x8] sm:$0xff] }
 0x526   : > { %8068 = vmatmul.mubr.msk.f32.gmra.mxu0 %vm5168_vm14, %v8063_v40  ;;  %6402 = vmatpush1.msra.mxu1 %v6347_v50  ;;  %5283 = vst.msk [vmem:[#allocation4 + $0x18] sm:$0xff] %vm5280_vm5, %v5258_v15  ;;  %v6741_v38 = vpop.permute.xlu1 %6740 }
 0x527   : > { %8061 = vmatmul.mubr.msk.f32.gmra.mxu1 %vm5168_vm14, %v8056_v51  ;;  %6403 = vmatprep.subr.mxu1 %v11164_v2  ;;  %v11355_v57 = vpop.f32.mrf.mxu0 }
 0x528   : > { %v6545_v53 = vpop.permute.xlu0 %6544  ;;  %6249 = vmatprep.mubr.f32.mxu0 %v12263_v12  ;;  %6404 = vmatpush1.msra.mxu1 %v6346_v4 }
 0x529   : > { %v6551_v62 = vsel %vm6546_vm6, %v11214_v25, %v6545_v53  ;;  %6405 = vmatprep.subr.mxu1 %v11186_v63  ;;  %6599 = vmatprep.subr.mxu0 %v6545_v53  ;;  %v5264_v11 = vpop.f32.mrf.mxu0  ;;  %v6548_v63 = vsel %vm6546_vm6, %v11274_v24, %v11284_v58  ;;  %v8086_v24 = vld [vmem:[%s12122_s4 + $0x138] sm:$0xff] }
 0x52a   : > { %8069 = vmatmul.mubr.msk.f32.gmra.mxu0 %vm5168_vm14, %v8064_v29  ;;  %6406 = vmatpush1.msra.mxu1 %v6345_v47  ;;  %5285 = vst.msk [vmem:[#allocation4 + $0x28] sm:$0xff] %vm5280_vm5, %v5264_v11  ;;  %v6737_v37 = vpop.permute.xlu1 %6736 }
 0x52b   : > { %6439 = vmatprep.mubr.f32.mxu1 %v12263_v12  ;;  %6600 = vmatpush1.msra.mxu0 %v6551_v62  ;;  %v11380_v27 = vpop.f32.mrf.mxu0 }
 0x52c   : > { %8077 = vmatmul.mubr.msk.f32.vlgmr.msra.gmra.mxu1 %vm5168_vm14, %v8072_v48  ;;  %6601 = vmatprep.subr.mxu0 %v11221_v31  ;;  %v6743_v2 = vpop.permute.xlu0 %6742 }
 0x52d   : > { %6255 = vmatprep.mubr.f32.mxu0 %v12263_v12  ;;  %6602 = vmatpush1.msra.mxu0 %v6550_v35  ;;  %v5270_v54 = vpop.f32.mrf.mxu0  ;;  %v6751_v55 = vsel %vm1640_vm4, %v6741_v38, %v6743_v2  ;;  %v5464_v5 = vld [vmem:[#allocation4 + $0x18] sm:$0xff] }
 0x52e   : > { %8070 = vmatmul.mubr.msk.f32.gmra.mxu0 %vm5168_vm14, %v8065_v32  ;;  %6603 = vmatprep.subr.mxu0 %v11262_v8  ;;  %5287 = vst.msk [vmem:[#allocation4 + $0x38] sm:$0xff] %vm5280_vm5, %v5270_v54  ;;  %v6733_v61 = vpop.permute.xlu1 %6732  ;;  %v8092_v8 = vld [vmem:[%s12122_s4 + $0x140] sm:$0xff] }
 0x52f   : > { %6445 = vmatprep.mubr.f32.mxu1 %v12263_v12  ;;  %6604 = vmatpush1.msra.mxu0 %v6549_v46  ;;  %v11399_v16 = vpop.f32.mrf.mxu0 }
 0x530   : > { %8078 = vmatmul.mubr.msk.f32.gmra.mxu1 %vm5168_vm14, %v8073_v45  ;;  %6605 = vmatprep.subr.mxu0 %v11284_v58  ;;  %v6739_v26 = vpop.permute.xlu0 %6738  ;;  %v8096_v58 = vld [vmem:[%s12122_s4 + $0x160] sm:$0xff] }
 0x531   : > { %6261 = vmatprep.mubr.f32.mxu0 %v12263_v12  ;;  %6606 = vmatpush1.msra.mxu0 %v6548_v63  ;;  %v5276_v31 = vpop.f32.mrf.mxu0  ;;  %v6750_v14 = vsel %vm1640_vm4, %v6737_v37, %v6739_v26 }
 0x532   : > { %8071 = vmatmul.mubr.msk.f32.gmra.mxu0 %vm5168_vm14, %v8066_v56  ;;  %6607 = vmatprep.subr.mxu0 %v6529_v34  ;;  %5289 = vst.msk [vmem:[#allocation4 + $0x48] sm:$0xff] %vm5280_vm5, %v5276_v31  ;;  %v6729_v43 = vpop.permute.xlu1 %6728  ;;  %v5466_v34 = vld [vmem:[#allocation4 + $0x28] sm:$0xff] }
 0x533   : > { %6451 = vmatprep.mubr.f32.mxu1 %v12263_v12  ;;  %6608 = vmatpush1.msra.mxu0 %v6547_v19 }
 0x534   : > { %8079 = vmatmul.mubr.msk.f32.gmra.mxu1 %vm5168_vm14, %v8074_v22  ;;  %v6747_v20 = vpop.permute.xlu0 %6746  ;;  %6641 = vmatprep.mubr.f32.mxu0 %v12263_v12 }
 0x535   : > { %v6752_v25 = vsel %vm1640_vm4, %v11320_v17, %v6747_v20  ;;  %6800 = vmatprep.subr.mxu1 %v6747_v20  ;;  %6457 = vmatprep.mubr.f32.mxu1 %v12263_v12  ;;  %v5468_v29 = vld [vmem:[#allocation4 + $0x38] sm:$0xff] }
 0x536   : > { %8087 = vmatmul.mubr.msk.f32.vlgmr.msra.gmra.mxu0 %vm5168_vm14, %v8082_v39  ;;  %6801 = vmatpush1.msra.mxu1 %v6752_v25 }
 0x537   : > { %6802 = vmatprep.subr.mxu1 %v6743_v2  ;;  %6647 = vmatprep.mubr.f32.mxu0 %v12263_v12 }
 0x538   : > { %8080 = vmatmul.mubr.msk.f32.gmra.mxu1 %vm5168_vm14, %v8075_v44  ;;  %v6735_v49 = vpop.permute.xlu0 %6734  ;;  %8182 = vmatprep.subr.mxu0 %v12263_v12 }
 0x539   : > { %6803 = vmatpush1.msra.mxu1 %v6751_v55  ;;  %6463 = vmatprep.mubr.f32.mxu1 %v12263_v12  ;;  %v6749_v59 = vsel %vm1640_vm4, %v6733_v61, %v6735_v49  ;;  %v5470_v11 = vld [vmem:[#allocation4 + $0x48] sm:$0xff] }
 0x53a   : > { %8088 = vmatmul.mubr.msk.f32.gmra.mxu0 %vm5168_vm14, %v8083_v28  ;;  %6804 = vmatprep.subr.mxu1 %v6739_v26 }
 0x53b   : > { %6805 = vmatpush1.msra.mxu1 %v6750_v14  ;;  %6653 = vmatprep.mubr.f32.mxu0 %v12263_v12 }
 0x53c   : > { %8081 = vmatmul.mubr.msk.f32.gmra.mxu1 %vm5168_vm14, %v8076_v33  ;;  %6806 = vmatprep.subr.mxu1 %v6735_v49  ;;  %v6731_v42 = vpop.permute.xlu0 %6730 }
 0x53d   : > { %v6748_v60 = vsel %vm1640_vm4, %v6729_v43, %v6731_v42  ;;  %6807 = vmatpush1.msra.mxu1 %v6749_v59  ;;  %6842 = vmatprep.mubr.f32.mxu1 %v12263_v12  ;;  %vm7084_vm4 = vcmask 1046528  }
 0x53e   : > { %8089 = vmatmul.mubr.msk.f32.gmra.mxu0 %vm5168_vm14, %v8084_v18  ;;  %6808 = vmatprep.subr.mxu1 %v6731_v42 }
 0x53f   : > { %6809 = vmatpush1.msra.mxu1 %v6748_v60  ;;  %6659 = vmatprep.mubr.f32.mxu0 %v12263_v12 }
 0x540   : > { %8097 = vmatmul.mubr.msk.f32.vlgmr.msra.gmra.mxu1 %vm5168_vm14, %v8092_v8 }
 0x541   : > { %6848 = vmatprep.mubr.f32.mxu1 %v12263_v12 }
 0x542   : > { %8090 = vmatmul.mubr.msk.f32.gmra.mxu0 %vm5168_vm14, %v8085_v52 }
 0x543   : > { %6665 = vmatprep.mubr.f32.mxu0 %v12263_v12 }
 0x544   : > { %8098 = vmatmul.mubr.msk.f32.gmra.mxu1 %vm5168_vm14, %v8093_v13 }
 0x545   : > { %6854 = vmatprep.mubr.f32.mxu1 %v12263_v12 }
 0x546   : > { %8091 = vmatmul.mubr.msk.f32.gmra.mxu0 %vm5168_vm14, %v8086_v24 }
 0x547   : > { %8214 = vmatprep.mubr.msk.f32.mxu0 %vm8513_vm7, %v12263_v12 }
 0x548   : > { %8099 = vmatmul.mubr.msk.f32.gmra.mxu1 %vm5168_vm14, %v8094_v36 }
 0x549   : > { %6860 = vmatprep.mubr.f32.mxu1 %v12263_v12 }
 0x54c   : > { %8100 = vmatmul.mubr.msk.f32.gmra.mxu1 %vm5168_vm14, %v8095_v1 }
 0x54d   : > { %6866 = vmatprep.mubr.f32.mxu1 %v12263_v12 }
 0x550   : > { %8101 = vmatmul.mubr.msk.f32.gmra.mxu1 %vm5168_vm14, %v8096_v58 }
 0x551   : > { %7301 = vmatprep.mubr.f32.mxu1 %v12263_v12 }
 0x5b7   : > { %v11468_v30 = vpop.f32.mrf.mxu0 }
 0x5b9   : > { %v5434_v0 = vpop.f32.mrf.mxu0 }
 0x5ba   : > { %v5472_v6 = vadd.f32 %v5462_v7, %v5434_v0 }
 0x5bb   : > { %v11470_v9 = vpop.f32.mrf.mxu0 }
 0x5bc   : > { %5482 = vst.msk [vmem:[#allocation4 + $0x8] sm:$0xff] %vm5280_vm5, %v5472_v6 }
 0x5bd   : > { %v5440_v3 = vpop.f32.mrf.mxu0 }
 0x5be   : > { %v5474_v21 = vadd.f32 %v5464_v5, %v5440_v3 }
 0x5bf   : > { %v11473_v40 = vpop.f32.mrf.mxu0 }
 0x5c0   : > { %5484 = vst.msk [vmem:[#allocation4 + $0x18] sm:$0xff] %vm5280_vm5, %v5474_v21 }
 0x5c1   : > { %v5446_v17 = vpop.f32.mrf.mxu0 }
 0x5c2   : > { %v5476_v51 = vadd.f32 %v5466_v34, %v5446_v17 }
 0x5c3   : > { %v11476_v10 = vpop.f32.mrf.mxu0  ;;  %v11478_v50 = vpop.f32.mrf.mxu1  ;;  %v5663_v15 = vld [vmem:[#allocation4 + $0x8] sm:$0xff] }
 0x5c4   : > { %5486 = vst.msk [vmem:[#allocation4 + $0x28] sm:$0xff] %vm5280_vm5, %v5476_v51 }
 0x5c5   : > { %v5452_v4 = vpop.f32.mrf.mxu0  ;;  %v5635_v53 = vpop.f32.mrf.mxu1 }
 0x5c6   : > { %v5478_v47 = vadd.f32 %v5468_v29, %v5452_v4  ;;  %v5673_v62 = vadd.f32 %v5663_v15, %v5635_v53 }
 0x5c7   : > { %v11481_v48 = vpop.f32.mrf.mxu1  ;;  %v5665_v35 = vld [vmem:[#allocation4 + $0x18] sm:$0xff] }
 0x5c8   : > { %5488 = vst.msk [vmem:[#allocation4 + $0x38] sm:$0xff] %vm5280_vm5, %v5478_v47  ;;  %5683 = vst.msk [vmem:[#allocation4 + $0x8] sm:$0xff] %vm5280_vm5, %v5673_v62  ;;  %v11485_v38 = vpop.f32.mrf.mxu0 }
 0x5c9   : > { %v5641_v32 = vpop.f32.mrf.mxu1 }
 0x5ca   : > { %v5458_v2 = vpop.f32.mrf.mxu0  ;;  %v5675_v45 = vadd.f32 %v5665_v35, %v5641_v32 }
 0x5cb   : > { %v5480_v46 = vadd.f32 %v5470_v11, %v5458_v2  ;;  %v11487_v56 = vpop.f32.mrf.mxu1  ;;  %v5667_v37 = vld [vmem:[#allocation4 + $0x28] sm:$0xff] }
 0x5cc   : > { %5685 = vst.msk [vmem:[#allocation4 + $0x18] sm:$0xff] %vm5280_vm5, %v5675_v45  ;;  %v11490_v63 = vpop.f32.mrf.mxu0 }
 0x5cd   : > { %5490 = vst.msk [vmem:[#allocation4 + $0x48] sm:$0xff] %vm5280_vm5, %v5480_v46  ;;  %v5647_v26 = vpop.f32.mrf.mxu1 }
 0x5ce   : > { %v5677_v22 = vadd.f32 %v5667_v37, %v5647_v26  ;;  %v5837_v54 = vpop.f32.mrf.mxu0 }
 0x5cf   : > { %v11493_v19 = vpop.f32.mrf.mxu1  ;;  %v5865_v39 = vld [vmem:[#allocation4 + $0x8] sm:$0xff]  ;;  %v5669_v31 = vld [vmem:[#allocation4 + $0x38] sm:$0xff] }
 0x5d0   : > { %5687 = vst.msk [vmem:[#allocation4 + $0x28] sm:$0xff] %vm5280_vm5, %v5677_v22  ;;  %v5875_v20 = vadd.f32 %v5865_v39, %v5837_v54  ;;  %v11496_v25 = vpop.f32.mrf.mxu0 }
 0x5d1   : > { %v5653_v44 = vpop.f32.mrf.mxu1 }
 0x5d2   : > { %5885 = vst.msk [vmem:[#allocation4 + $0x8] sm:$0xff] %vm5280_vm5, %v5875_v20  ;;  %v5679_v61 = vadd.f32 %v5669_v31, %v5653_v44  ;;  %v5843_v28 = vpop.f32.mrf.mxu0 }
 0x5d3   : > { %v11499_v55 = vpop.f32.mrf.mxu1  ;;  %v5867_v49 = vld [vmem:[#allocation4 + $0x18] sm:$0xff] }
 0x5d4   : > { %5689 = vst.msk [vmem:[#allocation4 + $0x38] sm:$0xff] %vm5280_vm5, %v5679_v61  ;;  %v5877_v33 = vadd.f32 %v5867_v49, %v5843_v28  ;;  %v11502_v14 = vpop.f32.mrf.mxu0  ;;  %v5671_v59 = vld [vmem:[#allocation4 + $0x48] sm:$0xff] }
 0x5d5   : > { %v5659_v18 = vpop.f32.mrf.mxu1 }
 0x5d6   : > { %5887 = vst.msk [vmem:[#allocation4 + $0x18] sm:$0xff] %vm5280_vm5, %v5877_v33  ;;  %v5681_v43 = vadd.f32 %v5671_v59, %v5659_v18  ;;  %v5849_v42 = vpop.f32.mrf.mxu0 }
 0x5d7   : > { %v5869_v60 = vld [vmem:[#allocation4 + $0x28] sm:$0xff]  ;;  %v11505_v8 = vpop.f32.mrf.mxu1 }
 0x5d8   : > { %5691 = vst.msk [vmem:[#allocation4 + $0x48] sm:$0xff] %vm5280_vm5, %v5681_v43  ;;  %v5879_v52 = vadd.f32 %v5869_v60, %v5849_v42 }
 0x5d9   : > { %v6039_v13 = vpop.f32.mrf.mxu1  ;;  %v6067_v24 = vld [vmem:[#allocation4 + $0x8] sm:$0xff] }
 0x5da   : > { %5889 = vst.msk [vmem:[#allocation4 + $0x28] sm:$0xff] %vm5280_vm5, %v5879_v52  ;;  %v11509_v36 = vpop.f32.mrf.mxu0  ;;  %v6077_v1 = vadd.f32 %v6067_v24, %v6039_v13 }
 0x5db   : > { %v5871_v58 = vld [vmem:[#allocation4 + $0x38] sm:$0xff]  ;;  %v11511_v0 = vpop.f32.mrf.mxu1 }
 0x5dc   : > { %6087 = vst.msk [vmem:[#allocation4 + $0x8] sm:$0xff] %vm5280_vm5, %v6077_v1  ;;  %v5855_v7 = vpop.f32.mrf.mxu0 }
 0x5dd   : > { %v5881_v6 = vadd.f32 %v5871_v58, %v5855_v7  ;;  %v6045_v3 = vpop.f32.mrf.mxu1  ;;  %v6069_v5 = vld [vmem:[#allocation4 + $0x18] sm:$0xff] }
 0x5de   : > { %v11514_v21 = vpop.f32.mrf.mxu0  ;;  %v6079_v17 = vadd.f32 %v6069_v5, %v6045_v3  ;;  %v5471_v5 = vadd.f32 %v11468_v30, %v11310_v23 }
 0x5df   : > { %5891 = vst.msk [vmem:[#allocation4 + $0x38] sm:$0xff] %vm5280_vm5, %v5881_v6  ;;  %v5873_v34 = vld [vmem:[#allocation4 + $0x48] sm:$0xff]  ;;  %v11517_v51 = vpop.f32.mrf.mxu1 }
 0x5e0   : > { %6089 = vst.msk [vmem:[#allocation4 + $0x18] sm:$0xff] %vm5280_vm5, %v6079_v17  ;;  %v5861_v4 = vpop.f32.mrf.mxu0 }
 0x5e1   : > { %v5883_v29 = vadd.f32 %v5873_v34, %v5861_v4  ;;  %v6051_v53 = vpop.f32.mrf.mxu1  ;;  %v6071_v15 = vld [vmem:[#allocation4 + $0x28] sm:$0xff] }
 0x5e2   : > { %v6081_v47 = vadd.f32 %v6071_v15, %v6051_v53  ;;  %v11520_v62 = vpop.f32.mrf.mxu0  ;;  %v5672_v53 = vadd.f32 %v11478_v50, %v5471_v5 }
 0x5e3   : > { %5893 = vst.msk [vmem:[#allocation4 + $0x48] sm:$0xff] %vm5280_vm5, %v5883_v29  ;;  %v11523_v32 = vpop.f32.mrf.mxu1  ;;  %v6269_v35 = vld [vmem:[#allocation4 + $0x8] sm:$0xff] }
 0x5e4   : > { %6091 = vst.msk [vmem:[#allocation4 + $0x28] sm:$0xff] %vm5280_vm5, %v6081_v47  ;;  %v6241_v2 = vpop.f32.mrf.mxu0  ;;  %v5874_v23 = vadd.f32 %v11490_v63, %v5672_v53 }
 0x5e5   : > { %v6279_v11 = vadd.f32 %v6269_v35, %v6241_v2  ;;  %v6057_v45 = vpop.f32.mrf.mxu1 }
 0x5e6   : > { %v6073_v46 = vld [vmem:[#allocation4 + $0x38] sm:$0xff]  ;;  %v11526_v26 = vpop.f32.mrf.mxu0 }
 0x5e7   : > { %6289 = vst.msk [vmem:[#allocation4 + $0x8] sm:$0xff] %vm5280_vm5, %v6279_v11  ;;  %v6083_v37 = vadd.f32 %v6073_v46, %v6057_v45  ;;  %v11529_v22 = vpop.f32.mrf.mxu1  ;;  %v6271_v54 = vld [vmem:[#allocation4 + $0x18] sm:$0xff]  ;;  %v5473_v11 = vadd.f32 %v11470_v9, %v11333_v41  ;;  %v5475_v41 = vadd.f32 %v11473_v40, %v11355_v57  ;;  %v5477_v57 = vadd.f32 %v11476_v10, %v11380_v27 }
 0x5e8   : > { %v6247_v39 = vpop.f32.mrf.mxu0 }
 0x5e9   : > { %6093 = vst.msk [vmem:[#allocation4 + $0x38] sm:$0xff] %vm5280_vm5, %v6083_v37  ;;  %v6281_v20 = vadd.f32 %v6271_v54, %v6247_v39  ;;  %v6063_v44 = vpop.f32.mrf.mxu1  ;;  %v5674_v50 = vadd.f32 %v11481_v48, %v5473_v11  ;;  %v6076_v54 = vadd.f32 %v11505_v8, %v5874_v23 }
 0x5ea   : > { %v6075_v31 = vld [vmem:[#allocation4 + $0x48] sm:$0xff]  ;;  %v11532_v61 = vpop.f32.mrf.mxu0 }
 0x5eb   : > { %6291 = vst.msk [vmem:[#allocation4 + $0x18] sm:$0xff] %vm5280_vm5, %v6281_v20  ;;  %v6085_v28 = vadd.f32 %v6075_v31, %v6063_v44  ;;  %v6273_v49 = vld [vmem:[#allocation4 + $0x28] sm:$0xff]  ;;  %v5876_v9 = vadd.f32 %v11496_v25, %v5674_v50  ;;  %v6278_v63 = vadd.f32 %v11520_v62, %v6076_v54 }
 0x5ec   : > { %v6253_v33 = vpop.f32.mrf.mxu0  ;;  %v6441_v18 = vpop.f32.mrf.mxu1 }
 0x5ed   : > { %6095 = vst.msk [vmem:[#allocation4 + $0x48] sm:$0xff] %vm5280_vm5, %v6085_v28  ;;  %v6283_v59 = vadd.f32 %v6273_v49, %v6253_v33  ;;  %v5676_v33 = vadd.f32 %v11487_v56, %v5475_v41 }
 0x5ee   : > { %v11536_v43 = vpop.f32.mrf.mxu0  ;;  %v6443_v42 = vpop.f32.mrf.mxu1  ;;  %v6471_v60 = vld [vmem:[#allocation4 + $0x8] sm:$0xff] }
 0x5ef   : > { %6293 = vst.msk [vmem:[#allocation4 + $0x28] sm:$0xff] %vm5280_vm5, %v6283_v59  ;;  %v6481_v52 = vadd.f32 %v6471_v60, %v6443_v42  ;;  %v6078_v59 = vadd.f32 %v11511_v0, %v5876_v9  ;;  %v6480_v42 = vadd.f32 %v6441_v18, %v6278_v63  ;;  %v5678_v0 = vadd.f32 %v11493_v19, %v5477_v57 }
 0x5f0   : > { %v6259_v13 = vpop.f32.mrf.mxu0  ;;  %v6275_v24 = vld [vmem:[#allocation4 + $0x38] sm:$0xff]  ;;  %v6447_v1 = vpop.f32.mrf.mxu1 }
 0x5f1   : > { %6491 = vst.msk [vmem:[#allocation4 + $0x8] sm:$0xff] %vm5280_vm5, %v6481_v52  ;;  %v6285_v58 = vadd.f32 %v6275_v24, %v6259_v13  ;;  %v5878_v52 = vadd.f32 %v11502_v14, %v5676_v33  ;;  %v6280_v13 = vadd.f32 %v11526_v26, %v6078_v59  ;;  %v5479_v14 = vadd.f32 %v11485_v38, %v11399_v16 }
 0x5f2   : > { %v11540_v7 = vpop.f32.mrf.mxu0  ;;  %v6449_v6 = vpop.f32.mrf.mxu1  ;;  %v6473_v3 = vld [vmem:[#allocation4 + $0x18] sm:$0xff] }
 0x5f3   : > { %6295 = vst.msk [vmem:[#allocation4 + $0x38] sm:$0xff] %vm5280_vm5, %v6285_v58  ;;  %v6483_v17 = vadd.f32 %v6473_v3, %v6449_v6  ;;  %v6080_v3 = vadd.f32 %v11517_v51, %v5878_v52  ;;  %v6482_v5 = vadd.f32 %v6447_v1, %v6280_v13  ;;  %v5680_v1 = vadd.f32 %v11499_v55, %v5479_v14  ;;  %v7038_v13 = vld [vmem:[%s12124_s6 + $0x78] sm:$0x7f]  ;;  %v7028_v14 = vld [vmem:[%s12124_s6 + $0x28] sm:$0xff] }
 0x5f4   : > { %v6265_v34 = vpop.f32.mrf.mxu0  ;;  %v6277_v4 = vld [vmem:[#allocation4 + $0x48] sm:$0xff]  ;;  %v11545_v29 = vpop.f32.mrf.mxu1  ;;  %8183 = vmatpush3.msk.msra.mxu0 %vm7084_vm4, %v7038_v13 }
 0x5f5   : > { %6493 = vst.msk [vmem:[#allocation4 + $0x18] sm:$0xff] %vm5280_vm5, %v6483_v17  ;;  %v6287_v15 = vadd.f32 %v6277_v4, %v6265_v34  ;;  %v5880_v4 = vadd.f32 %v11509_v36, %v5678_v0  ;;  %v6282_v19 = vadd.f32 %v11532_v61, %v6080_v3  ;;  %8184 = vmatprep.subr.mxu0 %v12263_v12  ;;  %v7035_v0 = vld [vmem:[%s12124_s6 + $0x60] sm:$0xff] }
 0x5f6   : > { %v6455_v47 = vpop.f32.mrf.mxu1  ;;  %v6475_v35 = vld [vmem:[#allocation4 + $0x28] sm:$0xff]  ;;  %v6643_v2 = vpop.f32.mrf.mxu0  ;;  %v7031_v3 = vld [vmem:[%s12124_s6 + $0x40] sm:$0xff] }
 0x5f7   : > { %6297 = vst.msk [vmem:[#allocation4 + $0x48] sm:$0xff] %vm5280_vm5, %v6287_v15  ;;  %v6485_v30 = vadd.f32 %v6475_v35, %v6455_v47  ;;  %v6682_v24 = vadd.f32 %v6643_v2, %v6480_v42  ;;  %v6082_v16 = vadd.f32 %v11523_v32, %v5880_v4  ;;  %v6484_v38 = vadd.f32 %v11545_v29, %v6282_v19  ;;  %v7024_v19 = vld [vmem:[%s12124_s6 + $0x8] sm:$0xff] }
 0x5f8   : > { %v11553_v45 = vpop.f32.mrf.mxu1  ;;  %v6645_v46 = vpop.f32.mrf.mxu0  ;;  %v6673_v37 = vld [vmem:[#allocation4 + $0x8] sm:$0xff] }
 0x5f9   : > { %6495 = vst.msk [vmem:[#allocation4 + $0x28] sm:$0xff] %vm5280_vm5, %v6485_v30  ;;  %v6683_v39 = vadd.f32 %v6673_v37, %v6645_v46  ;;  %v5882_v30 = vadd.f32 %v11514_v21, %v5680_v1  ;;  %v6284_v46 = vadd.f32 %v11536_v43, %v6082_v16 }
 0x5fa   : > { %v6461_v20 = vpop.f32.mrf.mxu1  ;;  %v6477_v44 = vld [vmem:[#allocation4 + $0x38] sm:$0xff]  ;;  %v6649_v31 = vpop.f32.mrf.mxu0 }
 0x5fb   : > { %6693 = vst.msk [vmem:[#allocation4 + $0x8] sm:$0xff] %vm5280_vm5, %v6683_v39  ;;  %v6487_v28 = vadd.f32 %v6477_v44, %v6461_v20  ;;  %v6684_v53 = vadd.f32 %v6649_v31, %v6482_v5  ;;  %v6084_v54 = vadd.f32 %v11529_v22, %v5882_v30  ;;  %v6486_v39 = vadd.f32 %v11553_v45, %v6284_v46  ;;  %v7030_v5 = vld [vmem:[%s12124_s6 + $0x38] sm:$0xff] }
 0x5fc   : > { %v11563_v49 = vpop.f32.mrf.mxu1  ;;  %v6651_v48 = vpop.f32.mrf.mxu0  ;;  %v6675_v8 = vld [vmem:[#allocation4 + $0x18] sm:$0xff] }
 0x5fd   : > { %6497 = vst.msk [vmem:[#allocation4 + $0x38] sm:$0xff] %vm5280_vm5, %v6487_v28  ;;  %v6685_v60 = vadd.f32 %v6675_v8, %v6651_v48  ;;  %v6286_v31 = vadd.f32 %v11540_v7, %v6084_v54 }
 0x5fe   : > { %v6467_v40 = vpop.f32.mrf.mxu1  ;;  %v6479_v25 = vld [vmem:[#allocation4 + $0x48] sm:$0xff]  ;;  %v6655_v62 = vpop.f32.mrf.mxu0 }
 0x5ff   : > { %6695 = vst.msk [vmem:[#allocation4 + $0x18] sm:$0xff] %vm5280_vm5, %v6685_v60  ;;  %v6489_v56 = vadd.f32 %v6479_v25, %v6467_v40  ;;  %v6686_v55 = vadd.f32 %v6655_v62, %v6484_v38  ;;  %v6488_v45 = vadd.f32 %v11563_v49, %v6286_v31 }
 0x600   : > { %v6657_v18 = vpop.f32.mrf.mxu0  ;;  %v6677_v58 = vld [vmem:[#allocation4 + $0x28] sm:$0xff]  ;;  %v6844_v6 = vpop.f32.mrf.mxu1 }
 0x601   : > { %6499 = vst.msk [vmem:[#allocation4 + $0x48] sm:$0xff] %vm5280_vm5, %v6489_v56  ;;  %v6687_v27 = vadd.f32 %v6677_v58, %v6657_v18  ;;  %v11576_v10 = vadd.f32 %v6844_v6, %v6682_v24  ;;  %v7037_v24 = vld [vmem:[%s12124_s6 + $0x70] sm:$0xff]  ;;  %v7036_v56 = vld [vmem:[%s12124_s6 + $0x68] sm:$0xff]  ;;  %v7034_v18 = vld [vmem:[%s12124_s6 + $0x58] sm:$0xff] }
 0x602   : > { %v6661_v26 = vpop.f32.mrf.mxu0  ;;  %v6846_v17 = vpop.f32.mrf.mxu1  ;;  %v6874_v34 = vld [vmem:[#allocation4 + $0x8] sm:$0xff]  ;;  %8185 = vmatpush3.msra.mxu0 %v7037_v24  ;;  %v7033_v58 = vld [vmem:[%s12124_s6 + $0x50] sm:$0xff] }
 0x603   : > { %6697 = vst.msk [vmem:[#allocation4 + $0x28] sm:$0xff] %vm5280_vm5, %v6687_v27  ;;  %v6884_v51 = vadd.f32 %v6874_v34, %v6846_v17  ;;  %6913 = vrot.lane.b32.xlu1 %v11576_v10, %s12264_s0  ;;  %v6688_v41 = vadd.f32 %v6661_v26, %v6486_v39  ;;  %8186 = vmatprep.subr.mxu0 %v12263_v12  ;;  %v7032_v6 = vld [vmem:[%s12124_s6 + $0x48] sm:$0xff]  ;;  %v7029_v27 = vld [vmem:[%s12124_s6 + $0x30] sm:$0xff]  ;;  %v7027_v26 = vld [vmem:[%s12124_s6 + $0x20] sm:$0xff] }
 0x604   : > { %v6663_v15 = vpop.f32.mrf.mxu0  ;;  %v6679_v47 = vld [vmem:[#allocation4 + $0x38] sm:$0xff]  ;;  %v6850_v35 = vpop.f32.mrf.mxu1  ;;  %8187 = vmatpush3.msra.mxu0 %v7036_v56  ;;  %v7025_v34 = vld [vmem:[%s12124_s6 + $0x10] sm:$0xff] }
 0x605   : > { %6894 = vst.msk [vmem:[#allocation4 + $0x8] sm:$0xff] %vm5280_vm5, %v6884_v51  ;;  %v6689_v36 = vadd.f32 %v6679_v47, %v6663_v15  ;;  %v11589_v61 = vadd.f32 %v6850_v35, %v6684_v53  ;;  %8188 = vmatprep.subr.mxu0 %v12263_v12  ;;  %v7026_v17 = vld [vmem:[%s12124_s6 + $0x18] sm:$0xff]  ;;  %v7023_v53 = vld [vmem:[%s12124_s6] sm:$0xff] }
 0x606   : > { %v6667_v2 = vpop.f32.mrf.mxu0  ;;  %v6852_v11 = vpop.f32.mrf.mxu1  ;;  %v6876_v23 = vld [vmem:[#allocation4 + $0x18] sm:$0xff]  ;;  %8189 = vmatpush3.msra.mxu0 %v7035_v0 }
 0x607   : > { %6699 = vst.msk [vmem:[#allocation4 + $0x38] sm:$0xff] %vm5280_vm5, %v6689_v36  ;;  %v6886_v37 = vadd.f32 %v6876_v23, %v6852_v11  ;;  %6915 = vrot.lane.b32.xlu1 %v11589_v61, %s12264_s0  ;;  %v6690_v8 = vadd.f32 %v6667_v2, %v6488_v45  ;;  %8190 = vmatprep.subr.mxu0 %v12263_v12  ;;  %v7043_v45 = vld [vmem:[%s12123_s5 + $0x20] sm:$0xff] }
 0x608   : > { %v6669_v32 = vpop.f32.mrf.mxu0  ;;  %v6681_v29 = vld [vmem:[#allocation4 + $0x48] sm:$0xff]  ;;  %v6856_v50 = vpop.f32.mrf.mxu1  ;;  %8191 = vmatpush3.msra.mxu0 %v7034_v18 }
 0x609   : > { %6896 = vst.msk [vmem:[#allocation4 + $0x18] sm:$0xff] %vm5280_vm5, %v6886_v37  ;;  %v6691_v20 = vadd.f32 %v6681_v29, %v6669_v32  ;;  %v11599_v21 = vadd.f32 %v6856_v50, %v6686_v55  ;;  %8192 = vmatprep.subr.mxu0 %v12263_v12 }
 0x60a   : > { %v6858_v43 = vpop.f32.mrf.mxu1  ;;  %v6878_v44 = vld [vmem:[#allocation4 + $0x28] sm:$0xff]  ;;  %8193 = vmatpush3.msra.mxu0 %v7033_v58 }
 0x60b   : > { %6701 = vst.msk [vmem:[#allocation4 + $0x48] sm:$0xff] %vm5280_vm5, %v6691_v20  ;;  %v6888_v9 = vadd.f32 %v6878_v44, %v6858_v43  ;;  %6917 = vrot.lane.b32.xlu1 %v11599_v21, %s12264_s0  ;;  %8194 = vmatprep.subr.mxu0 %v12263_v12 }
 0x60c   : > { %v6862_v63 = vpop.f32.mrf.mxu1  ;;  %v11605_v22 = vld [vmem:[#allocation4 + $0x8] sm:$0xff]  ;;  %8195 = vmatpush3.msra.mxu0 %v7032_v6 }
 0x60d   : > { %6898 = vst.msk [vmem:[#allocation4 + $0x28] sm:$0xff] %vm5280_vm5, %v6888_v9  ;;  %v11609_v28 = vadd.f32 %v6862_v63, %v6688_v41  ;;  %6943 = vrot.lane.b32.xlu0 %v11605_v22, %s12264_s0  ;;  %8196 = vmatprep.subr.mxu0 %v12263_v12  ;;  %v7040_v41 = vld [vmem:[%s12123_s5 + $0x8] sm:$0xff]  ;;  %v7039_v9 = vld [vmem:[%s12123_s5] sm:$0xff]  ;;  %v7042_v63 = vld [vmem:[%s12123_s5 + $0x18] sm:$0xff] }
 0x60e   : > { %v6864_v7 = vpop.f32.mrf.mxu1  ;;  %v6880_v48 = vld [vmem:[#allocation4 + $0x38] sm:$0xff]  ;;  %8197 = vmatpush3.msra.mxu0 %v7031_v3 }
 0x60f   : > { %v6890_v33 = vadd.f32 %v6880_v48, %v6864_v7  ;;  %6919 = vrot.lane.b32.xlu1 %v11609_v28, %s12264_s0  ;;  %8198 = vmatprep.subr.mxu0 %v12263_v12 }
 0x610   : > { %v6868_v59 = vpop.f32.mrf.mxu1  ;;  %v11615_v42 = vld [vmem:[#allocation4 + $0x18] sm:$0xff]  ;;  %8199 = vmatpush3.msra.mxu0 %v7030_v5 }
 0x611   : > { %6900 = vst.msk [vmem:[#allocation4 + $0x38] sm:$0xff] %vm5280_vm5, %v6890_v33  ;;  %v11618_v49 = vadd.f32 %v6868_v59, %v6690_v8  ;;  %6945 = vrot.lane.b32.xlu0 %v11615_v42, %s12264_s0  ;;  %8200 = vmatprep.subr.mxu0 %v12263_v12 }
 0x612   : > { %v6870_v60 = vpop.f32.mrf.mxu1  ;;  %v6882_v57 = vld [vmem:[#allocation4 + $0x48] sm:$0xff]  ;;  %8201 = vmatpush3.msra.mxu0 %v7029_v27 }
 0x613   : > { %v6892_v40 = vadd.f32 %v6882_v57, %v6870_v60  ;;  %6921 = vrot.lane.b32.xlu1 %v11618_v49, %s12264_s0  ;;  %8202 = vmatprep.subr.mxu0 %v12263_v12  ;;  %v7207_v27 = vld [vmem:[%s12125_s7 + $0x68] sm:$0x1] }
 0x614   : > { %v11624_v25 = vld [vmem:[#allocation4 + $0x28] sm:$0xff]  ;;  %8203 = vmatpush3.msra.mxu0 %v7028_v14  ;;  %8108 = vmatprep.subr.msk.mxu1 %vm4840_vm12, %v7207_v27  ;;  %v7520_v27 = vld [vmem:[%s12127_s9 + $0x38] sm:$0xff] }
 0x615   : > { %6902 = vst.msk [vmem:[#allocation4 + $0x48] sm:$0xff] %vm5280_vm5, %v6892_v40  ;;  %6947 = vrot.lane.b32.xlu0 %v11624_v25, %s12264_s0  ;;  %8204 = vmatprep.subr.mxu0 %v12263_v12  ;;  %v7203_v14 = vld [vmem:[%s12125_s7 + $0x48] sm:$0xff] }
 0x616   : > { %8205 = vmatpush3.msra.mxu0 %v7027_v26  ;;  %v7202_v26 = vld [vmem:[%s12125_s7 + $0x40] sm:$0xff] }
 0x617   : > { %8206 = vmatprep.subr.mxu0 %v12263_v12 }
 0x618   : > { %v11629_v62 = vld [vmem:[#allocation4 + $0x38] sm:$0xff]  ;;  %8207 = vmatpush3.msra.mxu0 %v7026_v17  ;;  %v7199_v17 = vld [vmem:[%s12125_s7 + $0x28] sm:$0xff] }
 0x619   : > { %6949 = vrot.lane.b32.xlu0 %v11629_v62, %s12264_s0  ;;  %8208 = vmatprep.subr.mxu0 %v12263_v12 }
 0x61a   : > { %8209 = vmatpush3.msra.mxu0 %v7025_v34  ;;  %v7198_v34 = vld [vmem:[%s12125_s7 + $0x20] sm:$0xff] }
 0x61b   : > { %8210 = vmatprep.subr.mxu0 %v12263_v12 }
 0x61c   : > { %v11633_v52 = vld [vmem:[#allocation4 + $0x48] sm:$0xff]  ;;  %8211 = vmatpush3.msra.mxu0 %v7024_v19  ;;  %v7194_v19 = vld [vmem:[%s12125_s7] sm:$0xff] }
 0x61d   : > { %6951 = vrot.lane.b32.xlu0 %v11633_v52, %s12264_s0  ;;  %8212 = vmatprep.subr.mxu0 %v12263_v12  ;;  %s7709_s0 = scalar_lea.sflag [#allocation7], %s377_s14 }
 0x61e   : > { %8213 = vmatpush3.msra.mxu0 %v7023_v53  ;;  %v7209_v53 = vld [vmem:[%s12125_s7 + $0x78] sm:$0x1] }
 0x675   : > { %v6914_v4 = vpop.permute.xlu1 %6913 }
 0x676   : > { %v6928_v48 = vmax.f32 %v11576_v10, %v6914_v4 }
 0x679   : > { %v6916_v51 = vpop.permute.xlu1 %6915 }
 0x67a   : > { %v6929_v60 = vmax.f32 %v11589_v61, %v6916_v51 }
 0x67d   : > { %v6918_v38 = vpop.permute.xlu1 %6917 }
 0x67f   : > { %v6944_v1 = vpop.permute.xlu0 %6943 }
 0x680   : > { %v6953_v15 = vsel %vm770_vm2, %v6914_v4, %v6944_v1  ;;  %v6969_v47 = vmax.f32 %v11605_v22, %v6944_v1  ;;  %v7041_v22 = vld [vmem:[%s12123_s5 + $0x10] sm:$0xff]  ;;  %v7195_v4 = vld [vmem:[%s12125_s7 + $0x8] sm:$0xff] }
 0x681   : > { %v6968_v35 = vmax.f32 %v11576_v10, %v6953_v15  ;;  %v6920_v37 = vpop.permute.xlu1 %6919 }
 0x682   : > { %6990 = vrot.lane.b32.xlu0 %v6969_v47, %s8508_s22  ;;  %v6931_v56 = vmax.f32 %v11609_v28, %v6920_v37 }
 0x683   : > { %v6946_v16 = vpop.permute.xlu0 %6945  ;;  %6988 = vrot.lane.b32.xlu1 %v6968_v35, %s8508_s22 }
 0x684   : > { %v6954_v36 = vsel %vm770_vm2, %v6916_v51, %v6946_v16  ;;  %v6971_v2 = vmax.f32 %v11615_v42, %v6946_v16 }
 0x685   : > { %v6970_v11 = vmax.f32 %v11589_v61, %v6954_v36  ;;  %v6922_v39 = vpop.permute.xlu1 %6921 }
 0x686   : > { %6994 = vrot.lane.b32.xlu0 %v6971_v2, %s8508_s22  ;;  %v6932_v6 = vmax.f32 %v11618_v49, %v6922_v39 }
 0x687   : > { %v6948_v23 = vpop.permute.xlu0 %6947  ;;  %6992 = vrot.lane.b32.xlu1 %v6970_v11, %s8508_s22 }
 0x688   : > { %v6955_v30 = vsel %vm770_vm2, %v6918_v38, %v6948_v23  ;;  %v6973_v46 = vmax.f32 %v11624_v25, %v6948_v23 }
 0x689   : > { %v6972_v55 = vmax.f32 %v11599_v21, %v6955_v30 }
 0x68a   : > { %6998 = vrot.lane.b32.xlu0 %v6973_v46, %s8508_s22 }
 0x68b   : > { %v6950_v32 = vpop.permute.xlu0 %6949  ;;  %6996 = vrot.lane.b32.xlu1 %v6972_v55, %s8508_s22 }
 0x68c   : > { %v6956_v29 = vsel %vm770_vm2, %v6920_v37, %v6950_v32  ;;  %v6975_v50 = vmax.f32 %v11629_v62, %v6950_v32  ;;  %v7208_v32 = vld [vmem:[%s12125_s7 + $0x70] sm:$0x1] }
 0x68d   : > { %v6974_v54 = vmax.f32 %v11609_v28, %v6956_v29 }
 0x68e   : > { %7002 = vrot.lane.b32.xlu0 %v6975_v50, %s8508_s22 }
 0x68f   : > { %7000 = vrot.lane.b32.xlu1 %v6974_v54, %s8508_s22  ;;  %v6952_v20 = vpop.permute.xlu0 %6951 }
 0x690   : > { %v6957_v43 = vsel %vm770_vm2, %v6922_v39, %v6952_v20  ;;  %v6977_v44 = vmax.f32 %v11633_v52, %v6952_v20  ;;  %v6930_v52 = vmax.f32 %v11599_v21, %v6918_v38  ;;  %v7205_v39 = vld [vmem:[%s12125_s7 + $0x58] sm:$0xff] }
 0x691   : > { %v6976_v31 = vmax.f32 %v11618_v49, %v6957_v43  ;;  %v7206_v49 = vld [vmem:[%s12125_s7 + $0x60] sm:$0x1]  ;;  %v7204_v43 = vld [vmem:[%s12125_s7 + $0x50] sm:$0xff] }
 0x692   : > { %7006 = vrot.lane.b32.xlu0 %v6977_v44, %s8508_s22  ;;  %8109 = vmatpush1.msk.msra.mxu1 %vm4840_vm12, %v7206_v49  ;;  %v7535_v49 = vld [vmem:[%s12127_s9 + $0xb0] sm:$0xff] }
 0x693   : > { %7004 = vrot.lane.b32.xlu1 %v6976_v31, %s8508_s22  ;;  %7263 = vmatprep.subr.mxu1 %v7203_v14  ;;  %v7201_v31 = vld [vmem:[%s12125_s7 + $0x38] sm:$0xff]  ;;  %s8442_s22 = scalar_lea.vmem %s8441_s16, 32 }
 0x694   : > { %7264 = vmatpush1.msra.mxu1 %v7202_v26  ;;  %v7560_v14 = vld [vmem:[%s12127_s9 + $0x178] sm:$0xff]  ;;  %v7519_v26 = vld [vmem:[%s12127_s9 + $0x30] sm:$0xff]  ;;  %p8444_p1 = scmp.lt.s32.totalorder %s8442_s22, %s8436_s29 }
 0x695   : > { %7265 = vmatprep.subr.mxu1 %v7199_v17  ;;  %v7534_v17 = vld [vmem:[%s12127_s9 + $0xa8] sm:$0xff] }
 0x696   : > { %7051 = vperm.xlu0 %8408, %v7040_v41   ;;  %7266 = vmatpush1.msra.mxu1 %v7198_v34  ;;  %v7559_v34 = vld [vmem:[%s12127_s9 + $0x170] sm:$0xff]  ;;  %p8445_p2 = por %p8444_p1, %p8443_p0 }
 0x697   : > { %7046 = vperm.xlu1 %8407, %v7039_v9   ;;  %7267 = vmatprep.subr.mxu1 %v7195_v4  ;;  %v7200_v9 = vld [vmem:[%s12125_s7 + $0x30] sm:$0xff]  ;;  %v7518_v4 = vld [vmem:[%s12127_s9 + $0x28] sm:$0xff] }
 0x698   : > { %7268 = vmatpush1.msra.mxu1 %v7194_v19  ;;  %v7533_v19 = vld [vmem:[%s12127_s9 + $0xa0] sm:$0xff]  ;;  %p8446_p3 = pnand %p8445_p2, %p8439_p13 }
 0x699   : > { %8115 = vmatprep.subr.msk.mxu1 %vm4840_vm12, %v7209_v53  ;;  %v7558_v53 = vld [vmem:[%s12127_s9 + $0x168] sm:$0xff] }
 0x69a   : > { %7061 = vperm.xlu0 %8408, %v7042_v63  }
 0x69b   : > { %7056 = vperm.xlu1 %8407, %v7041_v22  }
 0x69f   : > { %7066 = vperm.xlu1 %8407, %v7043_v45  }
 0x6f4   : > { %v6991_v7 = vpop.permute.xlu0 %6990 }
 0x6f5   : > { %v6989_v8 = vpop.permute.xlu1 %6988 }
 0x6f6   : > { %v7008_v33 = vsel %vm5738_vm0, %v6989_v8, %v6991_v7  ;;  %v7197_v7 = vld [vmem:[%s12125_s7 + $0x18] sm:$0xff]  ;;  %v7196_v8 = vld [vmem:[%s12125_s7 + $0x10] sm:$0xff] }
 0x6f7   : > { %v7018_v59 = vmax.f32 %v6928_v48, %v7008_v33 }
 0x6f8   : > { %v6995_v42 = vpop.permute.xlu0 %6994 }
 0x6f9   : > { %v6993_v57 = vpop.permute.xlu1 %6992  ;;  %8215 = vmatmul.mubr.msk.f32.vlgmr.msra.gmra.mxu0 %vm770_vm2, %v7018_v59 }
 0x6fa   : > { %v7009_v40 = vsel %vm5738_vm0, %v6993_v57, %v6995_v42  ;;  %8217 = vmatprep.mubr.msk.f32.mxu0 %vm8513_vm7, %v12263_v12 }
 0x6fb   : > { %v7019_v25 = vmax.f32 %v6929_v60, %v7009_v40  ;;  %v7544_v40 = vld [vmem:[%s12127_s9 + $0xf8] sm:$0xff] }
 0x6fc   : > { %v6999_v62 = vpop.permute.xlu0 %6998  ;;  %8147 = vmatprep.subr.mxu0 %v7544_v40 }
 0x6fd   : > { %v6997_v10 = vpop.permute.xlu1 %6996  ;;  %8218 = vmatmul.mubr.msk.f32.gmra.mxu0 %vm770_vm2, %v7019_v25  ;;  %v7528_v25 = vld [vmem:[%s12127_s9 + $0x78] sm:$0xff] }
 0x6fe   : > { %v7010_v13 = vsel %vm5738_vm0, %v6997_v10, %v6999_v62  ;;  %8220 = vmatprep.mubr.msk.f32.mxu0 %vm8513_vm7, %v12263_v12  ;;  %8148 = vmatpush3.msra.mxu0 %v7528_v25  ;;  %v7543_v62 = vld [vmem:[%s12127_s9 + $0xf0] sm:$0xff]  ;;  %v7542_v10 = vld [vmem:[%s12127_s9 + $0xe8] sm:$0xff] }
 0x6ff   : > { %v7020_v61 = vmax.f32 %v6930_v52, %v7010_v13  ;;  %8149 = vmatprep.subr.mxu0 %v7543_v62  ;;  %v7527_v52 = vld [vmem:[%s12127_s9 + $0x70] sm:$0xff]  ;;  %v7526_v13 = vld [vmem:[%s12127_s9 + $0x68] sm:$0xff] }
 0x700   : > { %v7003_v24 = vpop.permute.xlu0 %7002  ;;  %8150 = vmatpush3.msra.mxu0 %v7527_v52 }
 0x701   : > { %v7001_v0 = vpop.permute.xlu1 %7000  ;;  %8221 = vmatmul.mubr.msk.f32.gmra.mxu0 %vm770_vm2, %v7020_v61  ;;  %8151 = vmatprep.subr.mxu0 %v7542_v10  ;;  %v7541_v61 = vld [vmem:[%s12127_s9 + $0xe0] sm:$0xff]  ;;  %v7440_v10 = vld [vmem:[%s12126_s8 + $0x68] sm:$0xff] }
 0x702   : > { %v7011_v18 = vsel %vm5738_vm0, %v7001_v0, %v7003_v24  ;;  %8223 = vmatprep.mubr.msk.f32.mxu0 %vm8513_vm7, %v12263_v12  ;;  %8152 = vmatpush3.msra.mxu0 %v7526_v13  ;;  %v7525_v24 = vld [vmem:[%s12127_s9 + $0x60] sm:$0xff]  ;;  %v7524_v0 = vld [vmem:[%s12127_s9 + $0x58] sm:$0xff] }
 0x703   : > { %v7021_v21 = vmax.f32 %v6931_v56, %v7011_v18  ;;  %8153 = vmatprep.subr.mxu0 %v7541_v61  ;;  %v7540_v56 = vld [vmem:[%s12127_s9 + $0xd8] sm:$0xff]  ;;  %v7539_v18 = vld [vmem:[%s12127_s9 + $0xd0] sm:$0xff] }
 0x704   : > { %v7007_v58 = vpop.permute.xlu0 %7006  ;;  %8154 = vmatpush3.msra.mxu0 %v7525_v24 }
 0x705   : > { %v7005_v3 = vpop.permute.xlu1 %7004  ;;  %8224 = vmatmul.mubr.msk.f32.gmra.mxu0 %vm770_vm2, %v7021_v21  ;;  %8155 = vmatprep.subr.mxu0 %v7540_v56  ;;  %v7523_v21 = vld [vmem:[%s12127_s9 + $0x50] sm:$0xff] }
 0x706   : > { %v7012_v5 = vsel %vm5738_vm0, %v7005_v3, %v7007_v58  ;;  %8226 = vmatprep.mubr.msk.f32.mxu0 %vm8513_vm7, %v12263_v12  ;;  %8156 = vmatpush3.msra.mxu0 %v7524_v0  ;;  %v7538_v58 = vld [vmem:[%s12127_s9 + $0xc8] sm:$0xff]  ;;  %v7537_v3 = vld [vmem:[%s12127_s9 + $0xc0] sm:$0xff] }
 0x707   : > { %v7022_v28 = vmax.f32 %v6932_v6, %v7012_v5  ;;  %8157 = vmatprep.subr.mxu0 %v7539_v18  ;;  %v7522_v6 = vld [vmem:[%s12127_s9 + $0x48] sm:$0xff]  ;;  %v7521_v5 = vld [vmem:[%s12127_s9 + $0x40] sm:$0xff] }
 0x708   : > { %8158 = vmatpush3.msra.mxu0 %v7523_v21  ;;  %v7443_v18 = vld [vmem:[%s12126_s8 + $0x80] sm:$0xff] }
 0x709   : > { %8227 = vmatmul.mubr.msk.f32.gmra.mxu0 %vm770_vm2, %v7022_v28  ;;  %vm7183_vm2 = vcmask 203776   ;;  %8159 = vmatprep.subr.mxu0 %v7538_v58  ;;  %v7536_v28 = vld [vmem:[%s12127_s9 + $0xb8] sm:$0xff] }
 0x70a   : > { %8160 = vmatpush3.msra.mxu0 %v7522_v6 }
 0x70b   : > { %8161 = vmatprep.subr.mxu0 %v7537_v3 }
 0x70c   : > { %8162 = vmatpush3.msra.mxu0 %v7521_v5  ;;  %v7444_v5 = vld [vmem:[%s12126_s8 + $0x88] sm:$0xff] }
 0x70d   : > { %8163 = vmatprep.subr.mxu0 %v7536_v28 }
 0x70e   : > { %8164 = vmatpush3.msra.mxu0 %v7520_v27 }
 0x70f   : > { %8165 = vmatprep.subr.mxu0 %v7535_v49 }
 0x710   : > { %8166 = vmatpush3.msra.mxu0 %v7519_v26 }
 0x711   : > { %v7052_v16 = vpop.permute.xlu0 %7051  ;;  %8167 = vmatprep.subr.mxu0 %v7534_v17 }
 0x712   : > { %v7047_v51 = vpop.permute.xlu1 %7046  ;;  %8168 = vmatpush3.msra.mxu0 %v7518_v4 }
 0x713   : > { %8169 = vmatprep.subr.mxu0 %v7533_v19 }
 0x715   : > { %v7062_v29 = vpop.permute.xlu0 %7061 }
 0x716   : > { %v7057_v23 = vpop.permute.xlu1 %7056 }
 0x71a   : > { %v7067_v63 = vpop.permute.xlu1 %7066 }
 0x7b9   : > { %v7154_v1 = vpop.f32.mrf.mxu0 }
 0x7ba   : > { %v7155_v15 = vadd.f32 %v7154_v1, %v7047_v51  ;;  %v7517_v51 = vld [vmem:[%s12127_s9 + $0x20] sm:$0xff]  ;;  %v7532_v1 = vld [vmem:[%s12127_s9 + $0x98] sm:$0xff] }
 0x7bb   : > { %v8216_v47 = vpop.f32.mrf.mxu0  ;;  %8170 = vmatpush3.msra.mxu0 %v7517_v51 }
 0x7bc   : > { %v7178_v35 = vmax.f32 %v7155_v15, 0.0  ;;  %v7557_v15 = vld [vmem:[%s12127_s9 + $0x160] sm:$0xff]  ;;  %8171 = vmatprep.subr.mxu0 %v7532_v1  ;;  %v7516_v47 = vld [vmem:[%s12127_s9 + $0x18] sm:$0xff] }
 0x7bd   : > { %v7159_v38 = vpop.f32.mrf.mxu0  ;;  %8172 = vmatpush3.msra.mxu0 %v7516_v47 }
 0x7be   : > { %7184 = vst.msk [vmem:[#allocation5] sm:$0xff] %vm7183_vm2, %v7178_v35  ;;  %v7160_v36 = vadd.f32 %v7159_v38, %v7052_v16  ;;  %v7531_v35 = vld [vmem:[%s12127_s9 + $0x90] sm:$0xff]  ;;  %v7556_v16 = vld [vmem:[%s12127_s9 + $0x158] sm:$0xff] }
 0x7bf   : > { %v8219_v2 = vpop.f32.mrf.mxu0  ;;  %8173 = vmatprep.subr.mxu0 %v7531_v35  ;;  %v7515_v38 = vld [vmem:[%s12127_s9 + $0x10] sm:$0xff] }
 0x7c0   : > { %v7179_v11 = vmax.f32 %v7160_v36, 0.0  ;;  %8174 = vmatpush3.msra.mxu0 %v7515_v38  ;;  %v7530_v36 = vld [vmem:[%s12127_s9 + $0x88] sm:$0xff]  ;;  %v7555_v2 = vld [vmem:[%s12127_s9 + $0x150] sm:$0xff] }
 0x7c1   : > { %v7164_v30 = vpop.f32.mrf.mxu0  ;;  %8175 = vmatprep.subr.mxu0 %v7530_v36  ;;  %v7433_v38 = vld [vmem:[%s12126_s8 + $0x30] sm:$0xff] }
 0x7c2   : > { %7185 = vst.msk [vmem:[#allocation5 + $0x8] sm:$0xff] %vm7183_vm2, %v7179_v11  ;;  %v7165_v46 = vadd.f32 %v7164_v30, %v7057_v23  ;;  %v7514_v11 = vld [vmem:[%s12127_s9 + $0x8] sm:$0xff]  ;;  %v7529_v23 = vld [vmem:[%s12127_s9 + $0x80] sm:$0xff] }
 0x7c3   : > { %v8222_v55 = vpop.f32.mrf.mxu0  ;;  %8176 = vmatpush3.msra.mxu0 %v7514_v11  ;;  %v7554_v30 = vld [vmem:[%s12127_s9 + $0x148] sm:$0xff] }
 0x7c4   : > { %v7180_v37 = vmax.f32 %v7165_v46, 0.0  ;;  %8177 = vmatprep.subr.mxu0 %v7529_v23  ;;  %v7513_v46 = vld [vmem:[%s12127_s9] sm:$0xff] }
 0x7c5   : > { %v7169_v50 = vpop.f32.mrf.mxu0  ;;  %v7189_v54 = vld [vmem:[#allocation5] sm:$0xff]  ;;  %8178 = vmatpush3.msra.mxu0 %v7513_v46  ;;  %v7553_v55 = vld [vmem:[%s12127_s9 + $0x140] sm:$0xff]  ;;  %v7430_v46 = vld [vmem:[%s12126_s8 + $0x18] sm:$0xff] }
 0x7c6   : > { %7186 = vst.msk [vmem:[#allocation5 + $0x10] sm:$0xff] %vm7183_vm2, %v7180_v37  ;;  %v7170_v20 = vadd.f32 %v7169_v50, %v7062_v29  ;;  %8110 = vmatmul.mubr.msk.f32.vlgmr.msra.gmra.mxu1 %vm7183_vm2, %v7189_v54  ;;  %v7552_v37 = vld [vmem:[%s12127_s9 + $0x138] sm:$0xff]  ;;  %v7550_v29 = vld [vmem:[%s12127_s9 + $0x128] sm:$0xff]  ;;  %v7549_v50 = vld [vmem:[%s12127_s9 + $0x120] sm:$0xff] }
 0x7c7   : > { %v8225_v44 = vpop.f32.mrf.mxu0  ;;  %7307 = vmatprep.mubr.f32.mxu1 %v12263_v12  ;;  %8116 = vmatpush1.msk.msra.mxu1 %vm4840_vm12, %v7208_v32  ;;  %v7551_v32 = vld [vmem:[%s12127_s9 + $0x130] sm:$0xff] }
 0x7c8   : > { %v7181_v41 = vmax.f32 %v7170_v20, 0.0  ;;  %7358 = vmatprep.subr.mxu1 %v7205_v39  ;;  %v7547_v39 = vld [vmem:[%s12127_s9 + $0x110] sm:$0xff]  ;;  %v7546_v20 = vld [vmem:[%s12127_s9 + $0x108] sm:$0xff] }
 0x7c9   : > { %v7174_v22 = vpop.f32.mrf.mxu0  ;;  %v7190_v45 = vld [vmem:[#allocation5 + $0x8] sm:$0xff]  ;;  %7359 = vmatpush1.msra.mxu1 %v7204_v43  ;;  %v7545_v43 = vld [vmem:[%s12127_s9 + $0x100] sm:$0xff]  ;;  %v7562_v44 = vld [vmem:[%s12127_s9 + $0x188] sm:$0xff] }
 0x7ca   : > { %7187 = vst.msk [vmem:[#allocation5 + $0x18] sm:$0xff] %vm7183_vm2, %v7181_v41  ;;  %v7175_v48 = vadd.f32 %v7174_v22, %v7067_v63  ;;  %8111 = vmatmul.mubr.msk.f32.gmra.mxu1 %vm7183_vm2, %v7190_v45  ;;  %7360 = vmatprep.subr.mxu1 %v7201_v31  ;;  %v7561_v31 = vld [vmem:[%s12127_s9 + $0x180] sm:$0xff] }
 0x7cb   : > { %v8228_v33 = vpop.f32.mrf.mxu0  ;;  %7313 = vmatprep.mubr.f32.mxu1 %v12263_v12  ;;  %7361 = vmatpush1.msra.mxu1 %v7200_v9  ;;  %v7431_v22 = vld [vmem:[%s12126_s8 + $0x20] sm:$0xff] }
 0x7cc   : > { %v7182_v59 = vmax.f32 %v7175_v48, 0.0  ;;  %7362 = vmatprep.subr.mxu1 %v7197_v7  ;;  %v7427_v7 = vld [vmem:[%s12126_s8] sm:$0xff]  ;;  %v7432_v48 = vld [vmem:[%s12126_s8 + $0x28] sm:$0xff] }
 0x7cd   : > { %v7191_v42 = vld [vmem:[#allocation5 + $0x10] sm:$0xff]  ;;  %7363 = vmatpush1.msra.mxu1 %v7196_v8 }
 0x7ce   : > { %7188 = vst.msk [vmem:[#allocation5 + $0x20] sm:$0xff] %vm7183_vm2, %v7182_v59  ;;  %8112 = vmatmul.mubr.msk.f32.gmra.mxu1 %vm7183_vm2, %v7191_v42  ;;  %7637 = vmatprep.subr.mxu1 %v12263_v12  ;;  %v7428_v59 = vld [vmem:[%s12126_s8 + $0x8] sm:$0xff] }
 0x7cf   : > { %7319 = vmatprep.mubr.f32.mxu1 %v12263_v12 }
 0x7d1   : > { %v7192_v60 = vld [vmem:[#allocation5 + $0x18] sm:$0xff] }
 0x7d2   : > { %8113 = vmatmul.mubr.msk.f32.gmra.mxu1 %vm7183_vm2, %v7192_v60 }
 0x7d3   : > { %7325 = vmatprep.mubr.f32.mxu1 %v12263_v12 }
 0x7d5   : > { %v7193_v57 = vld [vmem:[#allocation5 + $0x20] sm:$0xff] }
 0x7d6   : > { %8114 = vmatmul.mubr.msk.f32.gmra.mxu1 %vm7183_vm2, %v7193_v57 }
 0x7d7   : > { %7396 = vmatprep.mubr.f32.mxu1 %v12263_v12 }
 0x7da   : > { %8117 = vmatmul.mubr.msk.f32.vlgmr.msra.gmra.mxu1 %vm7183_vm2, %v7189_v54  ;;  %v7548_v54 = vld [vmem:[%s12127_s9 + $0x118] sm:$0xff] }
 0x7db   : > { %7402 = vmatprep.mubr.f32.mxu1 %v12263_v12  ;;  %7638 = vmatpush1.msra.mxu1 %v7560_v14 }
 0x7dc   : > { %7639 = vmatprep.subr.mxu1 %v12263_v12 }
 0x7dd   : > { %7640 = vmatpush1.msra.mxu1 %v7559_v34 }
 0x7de   : > { %8118 = vmatmul.mubr.msk.f32.gmra.mxu1 %vm7183_vm2, %v7190_v45  ;;  %7641 = vmatprep.subr.mxu1 %v12263_v12 }
 0x7df   : > { %7408 = vmatprep.mubr.f32.mxu1 %v12263_v12  ;;  %7642 = vmatpush1.msra.mxu1 %v7558_v53 }
 0x7e0   : > { %7643 = vmatprep.subr.mxu1 %v12263_v12 }
 0x7e1   : > { %7644 = vmatpush1.msra.mxu1 %v7557_v15 }
 0x7e2   : > { %8119 = vmatmul.mubr.msk.f32.gmra.mxu1 %vm7183_vm2, %v7191_v42  ;;  %7645 = vmatprep.subr.mxu1 %v12263_v12 }
 0x7e3   : > { %7414 = vmatprep.mubr.f32.mxu1 %v12263_v12  ;;  %7646 = vmatpush1.msra.mxu1 %v7556_v16 }
 0x7e4   : > { %7647 = vmatprep.subr.mxu1 %v12263_v12 }
 0x7e5   : > { %7648 = vmatpush1.msra.mxu1 %v7555_v2  ;;  %v7434_v2 = vld [vmem:[%s12126_s8 + $0x38] sm:$0xff] }
 0x7e6   : > { %8120 = vmatmul.mubr.msk.f32.gmra.mxu1 %vm7183_vm2, %v7192_v60  ;;  %7649 = vmatprep.subr.mxu1 %v12263_v12  ;;  %v7436_v60 = vld [vmem:[%s12126_s8 + $0x48] sm:$0xff] }
 0x7e7   : > { %7420 = vmatprep.mubr.f32.mxu1 %v12263_v12  ;;  %7650 = vmatpush1.msra.mxu1 %v7554_v30  ;;  %v7429_v30 = vld [vmem:[%s12126_s8 + $0x10] sm:$0xff] }
 0x7e8   : > { %7651 = vmatprep.subr.mxu1 %v12263_v12 }
 0x7e9   : > { %7652 = vmatpush1.msra.mxu1 %v7553_v55 }
 0x7ea   : > { %8121 = vmatmul.mubr.msk.f32.gmra.mxu1 %vm7183_vm2, %v7193_v57  ;;  %7653 = vmatprep.subr.mxu1 %v12263_v12  ;;  %v7439_v57 = vld [vmem:[%s12126_s8 + $0x60] sm:$0xff] }
 0x7eb   : > { %7654 = vmatpush1.msra.mxu1 %v7552_v37  ;;  %v7437_v37 = vld [vmem:[%s12126_s8 + $0x50] sm:$0xff] }
 0x7ec   : > { %7655 = vmatprep.subr.mxu1 %v12263_v12 }
 0x7ed   : > { %7656 = vmatpush1.msra.mxu1 %v7551_v32  ;;  %v7438_v32 = vld [vmem:[%s12126_s8 + $0x58] sm:$0xff] }
 0x7ee   : > { %7657 = vmatprep.subr.mxu1 %v12263_v12 }
 0x7ef   : > { %7658 = vmatpush1.msra.mxu1 %v7550_v29 }
 0x7f0   : > { %7659 = vmatprep.subr.mxu1 %v12263_v12 }
 0x7f1   : > { %7660 = vmatpush1.msra.mxu1 %v7549_v50 }
 0x7f2   : > { %7661 = vmatprep.subr.mxu1 %v12263_v12 }
 0x7f3   : > { %7662 = vmatpush1.msra.mxu1 %v7548_v54 }
 0x7f4   : > { %7663 = vmatprep.subr.mxu1 %v12263_v12 }
 0x7f5   : > { %7664 = vmatpush1.msra.mxu1 %v7547_v39 }
 0x7f6   : > { %7665 = vmatprep.subr.mxu1 %v12263_v12 }
 0x7f7   : > { %7666 = vmatpush1.msra.mxu1 %v7546_v20 }
 0x7f8   : > { %7667 = vmatprep.subr.mxu1 %v12263_v12 }
 0x7f9   : > { %7668 = vmatpush1.msra.mxu1 %v7545_v43 }
 0x7fa   : > { %7697 = vmatprep.subr.mxu1 %v12263_v12 }
 0x7fb   : > { %7698 = vmatpush2.msra.mxu1 %v7562_v44  ;;  %v7441_v44 = vld [vmem:[%s12126_s8 + $0x70] sm:$0xff] }
 0x7fc   : > { %7699 = vmatprep.subr.mxu1 %v12263_v12  ;;  %v7435_v12 = vld [vmem:[%s12126_s8 + $0x40] sm:$0xff] }
 0x7fd   : > { %7700 = vmatpush2.msra.mxu1 %v7561_v31 }
 0x886   : > { %v7303_v41 = vpop.f32.mrf.mxu1 }
 0x887   : > { %v7447_v40 = vmul.f32 %v7427_v7, %v7303_v41 }
 0x888   : > { %v7305_v9 = vpop.f32.mrf.mxu1 }
 0x889   : > { %v7448_v13 = vmul.f32 %v7428_v59, %v7305_v9 }
 0x88a   : > { %v7309_v63 = vpop.f32.mrf.mxu1 }
 0x88b   : > { %v7451_v33 = vmul.f32 %v7431_v22, %v7309_v63 }
 0x88c   : > { %v7311_v45 = vpop.f32.mrf.mxu1 }
 0x88d   : > { %v7452_v25 = vmul.f32 %v7432_v48, %v7311_v45  ;;  %v7467_v61 = vadd.f32 %v7451_v33, %v7447_v40  ;;  %v7442_v45 = vld [vmem:[%s12126_s8 + $0x78] sm:$0xff] }
 0x88e   : > { %v7315_v8 = vpop.f32.mrf.mxu1 }
 0x88f   : > { %v7455_v62 = vmul.f32 %v7435_v12, %v7315_v8  ;;  %v7477_v21 = vadd.f32 %v7452_v25, %v7448_v13 }
 0x890   : > { %v7317_v42 = vpop.f32.mrf.mxu1 }
 0x891   : > { %v7456_v24 = vmul.f32 %v7436_v60, %v7317_v42  ;;  %v7468_v58 = vadd.f32 %v7467_v61, %v7455_v62  ;;  %v7445_v42 = vld [vmem:[%s12126_s8 + $0x90] sm:$0xff] }
 0x892   : > { %v7321_v52 = vpop.f32.mrf.mxu1 }
 0x893   : > { %v7459_v56 = vmul.f32 %v7439_v57, %v7321_v52  ;;  %v7478_v28 = vadd.f32 %v7477_v21, %v7456_v24 }
 0x894   : > { %v7323_v0 = vpop.f32.mrf.mxu1 }
 0x895   : > { %v7460_v6 = vmul.f32 %v7440_v10, %v7323_v0  ;;  %v7469_v27 = vadd.f32 %v7468_v58, %v7459_v56  ;;  %v7446_v10 = vld [vmem:[%s12126_s8 + $0x98] sm:$0xff] }
 0x896   : > { %v7327_v3 = vpop.f32.mrf.mxu1 }
 0x897   : > { %v7463_v49 = vmul.f32 %v7443_v18, %v7327_v3  ;;  %v7479_v26 = vadd.f32 %v7478_v28, %v7460_v6 }
 0x898   : > { %v7329_v14 = vpop.f32.mrf.mxu1 }
 0x899   : > { %v7470_v17 = vadd.f32 %v7469_v27, %v7463_v49  ;;  %v7464_v34 = vmul.f32 %v7444_v5, %v7329_v14 }
 0x89a   : > { %v7398_v4 = vpop.f32.mrf.mxu1 }
 0x89b   : > { %v7471_v19 = vrot.slane %v7470_v17, 4  ;;  %v7480_v53 = vadd.f32 %v7479_v26, %v7464_v34  ;;  %v7449_v20 = vmul.f32 %v7429_v30, %v7398_v4 }
 0x89c   : > { %v7400_v51 = vpop.f32.mrf.mxu1 }
 0x89d   : > { %v7472_v1 = vadd.f32 %v7471_v19, %v7470_v17  ;;  %v7481_v15 = vrot.slane %v7480_v53, 4  ;;  %v7450_v31 = vmul.f32 %v7430_v46, %v7400_v51 }
 0x89e   : > { %v7404_v47 = vpop.f32.mrf.mxu1 }
 0x89f   : > { %v7473_v35 = vrot.slane %v7472_v1, 2  ;;  %v7482_v16 = vadd.f32 %v7481_v15, %v7480_v53  ;;  %v7453_v29 = vmul.f32 %v7433_v38, %v7404_v47  ;;  %v7498_v60 = vsel %vm7497_vm8, %v7450_v31, 0.0 }
 0x8a0   : > { %v7406_v36 = vpop.f32.mrf.mxu1 }
 0x8a1   : > { %v7474_v11 = vadd.f32 %v7473_v35, %v7472_v1  ;;  %v7483_v23 = vrot.slane %v7482_v16, 2  ;;  %v7454_v50 = vmul.f32 %v7434_v2, %v7406_v36  ;;  %v7487_v7 = vadd.f32 %v7453_v29, %v7449_v20  ;;  %v7563_v35 = vld [vmem:[%s12128_s10] sm:$0x1] }
 0x8a2   : > { %v7410_v55 = vpop.f32.mrf.mxu1 }
 0x8a3   : > { %v7484_v54 = vadd.f32 %v7483_v23, %v7482_v16  ;;  %v7475_v39 = vrot.slane %v7474_v11, 1  ;;  %v7457_v41 = vmul.f32 %v7437_v37, %v7410_v55  ;;  %v7499_v48 = vsel %vm7497_vm8, %v7454_v50, 0.0 }
 0x8a4   : > { %v7412_v43 = vpop.f32.mrf.mxu1  ;;  %v7500_v62 = vadd.f32 %v7499_v48, %v7498_v60 }
 0x8a5   : > { %v7458_v9 = vmul.f32 %v7438_v32, %v7412_v43  ;;  %v7485_v63 = vrot.slane %v7484_v54, 1  ;;  %v7476_v33 = vadd.f32 %v7475_v39, %v7474_v11  ;;  %v7488_v57 = vadd.f32 %v7487_v7, %v7457_v41 }
 0x8a6   : > { %v7416_v22 = vpop.f32.mrf.mxu1 }
 0x8a7   : > { %v7461_v8 = vmul.f32 %v7441_v44, %v7416_v22  ;;  %v7486_v12 = vadd.f32 %v7485_v63, %v7484_v54  ;;  %v7501_v40 = vsel %vm7497_vm8, %v7458_v9, 0.0 }
 0x8a8   : > { %v7418_v59 = vpop.f32.mrf.mxu1  ;;  %v7502_v56 = vadd.f32 %v7501_v40, %v7500_v62 }
 0x8a9   : > { %v7462_v25 = vmul.f32 %v7442_v45, %v7418_v59  ;;  %7631 = vmatprep.mubr.f32.mxu0 %v7486_v12  ;;  %v7489_v13 = vadd.f32 %v7488_v57, %v7461_v8 }
 0x8aa   : > { %v7422_v52 = vpop.f32.mrf.mxu1  ;;  %7632 = vmatmul.mubr.f32.vlgmr.msra.gmra.mxu0 %v7476_v33 }
 0x8ab   : > { %v7503_v61 = vsel %vm7497_vm8, %v7462_v25, 0.0  ;;  %v7465_v24 = vmul.f32 %v7445_v42, %v7422_v52 }
 0x8ac   : > { %v7424_v0 = vpop.f32.mrf.mxu1  ;;  %v7504_v58 = vadd.f32 %v7503_v61, %v7502_v56 }
 0x8ad   : > { %v7490_v18 = vadd.f32 %v7489_v13, %v7465_v24  ;;  %v7466_v21 = vmul.f32 %v7446_v10, %v7424_v0 }
 0x8af   : > { %v7491_v6 = vrot.slane %v7490_v18, 4  ;;  %v7505_v3 = vsel %vm7497_vm8, %v7466_v21, 0.0 }
 0x8b0   : > { %v7506_v5 = vadd.f32 %v7505_v3, %v7504_v58 }
 0x8b1   : > { %v7492_v28 = vadd.f32 %v7491_v6, %v7490_v18 }
 0x8b2   : > { %v7507_v27 = vrot.slane %v7506_v5, 4 }
 0x8b3   : > { %v7493_v49 = vrot.slane %v7492_v28, 2 }
 0x8b4   : > { %v7508_v14 = vadd.f32 %v7507_v27, %v7506_v5 }
 0x8b5   : > { %v7494_v26 = vadd.f32 %v7493_v49, %v7492_v28 }
 0x8b6   : > { %v7509_v17 = vrot.slane %v7508_v14, 2 }
 0x8b7   : > { %v7495_v4 = vrot.slane %v7494_v26, 1 }
 0x8b8   : > { %v7510_v34 = vadd.f32 %v7509_v17, %v7508_v14 }
 0x8b9   : > { %v7496_v51 = vadd.f32 %v7495_v4, %v7494_v26 }
 0x8ba   : > { %v7511_v19 = vrot.slane %v7510_v34, 1 }
 0x8bc   : > { %v7512_v53 = vadd.f32 %v7511_v19, %v7510_v34 }
 0x8be   : > { %8122 = vmatprep.mubr.msk.f32.mxu1 %vm7497_vm8, %v7512_v53 }
 0x8bf   : > { %7702 = vmatmul.mubr.f32.vlgmr.msra.gmra.mxu1 %v7496_v51 }
 0x96a   : > { %v8179_v1 = vpop.f32.mrf.mxu0 }
 0x96c   : > { %v8180_v15 = vpop.f32.mrf.mxu0 }
 0x96d   : > { %v8181_v47 = vadd.f32 %v8180_v15, %v8179_v1 }
 0x96f   : > { %v7634_v16 = vadd.f32 %v8181_v47, %v7563_v35 }
 0x97f   : > { %v7703_v38 = vpop.f32.mrf.mxu1 }
 0x980   : > { %v7704_v36 = vadd.f32 %v7703_v38, %v7634_v16 }
 0x981   : > { %v7705_v2 = vpop.f32.mrf.mxu1 }
 0x982   : > { %7707 = vst [vmem:[%s378_s25] sm:$0x1] %v7704_v36 }
 0x983   : > { %8449 = shalt.err (!%p8446_p3)
}
 0x984   : > { %s8450_s15 = scalar_lea.hbm %s12083_s30, 16  ;;  %s8454_s13 = scalar_lea.hbm %s12129_s11, 32 }
 0x985   : > { %p8451_p4 = scmp.ne.s32.totalorder %s12083_s30, %s8450_s15  ;;  %p8455_p9 = scmp.lt.s32.totalorder %s12083_s30, %s12129_s11 }
 0x986   : > { %p8456_p10 = scmp.lt.s32.totalorder %s8454_s13, %s8450_s15 }
 0x987   : > { %p8452_p7 = pnand %p8451_p4, %p8613_p5 }
 0x988   : > { %p8457_p11 = por %p8456_p10, %p8455_p9 }
 0x989   : > { %p8453_p8 = pneg %p8452_p7 }
 0x98b   : > { %p8458_p12 = pnand %p8457_p11, %p8453_p8 }
 0x98d   : > { %8461 = shalt.err (!%p8458_p12)
}
 0x98e   : > { %8232 = dma.vmem_to_hbm [thread:$0]  (%p8613_p5), %s7722_s12, 16, %s12083_s30, %s7709_s0  }
 0x98f PF: > { %p8238_p13 = scmp.ge.s32.totalorder %s8496_s20, 2  ;;  %s7733_s29 = sand.u32 1, %s8484_s17  }
 0x990   : > { %s7734_s16 = scalar_lea.sflag [#allocation7], %s7733_s29 }
 0x991   : > { %p8235_p0 = pnand %p8238_p13, %p8617_p6 }
 0x993   : > { %p8236_p1 = pneg %p8235_p0 }
 0x995   : > { %8479 = dma.done.wait (%p8236_p1), %s7734_s16, 16  }
 0x996   : > { %8481 = vsyncadd (%p8236_p1), %s7734_s16, 4294967280  ;;  %p21_p2 = scmp.ge.s32.totalorder %s8600_s23, 4   ;;  %s12266_s17 = smov %s8488_s18 }
 0x997   : > { %s12267_s18 = smov %s8492_s19  ;;  %s12268_s19 = smov %s8611_s26 }
 0x998   : > { %s12269_s20 = smov %s8600_s23  ;;  %23 = sbr.rel (!%p21_p2) target bundleno = 5 (0x5), region = 115 }
 0x99d   :  { %7738 = vsyncpa [#allocation7], 1 }
 0x99e   :  { %7740 = vsyncpa [#allocation7 + $0x1], 1 }

</bundles_post_ra>
